<compile_context>
chip_gen: v5e
topology: v5e:2x2
jax: 0.10.0
libtpu: 0.0.40
codegen_flags: <defaults>
</compile_context>

<pallas_src>
import functools
import math

import jax
import jax.numpy as jnp
from jax.experimental import pallas as pl
from jax.experimental.pallas import tpu as pltpu


LN_EPS = 1e-5

# Order of the per-layer (stacked along leading L axis) parameters, shared between the
# kernel signature and the wrapper call.
LAYER_PARAM_NAMES = (
    'sa_wqkv', 'sa_bqkv', 'sa_wo', 'sa_bo',
    'ca_wq', 'ca_bq', 'ca_wkv', 'ca_bkv', 'ca_wo', 'ca_bo',
    'w1', 'b1', 'w2', 'b2',
    'ln1_g', 'ln1_b', 'ln2_g', 'ln2_b', 'ln3_g', 'ln3_b',
)


# --------------------------------------------------------------------------- #
# In-kernel helpers (traced inside the fused kernel)
# --------------------------------------------------------------------------- #

def _add_layernorm(x, y, gamma, beta):
    """LayerNorm(x + y) over the last dim (PyTorch LayerNorm, eps=1e-5), f32 math."""
    z = x + y
    mu = jnp.mean(z, axis=-1, keepdims=True)
    ms = jnp.mean(z * z, axis=-1, keepdims=True)
    var = jnp.maximum(ms - mu * mu, 0.0)           # one-pass variance
    return (z - mu) * jax.lax.rsqrt(var + LN_EPS) * gamma + beta


def _mha(q, k, v, mask, bblk, nhead):
    """Multi-head attention with heads*batch folded into one einsum batch axis.

    q: (bblk*Tq, E) f32, k/v: (bblk*Tk, E) f32, mask: (Tq, Tk) additive f32.
    Matmul operands are cast to bf16 (f32 accumulation); softmax stays in f32 and its
    denominator uses the EUP approximate reciprocal.
    """
    Mq, E = q.shape
    Mk = k.shape[0]
    Tq = Mq // bblk
    Tk = Mk // bblk
    Hd = E // nhead
    scale = 1.0 / math.sqrt(Hd)

    def split(a, t):
        # (bblk*t, E) -> (nhead*bblk, t, Hd): static lane slice per head (safe lowering)
        # + free leading-dim reshape + leading-axis concat.
        heads = [a[:, h * Hd:(h + 1) * Hd].reshape(bblk, t, Hd) for h in range(nhead)]
        return jnp.concatenate(heads, axis=0)

    qh = split((q * scale).astype(jnp.bfloat16), Tq)   # (H*B, Tq, Hd)
    kh = split(k.astype(jnp.bfloat16), Tk)             # (H*B, Tk, Hd)
    vh = split(v.astype(jnp.bfloat16), Tk)             # (H*B, Tk, Hd)

    s = jnp.einsum('gqd,gkd->gqk', qh, kh, preferred_element_type=jnp.float32)
    s = s + mask[None, :, :]                           # mask shared by all heads/batch
    s = s - jnp.max(s, axis=-1, keepdims=True)
    p = jnp.exp(s)
    p = p * pl.reciprocal(jnp.sum(p, axis=-1, keepdims=True), approx=True)
    o = jnp.einsum('gqk,gkd->gqd', p.astype(jnp.bfloat16), vh,
                   preferred_element_type=jnp.float32)  # (H*B, Tq, Hd) f32

    outs = [o[h * bblk:(h + 1) * bblk].reshape(bblk * Tq, Hd) for h in range(nhead)]
    return jnp.concatenate(outs, axis=-1)              # (bblk*Tq, E) f32


# --------------------------------------------------------------------------- #
# Fused decoder-stack + generator kernel
#   grid = (batch_blocks, num_layers); activation carried in VMEM scratch across layers.
# --------------------------------------------------------------------------- #

def fused_decoder_kernel(
        tgt_ref, mem_ref, tmask_ref, mmask_ref,
        sa_wqkv_ref, sa_bqkv_ref, sa_wo_ref, sa_bo_ref,
        ca_wq_ref, ca_bq_ref, ca_wkv_ref, ca_bkv_ref, ca_wo_ref, ca_bo_ref,
        w1_ref, b1_ref, w2_ref, b2_ref,
        ln1_g_ref, ln1_b_ref, ln2_g_ref, ln2_b_ref, ln3_g_ref, ln3_b_ref,
        gen_w_ref, gen_b_ref,
        out_ref,
        x_sc,
        *, nhead, bblk):
    l = pl.program_id(1)
    n_layers = pl.num_programs(1)

    Bb, T, E = tgt_ref.shape
    S = mem_ref.shape[1]
    M = Bb * T

    # Initialize the resident activation from the target embedding at the first layer.
    @pl.when(l == 0)
    def _():
        x_sc[...] = tgt_ref[...].astype(jnp.float32).reshape(M, E)

    x = x_sc[...]                                                  # (M, E) f32
    m = mem_ref[...].astype(jnp.bfloat16).reshape(Bb * S, E)       # (Bb*S, E) bf16
    tmask = tmask_ref[...]                                         # (T, T) f32 additive
    mmask = mmask_ref[...]                                         # (T, S) f32 additive

    # ---- self-attention block (fused QKV projection) ----
    qkv = jnp.dot(x.astype(jnp.bfloat16), sa_wqkv_ref[0],
                  preferred_element_type=jnp.float32) + sa_bqkv_ref[0]
    sa = _mha(qkv[:, :E], qkv[:, E:2 * E], qkv[:, 2 * E:], tmask, bblk, nhead)
    sa = jnp.dot(sa.astype(jnp.bfloat16), sa_wo_ref[0],
                 preferred_element_type=jnp.float32) + sa_bo_ref[0]
    x = _add_layernorm(x, sa, ln1_g_ref[0], ln1_b_ref[0])

    # ---- cross-attention block (fused KV projection on memory) ----
    qc = jnp.dot(x.astype(jnp.bfloat16), ca_wq_ref[0],
                 preferred_element_type=jnp.float32) + ca_bq_ref[0]
    kv = jnp.dot(m, ca_wkv_ref[0],
                 preferred_element_type=jnp.float32) + ca_bkv_ref[0]
    ca = _mha(qc, kv[:, :E], kv[:, E:], mmask, bblk, nhead)
    ca = jnp.dot(ca.astype(jnp.bfloat16), ca_wo_ref[0],
                 preferred_element_type=jnp.float32) + ca_bo_ref[0]
    x = _add_layernorm(x, ca, ln2_g_ref[0], ln2_b_ref[0])

    # ---- feed-forward block (ReLU) ----
    h = jnp.dot(x.astype(jnp.bfloat16), w1_ref[0],
                preferred_element_type=jnp.float32) + b1_ref[0]
    h = jnp.maximum(h, 0.0)
    ff = jnp.dot(h.astype(jnp.bfloat16), w2_ref[0],
                 preferred_element_type=jnp.float32) + b2_ref[0]
    x = _add_layernorm(x, ff, ln3_g_ref[0], ln3_b_ref[0])

    x_sc[...] = x                                                  # carry to next layer

    # ---- generator Linear on the final layer's output (lane-dense padded width) ----
    @pl.when(l == n_layers - 1)
    def _():
        logits = jnp.dot(x.astype(jnp.bfloat16), gen_w_ref[...],
                         preferred_element_type=jnp.float32) + gen_b_ref[...]
        out_ref[...] = logits.reshape(Bb, T, -1).astype(out_ref.dtype)


# --------------------------------------------------------------------------- #
# Wrapper
# --------------------------------------------------------------------------- #

def _vmem_limit_bytes():
    """Generation-aware scoped-VMEM limit (≈75% of physical, capped at 96 MiB)."""
    try:
        info = pltpu.get_tpu_info()
        cap = getattr(info, 'vmem_capacity_bytes', None) or (128 * 1024 * 1024)
    except Exception:
        cap = 64 * 1024 * 1024
    return max(32 * 1024 * 1024, min(int(cap * 3 // 4), 96 * 1024 * 1024))


def _pick_bblk(B, T, target_rows=256):
    """Largest divisor of B such that bblk*T stays near the MXU row target."""
    best = 1
    for c in range(1, B + 1):
        if B % c == 0 and c * T <= target_rows:
            best = c
    return best


def transformer_decoder_forward(tgt, memory, params, tgt_mask=None,
                                memory_mask=None, *, nhead=4, num_class=None):
    """tgt: (T, B, E), memory: (S, B, E) (PyTorch seq-first). Returns (T, B, C)."""
    T, B, E = tgt.shape
    S = memory.shape[0]
    x = jnp.transpose(tgt, (1, 0, 2))        # (B, T, E)
    mem = jnp.transpose(memory, (1, 0, 2))   # (B, S, E)

    if tgt_mask is None:
        tgt_mask = jnp.zeros((T, T), jnp.float32)
    elif tgt_mask.ndim > 2:                  # mirrors `tgt_mask = tgt_mask[0, :, :]`
        tgt_mask = tgt_mask[0]
    if memory_mask is None:
        memory_mask = jnp.zeros((T, S), jnp.float32)
    tgt_mask = tgt_mask.astype(jnp.float32)
    memory_mask = memory_mask.astype(jnp.float32)

    num_layers = params['sa_wqkv'].shape[0]
    Cp = params['gen_w'].shape[1]
    bblk = _pick_bblk(B, T)
    n_bblocks = B // bblk

    def batch_spec(t, e):                    # activation blocks: index follows b only
        return pl.BlockSpec((bblk, t, e), lambda b, l: (b, 0, 0))

    def layer_spec(w):                       # stacked layer weights: index follows l
        zeros = (0,) * (w.ndim - 1)
        return pl.BlockSpec((1,) + w.shape[1:], lambda b, l, _z=zeros: (l,) + _z)

    def const_spec(a):                       # resident constants (masks, generator)
        zeros = (0,) * a.ndim
        return pl.BlockSpec(a.shape, lambda b, l, _z=zeros: _z)

    layer_weights = [params[n] for n in LAYER_PARAM_NAMES]

    in_specs = ([batch_spec(T, E), batch_spec(S, E),
                 const_spec(tgt_mask), const_spec(memory_mask)]
                + [layer_spec(w) for w in layer_weights]
                + [const_spec(params['gen_w']), const_spec(params['gen_b'])])

    out = pl.pallas_call(
        functools.partial(fused_decoder_kernel, nhead=nhead, bblk=bblk),
        out_shape=jax.ShapeDtypeStruct((B, T, Cp), jnp.float32),
        grid=(n_bblocks, num_layers),
        in_specs=in_specs,
        out_specs=pl.BlockSpec((bblk, T, Cp), lambda b, l: (b, 0, 0)),
        scratch_shapes=[pltpu.VMEM((bblk * T, E), jnp.float32)],
        compiler_params=pltpu.CompilerParams(
            dimension_semantics=("parallel", "arbitrary"),
            vmem_limit_bytes=_vmem_limit_bytes(),
        ),
    )(x, mem, tgt_mask, memory_mask, *layer_weights,
      params['gen_w'], params['gen_b'])

    if num_class is not None:
        out = out[..., :num_class]
    return jnp.transpose(out, (1, 0, 2))     # (T, B, C)


# --------------------------------------------------------------------------- #
# Deterministic parameter init
#   Weights: kernel-ready (in, out) layout, stacked along a leading layer axis, bf16.
#   Biases / LN params: f32, shaped (L, 1, width) so a [0]-read broadcasts over rows.
#   PyTorch mapping: in_proj_weight (3E,E).T -> sa_wqkv; cross in_proj_weight[:E].T ->
#   ca_wq, [E:].T -> ca_wkv; every Linear weight (out,in).T -> (in,out).
# --------------------------------------------------------------------------- #

def init_params(key, num_layers, hidden_size, dim_feedforward, num_class):
    E, F, L = hidden_size, dim_feedforward, num_layers
    Cp = ((num_class + 127) // 128) * 128    # lane-dense generator output width

    def dense(k, shape, scale=0.05):
        return (scale * jax.random.normal(k, shape)).astype(jnp.bfloat16)

    keys = jax.random.split(key, 8)
    params = {
        'sa_wqkv': dense(keys[0], (L, E, 3 * E)),
        'sa_bqkv': jnp.zeros((L, 1, 3 * E), jnp.float32),
        'sa_wo':   dense(keys[1], (L, E, E)),
        'sa_bo':   jnp.zeros((L, 1, E), jnp.float32),
        'ca_wq':   dense(keys[2], (L, E, E)),
        'ca_bq':   jnp.zeros((L, 1, E), jnp.float32),
        'ca_wkv':  dense(keys[3], (L, E, 2 * E)),
        'ca_bkv':  jnp.zeros((L, 1, 2 * E), jnp.float32),
        'ca_wo':   dense(keys[4], (L, E, E)),
        'ca_bo':   jnp.zeros((L, 1, E), jnp.float32),
        'w1':      dense(keys[5], (L, E, F)),
        'b1':      jnp.zeros((L, 1, F), jnp.float32),
        'w2':      dense(keys[6], (L, F, E)),
        'b2':      jnp.zeros((L, 1, E), jnp.float32),
        'ln1_g': jnp.ones((L, 1, E), jnp.float32), 'ln1_b': jnp.zeros((L, 1, E), jnp.float32),
        'ln2_g': jnp.ones((L, 1, E), jnp.float32), 'ln2_b': jnp.zeros((L, 1, E), jnp.float32),
        'ln3_g': jnp.ones((L, 1, E), jnp.float32), 'ln3_b': jnp.zeros((L, 1, E), jnp.float32),
    }
    gen_w = jnp.zeros((E, Cp), jnp.float32).at[:, :num_class].set(
        0.05 * jax.random.normal(keys[7], (E, num_class)))
    params['gen_w'] = gen_w.astype(jnp.bfloat16)
    params['gen_b'] = jnp.zeros((1, Cp), jnp.float32)
    return params


# --------------------------------------------------------------------------- #
# Example run
# --------------------------------------------------------------------------- #

if __name__ == "__main__":
    T, S, B = 8, 12, 2
    hidden_size, nhead, dim_feedforward = 32, 4, 64
    num_layers, num_class = 2, 10

    key = jax.random.PRNGKey(0)
    k_tgt, k_mem, k_par = jax.random.split(key, 3)

    tgt = jax.random.normal(k_tgt, (T, B, hidden_size), jnp.float32)      # (T, B, E)
    memory = jax.random.normal(k_mem, (S, B, hidden_size), jnp.float32)   # (S, B, E)
    params = init_params(k_par, num_layers, hidden_size, dim_feedforward, num_class)

    # Causal (square subsequent) additive target mask; -1e9 stands in for -inf.
    causal = jnp.triu(jnp.ones((T, T), jnp.float32), k=1)
    tgt_mask = jnp.where(causal > 0, -1e9, 0.0)

    fwd = jax.jit(functools.partial(transformer_decoder_forward,
                                    nhead=nhead, num_class=num_class))
    out = fwd(tgt, memory, params, tgt_mask)
    out = jax.block_until_ready(out)

    assert out.shape == (T, B, num_class), out.shape
    assert bool(jnp.all(jnp.isfinite(out)))
    print("KERNEL_OK")
</pallas_src>

<mosaic_0001>
module attributes {stable_mosaic.version = 11 : i64} {
  func.func @fused_decoder_kernel(%arg0: i32, %arg1: i32, %arg2: memref<2x8x32xf32, #tpu.memory_space<vmem>>, %arg3: memref<2x12x32xf32, #tpu.memory_space<vmem>>, %arg4: memref<8x8xf32, #tpu.memory_space<vmem>>, %arg5: memref<8x12xf32, #tpu.memory_space<vmem>>, %arg6: memref<1x32x96xbf16, #tpu.memory_space<vmem>>, %arg7: memref<1x1x96xf32, #tpu.memory_space<vmem>>, %arg8: memref<1x32x32xbf16, #tpu.memory_space<vmem>>, %arg9: memref<1x1x32xf32, #tpu.memory_space<vmem>>, %arg10: memref<1x32x32xbf16, #tpu.memory_space<vmem>>, %arg11: memref<1x1x32xf32, #tpu.memory_space<vmem>>, %arg12: memref<1x32x64xbf16, #tpu.memory_space<vmem>>, %arg13: memref<1x1x64xf32, #tpu.memory_space<vmem>>, %arg14: memref<1x32x32xbf16, #tpu.memory_space<vmem>>, %arg15: memref<1x1x32xf32, #tpu.memory_space<vmem>>, %arg16: memref<1x32x64xbf16, #tpu.memory_space<vmem>>, %arg17: memref<1x1x64xf32, #tpu.memory_space<vmem>>, %arg18: memref<1x64x32xbf16, #tpu.memory_space<vmem>>, %arg19: memref<1x1x32xf32, #tpu.memory_space<vmem>>, %arg20: memref<1x1x32xf32, #tpu.memory_space<vmem>>, %arg21: memref<1x1x32xf32, #tpu.memory_space<vmem>>, %arg22: memref<1x1x32xf32, #tpu.memory_space<vmem>>, %arg23: memref<1x1x32xf32, #tpu.memory_space<vmem>>, %arg24: memref<1x1x32xf32, #tpu.memory_space<vmem>>, %arg25: memref<1x1x32xf32, #tpu.memory_space<vmem>>, %arg26: memref<32x128xbf16, #tpu.memory_space<vmem>>, %arg27: memref<1x128xf32, #tpu.memory_space<vmem>>, %arg28: memref<2x8x128xf32, #tpu.memory_space<vmem>>, %arg29: memref<16x32xf32, #tpu.memory_space<vmem>>) attributes {dimension_semantics = [#tpu.dimension_semantics<parallel>, #tpu.dimension_semantics<arbitrary>], iteration_bounds = array<i64: 1, 2>, scalar_prefetch = 0 : i64, scratch_operands = 1 : i64, tpu.core_type = #tpu.core_type<tc>, window_params = [{transform_indices = @transform_0, window_bounds = array<i64: 2, 8, 32>}, {transform_indices = @transform_1, window_bounds = array<i64: 2, 12, 32>}, {pipeline_mode = #tpu.pipeline_mode<synchronous>, transform_indices = @transform_2, window_bounds = array<i64: 8, 8>}, {pipeline_mode = #tpu.pipeline_mode<synchronous>, transform_indices = @transform_3, window_bounds = array<i64: 8, 12>}, {transform_indices = @transform_4, window_bounds = array<i64: 1, 32, 96>}, {transform_indices = @transform_5, window_bounds = array<i64: 1, 1, 96>}, {transform_indices = @transform_6, window_bounds = array<i64: 1, 32, 32>}, {transform_indices = @transform_7, window_bounds = array<i64: 1, 1, 32>}, {transform_indices = @transform_8, window_bounds = array<i64: 1, 32, 32>}, {transform_indices = @transform_9, window_bounds = array<i64: 1, 1, 32>}, {transform_indices = @transform_10, window_bounds = array<i64: 1, 32, 64>}, {transform_indices = @transform_11, window_bounds = array<i64: 1, 1, 64>}, {transform_indices = @transform_12, window_bounds = array<i64: 1, 32, 32>}, {transform_indices = @transform_13, window_bounds = array<i64: 1, 1, 32>}, {transform_indices = @transform_14, window_bounds = array<i64: 1, 32, 64>}, {transform_indices = @transform_15, window_bounds = array<i64: 1, 1, 64>}, {transform_indices = @transform_16, window_bounds = array<i64: 1, 64, 32>}, {transform_indices = @transform_17, window_bounds = array<i64: 1, 1, 32>}, {transform_indices = @transform_18, window_bounds = array<i64: 1, 1, 32>}, {transform_indices = @transform_19, window_bounds = array<i64: 1, 1, 32>}, {transform_indices = @transform_20, window_bounds = array<i64: 1, 1, 32>}, {transform_indices = @transform_21, window_bounds = array<i64: 1, 1, 32>}, {transform_indices = @transform_22, window_bounds = array<i64: 1, 1, 32>}, {transform_indices = @transform_23, window_bounds = array<i64: 1, 1, 32>}, {pipeline_mode = #tpu.pipeline_mode<synchronous>, transform_indices = @transform_24, window_bounds = array<i64: 32, 128>}, {pipeline_mode = #tpu.pipeline_mode<synchronous>, transform_indices = @transform_25, window_bounds = array<i64: 1, 128>}, {transform_indices = @transform_26, window_bounds = array<i64: 2, 8, 128>}]} {
    %c0_i32 = arith.constant 0 : i32
    %0 = arith.cmpi eq, %arg1, %c0_i32 : i32
    %1 = arith.extui %0 : i1 to i32
    %c0_i32_0 = arith.constant 0 : i32
    %2 = arith.cmpi ne, %1, %c0_i32_0 : i32
    scf.if %2 {
      %c0_107 = arith.constant 0 : index
      %c0_108 = arith.constant 0 : index
      %c0_109 = arith.constant 0 : index
      %276 = vector.load %arg2[%c0_107, %c0_108, %c0_109] : memref<2x8x32xf32, #tpu.memory_space<vmem>>, vector<2x8x32xf32>
      %277 = vector.shape_cast %276 : vector<2x8x32xf32> to vector<16x32xf32>
      %c0_110 = arith.constant 0 : index
      %c0_111 = arith.constant 0 : index
      %278 = vector.load %arg29[%c0_110, %c0_111] : memref<16x32xf32, #tpu.memory_space<vmem>>, vector<16x32xf32>
      tpu.vector_store %arg29[%c0_110, %c0_111], %277 {strides = array<i32>} : memref<16x32xf32, #tpu.memory_space<vmem>>, vector<16x32xf32>,
    } else {
    }
    %c0 = arith.constant 0 : index
    %c0_1 = arith.constant 0 : index
    %3 = vector.load %arg29[%c0, %c0_1] : memref<16x32xf32, #tpu.memory_space<vmem>>, vector<16x32xf32>
    %c0_2 = arith.constant 0 : index
    %c0_3 = arith.constant 0 : index
    %c0_4 = arith.constant 0 : index
    %4 = vector.load %arg3[%c0_2, %c0_3, %c0_4] : memref<2x12x32xf32, #tpu.memory_space<vmem>>, vector<2x12x32xf32>
    %5 = arith.truncf %4 : vector<2x12x32xf32> to vector<2x12x32xbf16>
    %6 = vector.shape_cast %5 : vector<2x12x32xbf16> to vector<24x32xbf16>
    %c0_5 = arith.constant 0 : index
    %c0_6 = arith.constant 0 : index
    %7 = vector.load %arg4[%c0_5, %c0_6] : memref<8x8xf32, #tpu.memory_space<vmem>>, vector<8x8xf32>
    %c0_7 = arith.constant 0 : index
    %c0_8 = arith.constant 0 : index
    %8 = vector.load %arg5[%c0_7, %c0_8] : memref<8x12xf32, #tpu.memory_space<vmem>>, vector<8x12xf32>
    %9 = arith.truncf %3 : vector<16x32xf32> to vector<16x32xbf16>
    %c0_9 = arith.constant 0 : index
    %c0_10 = arith.constant 0 : index
    %c0_11 = arith.constant 0 : index
    %10 = vector.load %arg6[%c0_9, %c0_10, %c0_11] : memref<1x32x96xbf16, #tpu.memory_space<vmem>>, vector<1x32x96xbf16>
    %11 = vector.shape_cast %10 : vector<1x32x96xbf16> to vector<32x96xbf16>
    %cst = arith.constant dense<0.000000e+00> : vector<16x96xf32>
    %12 = tpu.matmul %9, %11, %cst {dimension_numbers = #tpu.dot_dimension_numbers<[1], [0], [0], [1], [0, 0, 1, 1], [], []>} : vector<16x32xbf16>, vector<32x96xbf16>, vector<16x96xf32> -> vector<16x96xf32>
    %c0_12 = arith.constant 0 : index
    %c0_13 = arith.constant 0 : index
    %c0_14 = arith.constant 0 : index
    %13 = vector.load %arg7[%c0_12, %c0_13, %c0_14] : memref<1x1x96xf32, #tpu.memory_space<vmem>>, vector<1x1x96xf32>
    %14 = vector.shape_cast %13 : vector<1x1x96xf32> to vector<1x96xf32>
    %15 = vector.broadcast %14 : vector<1x96xf32> to vector<16x96xf32>
    %16 = arith.addf %12, %15 : vector<16x96xf32>
    %17 = vector.extract_strided_slice %16 {offsets = [0, 0], sizes = [16, 32], strides = [1, 1]} : vector<16x96xf32> to vector<16x32xf32>
    %18 = vector.extract_strided_slice %16 {offsets = [0, 32], sizes = [16, 32], strides = [1, 1]} : vector<16x96xf32> to vector<16x32xf32>
    %19 = vector.extract_strided_slice %16 {offsets = [0, 64], sizes = [16, 32], strides = [1, 1]} : vector<16x96xf32> to vector<16x32xf32>
    %cst_15 = arith.constant 0.353553385 : f32
    %20 = vector.broadcast %cst_15 : f32 to vector<16x32xf32>
    %21 = arith.mulf %17, %20 : vector<16x32xf32>
    %22 = arith.truncf %21 : vector<16x32xf32> to vector<16x32xbf16>
    %23 = vector.extract_strided_slice %22 {offsets = [0, 0], sizes = [16, 8], strides = [1, 1]} : vector<16x32xbf16> to vector<16x8xbf16>
    %24 = vector.shape_cast %23 : vector<16x8xbf16> to vector<2x8x8xbf16>
    %25 = vector.extract_strided_slice %22 {offsets = [0, 8], sizes = [16, 8], strides = [1, 1]} : vector<16x32xbf16> to vector<16x8xbf16>
    %26 = vector.shape_cast %25 : vector<16x8xbf16> to vector<2x8x8xbf16>
    %27 = vector.extract_strided_slice %22 {offsets = [0, 16], sizes = [16, 8], strides = [1, 1]} : vector<16x32xbf16> to vector<16x8xbf16>
    %28 = vector.shape_cast %27 : vector<16x8xbf16> to vector<2x8x8xbf16>
    %29 = vector.extract_strided_slice %22 {offsets = [0, 24], sizes = [16, 8], strides = [1, 1]} : vector<16x32xbf16> to vector<16x8xbf16>
    %30 = vector.shape_cast %29 : vector<16x8xbf16> to vector<2x8x8xbf16>
    %31 = tpu.concatenate %24, %26, %28, %30 in 0 : vector<2x8x8xbf16>, vector<2x8x8xbf16>, vector<2x8x8xbf16>, vector<2x8x8xbf16> -> vector<8x8x8xbf16>
    %32 = arith.truncf %18 : vector<16x32xf32> to vector<16x32xbf16>
    %33 = vector.extract_strided_slice %32 {offsets = [0, 0], sizes = [16, 8], strides = [1, 1]} : vector<16x32xbf16> to vector<16x8xbf16>
    %34 = vector.shape_cast %33 : vector<16x8xbf16> to vector<2x8x8xbf16>
    %35 = vector.extract_strided_slice %32 {offsets = [0, 8], sizes = [16, 8], strides = [1, 1]} : vector<16x32xbf16> to vector<16x8xbf16>
    %36 = vector.shape_cast %35 : vector<16x8xbf16> to vector<2x8x8xbf16>
    %37 = vector.extract_strided_slice %32 {offsets = [0, 16], sizes = [16, 8], strides = [1, 1]} : vector<16x32xbf16> to vector<16x8xbf16>
    %38 = vector.shape_cast %37 : vector<16x8xbf16> to vector<2x8x8xbf16>
    %39 = vector.extract_strided_slice %32 {offsets = [0, 24], sizes = [16, 8], strides = [1, 1]} : vector<16x32xbf16> to vector<16x8xbf16>
    %40 = vector.shape_cast %39 : vector<16x8xbf16> to vector<2x8x8xbf16>
    %41 = tpu.concatenate %34, %36, %38, %40 in 0 : vector<2x8x8xbf16>, vector<2x8x8xbf16>, vector<2x8x8xbf16>, vector<2x8x8xbf16> -> vector<8x8x8xbf16>
    %42 = arith.truncf %19 : vector<16x32xf32> to vector<16x32xbf16>
    %43 = vector.extract_strided_slice %42 {offsets = [0, 0], sizes = [16, 8], strides = [1, 1]} : vector<16x32xbf16> to vector<16x8xbf16>
    %44 = vector.shape_cast %43 : vector<16x8xbf16> to vector<2x8x8xbf16>
    %45 = vector.extract_strided_slice %42 {offsets = [0, 8], sizes = [16, 8], strides = [1, 1]} : vector<16x32xbf16> to vector<16x8xbf16>
    %46 = vector.shape_cast %45 : vector<16x8xbf16> to vector<2x8x8xbf16>
    %47 = vector.extract_strided_slice %42 {offsets = [0, 16], sizes = [16, 8], strides = [1, 1]} : vector<16x32xbf16> to vector<16x8xbf16>
    %48 = vector.shape_cast %47 : vector<16x8xbf16> to vector<2x8x8xbf16>
    %49 = vector.extract_strided_slice %42 {offsets = [0, 24], sizes = [16, 8], strides = [1, 1]} : vector<16x32xbf16> to vector<16x8xbf16>
    %50 = vector.shape_cast %49 : vector<16x8xbf16> to vector<2x8x8xbf16>
    %51 = tpu.concatenate %44, %46, %48, %50 in 0 : vector<2x8x8xbf16>, vector<2x8x8xbf16>, vector<2x8x8xbf16>, vector<2x8x8xbf16> -> vector<8x8x8xbf16>
    "tpu.trace_start"() <{level = 10 : i32, message = "gqd,gkd->gqk"}> : () -> ()
    %cst_16 = arith.constant dense<0.000000e+00> : vector<8x8x8xf32>
    %52 = tpu.matmul %31, %41, %cst_16 {dimension_numbers = #tpu.dot_dimension_numbers<[2], [2], [1], [1], [0, 0, 0, 1, 1, 1], [0], [0]>} : vector<8x8x8xbf16>, vector<8x8x8xbf16>, vector<8x8x8xf32> -> vector<8x8x8xf32>
    "tpu.trace_stop"() : () -> ()
    %53 = vector.shape_cast %7 : vector<8x8xf32> to vector<1x8x8xf32>
    %54 = vector.broadcast %53 : vector<1x8x8xf32> to vector<8x8x8xf32>
    %55 = arith.addf %52, %54 : vector<8x8x8xf32>
    %cst_17 = arith.constant dense<0xFF800000> : vector<8x8xf32>
    %56 = vector.multi_reduction <maximumf>, %55, %cst_17 [2] : vector<8x8x8xf32> to vector<8x8xf32>
    %57 = vector.shape_cast %56 : vector<8x8xf32> to vector<8x8x1xf32>
    %58 = vector.broadcast %57 : vector<8x8x1xf32> to vector<8x8x8xf32>
    %59 = arith.subf %55, %58 : vector<8x8x8xf32>
    %60 = math.exp %59 : vector<8x8x8xf32>
    %cst_18 = arith.constant dense<0.000000e+00> : vector<8x8xf32>
    %61 = vector.multi_reduction <add>, %60, %cst_18 [2] : vector<8x8x8xf32> to vector<8x8xf32>
    %62 = vector.shape_cast %61 : vector<8x8xf32> to vector<8x8x1xf32>
    %63 = tpu.reciprocal %62 {approx = true} : vector<8x8x1xf32> -> vector<8x8x1xf32>
    %64 = vector.broadcast %63 : vector<8x8x1xf32> to vector<8x8x8xf32>
    %65 = arith.mulf %60, %64 : vector<8x8x8xf32>
    %66 = arith.truncf %65 : vector<8x8x8xf32> to vector<8x8x8xbf16>
    "tpu.trace_start"() <{level = 10 : i32, message = "gqk,gkd->gqd"}> : () -> ()
    %cst_19 = arith.constant dense<0.000000e+00> : vector<8x8x8xf32>
    %67 = tpu.matmul %66, %51, %cst_19 {dimension_numbers = #tpu.dot_dimension_numbers<[2], [1], [1], [2], [0, 0, 0, 1, 1, 2], [0], [0]>} : vector<8x8x8xbf16>, vector<8x8x8xbf16>, vector<8x8x8xf32> -> vector<8x8x8xf32>
    "tpu.trace_stop"() : () -> ()
    %68 = vector.extract_strided_slice %67 {offsets = [0, 0, 0], sizes = [2, 8, 8], strides = [1, 1, 1]} : vector<8x8x8xf32> to vector<2x8x8xf32>
    %69 = vector.shape_cast %68 : vector<2x8x8xf32> to vector<16x8xf32>
    %70 = vector.extract_strided_slice %67 {offsets = [2, 0, 0], sizes = [2, 8, 8], strides = [1, 1, 1]} : vector<8x8x8xf32> to vector<2x8x8xf32>
    %71 = vector.shape_cast %70 : vector<2x8x8xf32> to vector<16x8xf32>
    %72 = vector.extract_strided_slice %67 {offsets = [4, 0, 0], sizes = [2, 8, 8], strides = [1, 1, 1]} : vector<8x8x8xf32> to vector<2x8x8xf32>
    %73 = vector.shape_cast %72 : vector<2x8x8xf32> to vector<16x8xf32>
    %74 = vector.extract_strided_slice %67 {offsets = [6, 0, 0], sizes = [2, 8, 8], strides = [1, 1, 1]} : vector<8x8x8xf32> to vector<2x8x8xf32>
    %75 = vector.shape_cast %74 : vector<2x8x8xf32> to vector<16x8xf32>
    %76 = tpu.concatenate %69, %71, %73, %75 in 1 : vector<16x8xf32>, vector<16x8xf32>, vector<16x8xf32>, vector<16x8xf32> -> vector<16x32xf32>
    %77 = arith.truncf %76 : vector<16x32xf32> to vector<16x32xbf16>
    %c0_20 = arith.constant 0 : index
    %c0_21 = arith.constant 0 : index
    %c0_22 = arith.constant 0 : index
    %78 = vector.load %arg8[%c0_20, %c0_21, %c0_22] : memref<1x32x32xbf16, #tpu.memory_space<vmem>>, vector<1x32x32xbf16>
    %79 = vector.shape_cast %78 : vector<1x32x32xbf16> to vector<32x32xbf16>
    %cst_23 = arith.constant dense<0.000000e+00> : vector<16x32xf32>
    %80 = tpu.matmul %77, %79, %cst_23 {dimension_numbers = #tpu.dot_dimension_numbers<[1], [0], [0], [1], [0, 0, 1, 1], [], []>} : vector<16x32xbf16>, vector<32x32xbf16>, vector<16x32xf32> -> vector<16x32xf32>
    %c0_24 = arith.constant 0 : index
    %c0_25 = arith.constant 0 : index
    %c0_26 = arith.constant 0 : index
    %81 = vector.load %arg9[%c0_24, %c0_25, %c0_26] : memref<1x1x32xf32, #tpu.memory_space<vmem>>, vector<1x1x32xf32>
    %82 = vector.shape_cast %81 : vector<1x1x32xf32> to vector<1x32xf32>
    %83 = vector.broadcast %82 : vector<1x32xf32> to vector<16x32xf32>
    %84 = arith.addf %80, %83 : vector<16x32xf32>
    %c0_27 = arith.constant 0 : index
    %c0_28 = arith.constant 0 : index
    %c0_29 = arith.constant 0 : index
    %85 = vector.load %arg20[%c0_27, %c0_28, %c0_29] : memref<1x1x32xf32, #tpu.memory_space<vmem>>, vector<1x1x32xf32>
    %86 = vector.shape_cast %85 : vector<1x1x32xf32> to vector<1x32xf32>
    %c0_30 = arith.constant 0 : index
    %c0_31 = arith.constant 0 : index
    %c0_32 = arith.constant 0 : index
    %87 = vector.load %arg21[%c0_30, %c0_31, %c0_32] : memref<1x1x32xf32, #tpu.memory_space<vmem>>, vector<1x1x32xf32>
    %88 = vector.shape_cast %87 : vector<1x1x32xf32> to vector<1x32xf32>
    %89 = arith.addf %3, %84 : vector<16x32xf32>
    %cst_33 = arith.constant dense<0.000000e+00> : vector<16xf32>
    %90 = vector.multi_reduction <add>, %89, %cst_33 [1] : vector<16x32xf32> to vector<16xf32>
    %91 = vector.shape_cast %90 : vector<16xf32> to vector<16x1xf32>
    %cst_34 = arith.constant 3.200000e+01 : f32
    %92 = vector.broadcast %cst_34 : f32 to vector<16x1xf32>
    %93 = arith.divf %91, %92 : vector<16x1xf32>
    %94 = arith.mulf %89, %89 : vector<16x32xf32>
    %cst_35 = arith.constant dense<0.000000e+00> : vector<16xf32>
    %95 = vector.multi_reduction <add>, %94, %cst_35 [1] : vector<16x32xf32> to vector<16xf32>
    %96 = vector.shape_cast %95 : vector<16xf32> to vector<16x1xf32>
    %cst_36 = arith.constant 3.200000e+01 : f32
    %97 = vector.broadcast %cst_36 : f32 to vector<16x1xf32>
    %98 = arith.divf %96, %97 : vector<16x1xf32>
    %99 = arith.mulf %93, %93 : vector<16x1xf32>
    %100 = arith.subf %98, %99 : vector<16x1xf32>
    %cst_37 = arith.constant 0.000000e+00 : f32
    %101 = vector.broadcast %cst_37 : f32 to vector<16x1xf32>
    %102 = arith.maximumf %100, %101 : vector<16x1xf32>
    %103 = vector.broadcast %93 : vector<16x1xf32> to vector<16x32xf32>
    %104 = arith.subf %89, %103 : vector<16x32xf32>
    %cst_38 = arith.constant 9.99999974E-6 : f32
    %105 = vector.broadcast %cst_38 : f32 to vector<16x1xf32>
    %106 = arith.addf %102, %105 : vector<16x1xf32>
    %107 = math.rsqrt %106 : vector<16x1xf32>
    %108 = vector.broadcast %107 : vector<16x1xf32> to vector<16x32xf32>
    %109 = arith.mulf %104, %108 : vector<16x32xf32>
    %110 = vector.broadcast %86 : vector<1x32xf32> to vector<16x32xf32>
    %111 = arith.mulf %109, %110 : vector<16x32xf32>
    %112 = vector.broadcast %88 : vector<1x32xf32> to vector<16x32xf32>
    %113 = arith.addf %111, %112 : vector<16x32xf32>
    %114 = arith.truncf %113 : vector<16x32xf32> to vector<16x32xbf16>
    %c0_39 = arith.constant 0 : index
    %c0_40 = arith.constant 0 : index
    %c0_41 = arith.constant 0 : index
    %115 = vector.load %arg10[%c0_39, %c0_40, %c0_41] : memref<1x32x32xbf16, #tpu.memory_space<vmem>>, vector<1x32x32xbf16>
    %116 = vector.shape_cast %115 : vector<1x32x32xbf16> to vector<32x32xbf16>
    %cst_42 = arith.constant dense<0.000000e+00> : vector<16x32xf32>
    %117 = tpu.matmul %114, %116, %cst_42 {dimension_numbers = #tpu.dot_dimension_numbers<[1], [0], [0], [1], [0, 0, 1, 1], [], []>} : vector<16x32xbf16>, vector<32x32xbf16>, vector<16x32xf32> -> vector<16x32xf32>
    %c0_43 = arith.constant 0 : index
    %c0_44 = arith.constant 0 : index
    %c0_45 = arith.constant 0 : index
    %118 = vector.load %arg11[%c0_43, %c0_44, %c0_45] : memref<1x1x32xf32, #tpu.memory_space<vmem>>, vector<1x1x32xf32>
    %119 = vector.shape_cast %118 : vector<1x1x32xf32> to vector<1x32xf32>
    %120 = vector.broadcast %119 : vector<1x32xf32> to vector<16x32xf32>
    %121 = arith.addf %117, %120 : vector<16x32xf32>
    %c0_46 = arith.constant 0 : index
    %c0_47 = arith.constant 0 : index
    %c0_48 = arith.constant 0 : index
    %122 = vector.load %arg12[%c0_46, %c0_47, %c0_48] : memref<1x32x64xbf16, #tpu.memory_space<vmem>>, vector<1x32x64xbf16>
    %123 = vector.shape_cast %122 : vector<1x32x64xbf16> to vector<32x64xbf16>
    %cst_49 = arith.constant dense<0.000000e+00> : vector<24x64xf32>
    %124 = tpu.matmul %6, %123, %cst_49 {dimension_numbers = #tpu.dot_dimension_numbers<[1], [0], [0], [1], [0, 0, 1, 1], [], []>} : vector<24x32xbf16>, vector<32x64xbf16>, vector<24x64xf32> -> vector<24x64xf32>
    %c0_50 = arith.constant 0 : index
    %c0_51 = arith.constant 0 : index
    %c0_52 = arith.constant 0 : index
    %125 = vector.load %arg13[%c0_50, %c0_51, %c0_52] : memref<1x1x64xf32, #tpu.memory_space<vmem>>, vector<1x1x64xf32>
    %126 = vector.shape_cast %125 : vector<1x1x64xf32> to vector<1x64xf32>
    %127 = vector.broadcast %126 : vector<1x64xf32> to vector<24x64xf32>
    %128 = arith.addf %124, %127 : vector<24x64xf32>
    %129 = vector.extract_strided_slice %128 {offsets = [0, 0], sizes = [24, 32], strides = [1, 1]} : vector<24x64xf32> to vector<24x32xf32>
    %130 = vector.extract_strided_slice %128 {offsets = [0, 32], sizes = [24, 32], strides = [1, 1]} : vector<24x64xf32> to vector<24x32xf32>
    %cst_53 = arith.constant 0.353553385 : f32
    %131 = vector.broadcast %cst_53 : f32 to vector<16x32xf32>
    %132 = arith.mulf %121, %131 : vector<16x32xf32>
    %133 = arith.truncf %132 : vector<16x32xf32> to vector<16x32xbf16>
    %134 = vector.extract_strided_slice %133 {offsets = [0, 0], sizes = [16, 8], strides = [1, 1]} : vector<16x32xbf16> to vector<16x8xbf16>
    %135 = vector.shape_cast %134 : vector<16x8xbf16> to vector<2x8x8xbf16>
    %136 = vector.extract_strided_slice %133 {offsets = [0, 8], sizes = [16, 8], strides = [1, 1]} : vector<16x32xbf16> to vector<16x8xbf16>
    %137 = vector.shape_cast %136 : vector<16x8xbf16> to vector<2x8x8xbf16>
    %138 = vector.extract_strided_slice %133 {offsets = [0, 16], sizes = [16, 8], strides = [1, 1]} : vector<16x32xbf16> to vector<16x8xbf16>
    %139 = vector.shape_cast %138 : vector<16x8xbf16> to vector<2x8x8xbf16>
    %140 = vector.extract_strided_slice %133 {offsets = [0, 24], sizes = [16, 8], strides = [1, 1]} : vector<16x32xbf16> to vector<16x8xbf16>
    %141 = vector.shape_cast %140 : vector<16x8xbf16> to vector<2x8x8xbf16>
    %142 = tpu.concatenate %135, %137, %139, %141 in 0 : vector<2x8x8xbf16>, vector<2x8x8xbf16>, vector<2x8x8xbf16>, vector<2x8x8xbf16> -> vector<8x8x8xbf16>
    %143 = arith.truncf %129 : vector<24x32xf32> to vector<24x32xbf16>
    %144 = vector.extract_strided_slice %143 {offsets = [0, 0], sizes = [24, 8], strides = [1, 1]} : vector<24x32xbf16> to vector<24x8xbf16>
    %145 = vector.shape_cast %144 : vector<24x8xbf16> to vector<2x12x8xbf16>
    %146 = vector.extract_strided_slice %143 {offsets = [0, 8], sizes = [24, 8], strides = [1, 1]} : vector<24x32xbf16> to vector<24x8xbf16>
    %147 = vector.shape_cast %146 : vector<24x8xbf16> to vector<2x12x8xbf16>
    %148 = vector.extract_strided_slice %143 {offsets = [0, 16], sizes = [24, 8], strides = [1, 1]} : vector<24x32xbf16> to vector<24x8xbf16>
    %149 = vector.shape_cast %148 : vector<24x8xbf16> to vector<2x12x8xbf16>
    %150 = vector.extract_strided_slice %143 {offsets = [0, 24], sizes = [24, 8], strides = [1, 1]} : vector<24x32xbf16> to vector<24x8xbf16>
    %151 = vector.shape_cast %150 : vector<24x8xbf16> to vector<2x12x8xbf16>
    %152 = tpu.concatenate %145, %147, %149, %151 in 0 : vector<2x12x8xbf16>, vector<2x12x8xbf16>, vector<2x12x8xbf16>, vector<2x12x8xbf16> -> vector<8x12x8xbf16>
    %153 = arith.truncf %130 : vector<24x32xf32> to vector<24x32xbf16>
    %154 = vector.extract_strided_slice %153 {offsets = [0, 0], sizes = [24, 8], strides = [1, 1]} : vector<24x32xbf16> to vector<24x8xbf16>
    %155 = vector.shape_cast %154 : vector<24x8xbf16> to vector<2x12x8xbf16>
    %156 = vector.extract_strided_slice %153 {offsets = [0, 8], sizes = [24, 8], strides = [1, 1]} : vector<24x32xbf16> to vector<24x8xbf16>
    %157 = vector.shape_cast %156 : vector<24x8xbf16> to vector<2x12x8xbf16>
    %158 = vector.extract_strided_slice %153 {offsets = [0, 16], sizes = [24, 8], strides = [1, 1]} : vector<24x32xbf16> to vector<24x8xbf16>
    %159 = vector.shape_cast %158 : vector<24x8xbf16> to vector<2x12x8xbf16>
    %160 = vector.extract_strided_slice %153 {offsets = [0, 24], sizes = [24, 8], strides = [1, 1]} : vector<24x32xbf16> to vector<24x8xbf16>
    %161 = vector.shape_cast %160 : vector<24x8xbf16> to vector<2x12x8xbf16>
    %162 = tpu.concatenate %155, %157, %159, %161 in 0 : vector<2x12x8xbf16>, vector<2x12x8xbf16>, vector<2x12x8xbf16>, vector<2x12x8xbf16> -> vector<8x12x8xbf16>
    "tpu.trace_start"() <{level = 10 : i32, message = "gqd,gkd->gqk"}> : () -> ()
    %cst_54 = arith.constant dense<0.000000e+00> : vector<8x8x12xf32>
    %163 = tpu.matmul %142, %152, %cst_54 {dimension_numbers = #tpu.dot_dimension_numbers<[2], [2], [1], [1], [0, 0, 0, 1, 1, 1], [0], [0]>} : vector<8x8x8xbf16>, vector<8x12x8xbf16>, vector<8x8x12xf32> -> vector<8x8x12xf32>
    "tpu.trace_stop"() : () -> ()
    %164 = vector.shape_cast %8 : vector<8x12xf32> to vector<1x8x12xf32>
    %165 = vector.broadcast %164 : vector<1x8x12xf32> to vector<8x8x12xf32>
    %166 = arith.addf %163, %165 : vector<8x8x12xf32>
    %cst_55 = arith.constant dense<0xFF800000> : vector<8x8xf32>
    %167 = vector.multi_reduction <maximumf>, %166, %cst_55 [2] : vector<8x8x12xf32> to vector<8x8xf32>
    %168 = vector.shape_cast %167 : vector<8x8xf32> to vector<8x8x1xf32>
    %169 = vector.broadcast %168 : vector<8x8x1xf32> to vector<8x8x12xf32>
    %170 = arith.subf %166, %169 : vector<8x8x12xf32>
    %171 = math.exp %170 : vector<8x8x12xf32>
    %cst_56 = arith.constant dense<0.000000e+00> : vector<8x8xf32>
    %172 = vector.multi_reduction <add>, %171, %cst_56 [2] : vector<8x8x12xf32> to vector<8x8xf32>
    %173 = vector.shape_cast %172 : vector<8x8xf32> to vector<8x8x1xf32>
    %174 = tpu.reciprocal %173 {approx = true} : vector<8x8x1xf32> -> vector<8x8x1xf32>
    %175 = vector.broadcast %174 : vector<8x8x1xf32> to vector<8x8x12xf32>
    %176 = arith.mulf %171, %175 : vector<8x8x12xf32>
    %177 = arith.truncf %176 : vector<8x8x12xf32> to vector<8x8x12xbf16>
    "tpu.trace_start"() <{level = 10 : i32, message = "gqk,gkd->gqd"}> : () -> ()
    %cst_57 = arith.constant dense<0.000000e+00> : vector<8x8x8xf32>
    %178 = tpu.matmul %177, %162, %cst_57 {dimension_numbers = #tpu.dot_dimension_numbers<[2], [1], [1], [2], [0, 0, 0, 1, 1, 2], [0], [0]>} : vector<8x8x12xbf16>, vector<8x12x8xbf16>, vector<8x8x8xf32> -> vector<8x8x8xf32>
    "tpu.trace_stop"() : () -> ()
    %179 = vector.extract_strided_slice %178 {offsets = [0, 0, 0], sizes = [2, 8, 8], strides = [1, 1, 1]} : vector<8x8x8xf32> to vector<2x8x8xf32>
    %180 = vector.shape_cast %179 : vector<2x8x8xf32> to vector<16x8xf32>
    %181 = vector.extract_strided_slice %178 {offsets = [2, 0, 0], sizes = [2, 8, 8], strides = [1, 1, 1]} : vector<8x8x8xf32> to vector<2x8x8xf32>
    %182 = vector.shape_cast %181 : vector<2x8x8xf32> to vector<16x8xf32>
    %183 = vector.extract_strided_slice %178 {offsets = [4, 0, 0], sizes = [2, 8, 8], strides = [1, 1, 1]} : vector<8x8x8xf32> to vector<2x8x8xf32>
    %184 = vector.shape_cast %183 : vector<2x8x8xf32> to vector<16x8xf32>
    %185 = vector.extract_strided_slice %178 {offsets = [6, 0, 0], sizes = [2, 8, 8], strides = [1, 1, 1]} : vector<8x8x8xf32> to vector<2x8x8xf32>
    %186 = vector.shape_cast %185 : vector<2x8x8xf32> to vector<16x8xf32>
    %187 = tpu.concatenate %180, %182, %184, %186 in 1 : vector<16x8xf32>, vector<16x8xf32>, vector<16x8xf32>, vector<16x8xf32> -> vector<16x32xf32>
    %188 = arith.truncf %187 : vector<16x32xf32> to vector<16x32xbf16>
    %c0_58 = arith.constant 0 : index
    %c0_59 = arith.constant 0 : index
    %c0_60 = arith.constant 0 : index
    %189 = vector.load %arg14[%c0_58, %c0_59, %c0_60] : memref<1x32x32xbf16, #tpu.memory_space<vmem>>, vector<1x32x32xbf16>
    %190 = vector.shape_cast %189 : vector<1x32x32xbf16> to vector<32x32xbf16>
    %cst_61 = arith.constant dense<0.000000e+00> : vector<16x32xf32>
    %191 = tpu.matmul %188, %190, %cst_61 {dimension_numbers = #tpu.dot_dimension_numbers<[1], [0], [0], [1], [0, 0, 1, 1], [], []>} : vector<16x32xbf16>, vector<32x32xbf16>, vector<16x32xf32> -> vector<16x32xf32>
    %c0_62 = arith.constant 0 : index
    %c0_63 = arith.constant 0 : index
    %c0_64 = arith.constant 0 : index
    %192 = vector.load %arg15[%c0_62, %c0_63, %c0_64] : memref<1x1x32xf32, #tpu.memory_space<vmem>>, vector<1x1x32xf32>
    %193 = vector.shape_cast %192 : vector<1x1x32xf32> to vector<1x32xf32>
    %194 = vector.broadcast %193 : vector<1x32xf32> to vector<16x32xf32>
    %195 = arith.addf %191, %194 : vector<16x32xf32>
    %c0_65 = arith.constant 0 : index
    %c0_66 = arith.constant 0 : index
    %c0_67 = arith.constant 0 : index
    %196 = vector.load %arg22[%c0_65, %c0_66, %c0_67] : memref<1x1x32xf32, #tpu.memory_space<vmem>>, vector<1x1x32xf32>
    %197 = vector.shape_cast %196 : vector<1x1x32xf32> to vector<1x32xf32>
    %c0_68 = arith.constant 0 : index
    %c0_69 = arith.constant 0 : index
    %c0_70 = arith.constant 0 : index
    %198 = vector.load %arg23[%c0_68, %c0_69, %c0_70] : memref<1x1x32xf32, #tpu.memory_space<vmem>>, vector<1x1x32xf32>
    %199 = vector.shape_cast %198 : vector<1x1x32xf32> to vector<1x32xf32>
    %200 = arith.addf %113, %195 : vector<16x32xf32>
    %cst_71 = arith.constant dense<0.000000e+00> : vector<16xf32>
    %201 = vector.multi_reduction <add>, %200, %cst_71 [1] : vector<16x32xf32> to vector<16xf32>
    %202 = vector.shape_cast %201 : vector<16xf32> to vector<16x1xf32>
    %cst_72 = arith.constant 3.200000e+01 : f32
    %203 = vector.broadcast %cst_72 : f32 to vector<16x1xf32>
    %204 = arith.divf %202, %203 : vector<16x1xf32>
    %205 = arith.mulf %200, %200 : vector<16x32xf32>
    %cst_73 = arith.constant dense<0.000000e+00> : vector<16xf32>
    %206 = vector.multi_reduction <add>, %205, %cst_73 [1] : vector<16x32xf32> to vector<16xf32>
    %207 = vector.shape_cast %206 : vector<16xf32> to vector<16x1xf32>
    %cst_74 = arith.constant 3.200000e+01 : f32
    %208 = vector.broadcast %cst_74 : f32 to vector<16x1xf32>
    %209 = arith.divf %207, %208 : vector<16x1xf32>
    %210 = arith.mulf %204, %204 : vector<16x1xf32>
    %211 = arith.subf %209, %210 : vector<16x1xf32>
    %cst_75 = arith.constant 0.000000e+00 : f32
    %212 = vector.broadcast %cst_75 : f32 to vector<16x1xf32>
    %213 = arith.maximumf %211, %212 : vector<16x1xf32>
    %214 = vector.broadcast %204 : vector<16x1xf32> to vector<16x32xf32>
    %215 = arith.subf %200, %214 : vector<16x32xf32>
    %cst_76 = arith.constant 9.99999974E-6 : f32
    %216 = vector.broadcast %cst_76 : f32 to vector<16x1xf32>
    %217 = arith.addf %213, %216 : vector<16x1xf32>
    %218 = math.rsqrt %217 : vector<16x1xf32>
    %219 = vector.broadcast %218 : vector<16x1xf32> to vector<16x32xf32>
    %220 = arith.mulf %215, %219 : vector<16x32xf32>
    %221 = vector.broadcast %197 : vector<1x32xf32> to vector<16x32xf32>
    %222 = arith.mulf %220, %221 : vector<16x32xf32>
    %223 = vector.broadcast %199 : vector<1x32xf32> to vector<16x32xf32>
    %224 = arith.addf %222, %223 : vector<16x32xf32>
    %225 = arith.truncf %224 : vector<16x32xf32> to vector<16x32xbf16>
    %c0_77 = arith.constant 0 : index
    %c0_78 = arith.constant 0 : index
    %c0_79 = arith.constant 0 : index
    %226 = vector.load %arg16[%c0_77, %c0_78, %c0_79] : memref<1x32x64xbf16, #tpu.memory_space<vmem>>, vector<1x32x64xbf16>
    %227 = vector.shape_cast %226 : vector<1x32x64xbf16> to vector<32x64xbf16>
    %cst_80 = arith.constant dense<0.000000e+00> : vector<16x64xf32>
    %228 = tpu.matmul %225, %227, %cst_80 {dimension_numbers = #tpu.dot_dimension_numbers<[1], [0], [0], [1], [0, 0, 1, 1], [], []>} : vector<16x32xbf16>, vector<32x64xbf16>, vector<16x64xf32> -> vector<16x64xf32>
    %c0_81 = arith.constant 0 : index
    %c0_82 = arith.constant 0 : index
    %c0_83 = arith.constant 0 : index
    %229 = vector.load %arg17[%c0_81, %c0_82, %c0_83] : memref<1x1x64xf32, #tpu.memory_space<vmem>>, vector<1x1x64xf32>
    %230 = vector.shape_cast %229 : vector<1x1x64xf32> to vector<1x64xf32>
    %231 = vector.broadcast %230 : vector<1x64xf32> to vector<16x64xf32>
    %232 = arith.addf %228, %231 : vector<16x64xf32>
    %cst_84 = arith.constant 0.000000e+00 : f32
    %233 = vector.broadcast %cst_84 : f32 to vector<16x64xf32>
    %234 = arith.maximumf %232, %233 : vector<16x64xf32>
    %235 = arith.truncf %234 : vector<16x64xf32> to vector<16x64xbf16>
    %c0_85 = arith.constant 0 : index
    %c0_86 = arith.constant 0 : index
    %c0_87 = arith.constant 0 : index
    %236 = vector.load %arg18[%c0_85, %c0_86, %c0_87] : memref<1x64x32xbf16, #tpu.memory_space<vmem>>, vector<1x64x32xbf16>
    %237 = vector.shape_cast %236 : vector<1x64x32xbf16> to vector<64x32xbf16>
    %cst_88 = arith.constant dense<0.000000e+00> : vector<16x32xf32>
    %238 = tpu.matmul %235, %237, %cst_88 {dimension_numbers = #tpu.dot_dimension_numbers<[1], [0], [0], [1], [0, 0, 1, 1], [], []>} : vector<16x64xbf16>, vector<64x32xbf16>, vector<16x32xf32> -> vector<16x32xf32>
    %c0_89 = arith.constant 0 : index
    %c0_90 = arith.constant 0 : index
    %c0_91 = arith.constant 0 : index
    %239 = vector.load %arg19[%c0_89, %c0_90, %c0_91] : memref<1x1x32xf32, #tpu.memory_space<vmem>>, vector<1x1x32xf32>
    %240 = vector.shape_cast %239 : vector<1x1x32xf32> to vector<1x32xf32>
    %241 = vector.broadcast %240 : vector<1x32xf32> to vector<16x32xf32>
    %242 = arith.addf %238, %241 : vector<16x32xf32>
    %c0_92 = arith.constant 0 : index
    %c0_93 = arith.constant 0 : index
    %c0_94 = arith.constant 0 : index
    %243 = vector.load %arg24[%c0_92, %c0_93, %c0_94] : memref<1x1x32xf32, #tpu.memory_space<vmem>>, vector<1x1x32xf32>
    %244 = vector.shape_cast %243 : vector<1x1x32xf32> to vector<1x32xf32>
    %c0_95 = arith.constant 0 : index
    %c0_96 = arith.constant 0 : index
    %c0_97 = arith.constant 0 : index
    %245 = vector.load %arg25[%c0_95, %c0_96, %c0_97] : memref<1x1x32xf32, #tpu.memory_space<vmem>>, vector<1x1x32xf32>
    %246 = vector.shape_cast %245 : vector<1x1x32xf32> to vector<1x32xf32>
    %247 = arith.addf %224, %242 : vector<16x32xf32>
    %cst_98 = arith.constant dense<0.000000e+00> : vector<16xf32>
    %248 = vector.multi_reduction <add>, %247, %cst_98 [1] : vector<16x32xf32> to vector<16xf32>
    %249 = vector.shape_cast %248 : vector<16xf32> to vector<16x1xf32>
    %cst_99 = arith.constant 3.200000e+01 : f32
    %250 = vector.broadcast %cst_99 : f32 to vector<16x1xf32>
    %251 = arith.divf %249, %250 : vector<16x1xf32>
    %252 = arith.mulf %247, %247 : vector<16x32xf32>
    %cst_100 = arith.constant dense<0.000000e+00> : vector<16xf32>
    %253 = vector.multi_reduction <add>, %252, %cst_100 [1] : vector<16x32xf32> to vector<16xf32>
    %254 = vector.shape_cast %253 : vector<16xf32> to vector<16x1xf32>
    %cst_101 = arith.constant 3.200000e+01 : f32
    %255 = vector.broadcast %cst_101 : f32 to vector<16x1xf32>
    %256 = arith.divf %254, %255 : vector<16x1xf32>
    %257 = arith.mulf %251, %251 : vector<16x1xf32>
    %258 = arith.subf %256, %257 : vector<16x1xf32>
    %cst_102 = arith.constant 0.000000e+00 : f32
    %259 = vector.broadcast %cst_102 : f32 to vector<16x1xf32>
    %260 = arith.maximumf %258, %259 : vector<16x1xf32>
    %261 = vector.broadcast %251 : vector<16x1xf32> to vector<16x32xf32>
    %262 = arith.subf %247, %261 : vector<16x32xf32>
    %cst_103 = arith.constant 9.99999974E-6 : f32
    %263 = vector.broadcast %cst_103 : f32 to vector<16x1xf32>
    %264 = arith.addf %260, %263 : vector<16x1xf32>
    %265 = math.rsqrt %264 : vector<16x1xf32>
    %266 = vector.broadcast %265 : vector<16x1xf32> to vector<16x32xf32>
    %267 = arith.mulf %262, %266 : vector<16x32xf32>
    %268 = vector.broadcast %244 : vector<1x32xf32> to vector<16x32xf32>
    %269 = arith.mulf %267, %268 : vector<16x32xf32>
    %270 = vector.broadcast %246 : vector<1x32xf32> to vector<16x32xf32>
    %271 = arith.addf %269, %270 : vector<16x32xf32>
    %c0_104 = arith.constant 0 : index
    %c0_105 = arith.constant 0 : index
    %272 = vector.load %arg29[%c0_104, %c0_105] : memref<16x32xf32, #tpu.memory_space<vmem>>, vector<16x32xf32>
    tpu.vector_store %arg29[%c0_104, %c0_105], %271 {strides = array<i32>} : memref<16x32xf32, #tpu.memory_space<vmem>>, vector<16x32xf32>,
    %c1_i32 = arith.constant 1 : i32
    %273 = arith.cmpi eq, %arg1, %c1_i32 : i32
    %274 = arith.extui %273 : i1 to i32
    %c0_i32_106 = arith.constant 0 : i32
    %275 = arith.cmpi ne, %274, %c0_i32_106 : i32
    scf.if %275 {
      %276 = arith.truncf %271 : vector<16x32xf32> to vector<16x32xbf16>
      %c0_107 = arith.constant 0 : index
      %c0_108 = arith.constant 0 : index
      %277 = vector.load %arg26[%c0_107, %c0_108] : memref<32x128xbf16, #tpu.memory_space<vmem>>, vector<32x128xbf16>
      %cst_109 = arith.constant dense<0.000000e+00> : vector<16x128xf32>
      %278 = tpu.matmul %276, %277, %cst_109 {dimension_numbers = #tpu.dot_dimension_numbers<[1], [0], [0], [1], [0, 0, 1, 1], [], []>} : vector<16x32xbf16>, vector<32x128xbf16>, vector<16x128xf32> -> vector<16x128xf32>
      %c0_110 = arith.constant 0 : index
      %c0_111 = arith.constant 0 : index
      %279 = vector.load %arg27[%c0_110, %c0_111] : memref<1x128xf32, #tpu.memory_space<vmem>>, vector<1x128xf32>
      %280 = vector.broadcast %279 : vector<1x128xf32> to vector<16x128xf32>
      %281 = arith.addf %278, %280 : vector<16x128xf32>
      %282 = vector.shape_cast %281 : vector<16x128xf32> to vector<2x8x128xf32>
      %c0_112 = arith.constant 0 : index
      %c0_113 = arith.constant 0 : index
      %c0_114 = arith.constant 0 : index
      %283 = vector.load %arg28[%c0_112, %c0_113, %c0_114] : memref<2x8x128xf32, #tpu.memory_space<vmem>>, vector<2x8x128xf32>
      tpu.vector_store %arg28[%c0_112, %c0_113, %c0_114], %282 {strides = array<i32>} : memref<2x8x128xf32, #tpu.memory_space<vmem>>, vector<2x8x128xf32>,
    } else {
    }
    return
  }
  func.func @transform_0(%arg0: i32, %arg1: i32) -> (i32, i32, i32) {
    %c0_i32 = arith.constant 0 : i32
    %c0_i32_0 = arith.constant 0 : i32
    %c0_i32_1 = arith.constant 0 : i32
    return %arg0, %c0_i32, %c0_i32_0 : i32, i32, i32
  }
  func.func @transform_1(%arg0: i32, %arg1: i32) -> (i32, i32, i32) {
    %c0_i32 = arith.constant 0 : i32
    %c0_i32_0 = arith.constant 0 : i32
    %c0_i32_1 = arith.constant 0 : i32
    return %arg0, %c0_i32, %c0_i32_0 : i32, i32, i32
  }
  func.func @transform_2(%arg0: i32, %arg1: i32) -> (i32, i32) {
    %c0_i32 = arith.constant 0 : i32
    %c0_i32_0 = arith.constant 0 : i32
    %c0_i32_1 = arith.constant 0 : i32
    return %c0_i32, %c0_i32_0 : i32, i32
  }
  func.func @transform_3(%arg0: i32, %arg1: i32) -> (i32, i32) {
    %c0_i32 = arith.constant 0 : i32
    %c0_i32_0 = arith.constant 0 : i32
    %c0_i32_1 = arith.constant 0 : i32
    return %c0_i32, %c0_i32_0 : i32, i32
  }
  func.func @transform_4(%arg0: i32, %arg1: i32) -> (i32, i32, i32) {
    %c0_i32 = arith.constant 0 : i32
    %c0_i32_0 = arith.constant 0 : i32
    %c0_i32_1 = arith.constant 0 : i32
    return %arg1, %c0_i32, %c0_i32_0 : i32, i32, i32
  }
  func.func @transform_5(%arg0: i32, %arg1: i32) -> (i32, i32, i32) {
    %c0_i32 = arith.constant 0 : i32
    %c0_i32_0 = arith.constant 0 : i32
    %c0_i32_1 = arith.constant 0 : i32
    return %arg1, %c0_i32, %c0_i32_0 : i32, i32, i32
  }
  func.func @transform_6(%arg0: i32, %arg1: i32) -> (i32, i32, i32) {
    %c0_i32 = arith.constant 0 : i32
    %c0_i32_0 = arith.constant 0 : i32
    %c0_i32_1 = arith.constant 0 : i32
    return %arg1, %c0_i32, %c0_i32_0 : i32, i32, i32
  }
  func.func @transform_7(%arg0: i32, %arg1: i32) -> (i32, i32, i32) {
    %c0_i32 = arith.constant 0 : i32
    %c0_i32_0 = arith.constant 0 : i32
    %c0_i32_1 = arith.constant 0 : i32
    return %arg1, %c0_i32, %c0_i32_0 : i32, i32, i32
  }
  func.func @transform_8(%arg0: i32, %arg1: i32) -> (i32, i32, i32) {
    %c0_i32 = arith.constant 0 : i32
    %c0_i32_0 = arith.constant 0 : i32
    %c0_i32_1 = arith.constant 0 : i32
    return %arg1, %c0_i32, %c0_i32_0 : i32, i32, i32
  }
  func.func @transform_9(%arg0: i32, %arg1: i32) -> (i32, i32, i32) {
    %c0_i32 = arith.constant 0 : i32
    %c0_i32_0 = arith.constant 0 : i32
    %c0_i32_1 = arith.constant 0 : i32
    return %arg1, %c0_i32, %c0_i32_0 : i32, i32, i32
  }
  func.func @transform_10(%arg0: i32, %arg1: i32) -> (i32, i32, i32) {
    %c0_i32 = arith.constant 0 : i32
    %c0_i32_0 = arith.constant 0 : i32
    %c0_i32_1 = arith.constant 0 : i32
    return %arg1, %c0_i32, %c0_i32_0 : i32, i32, i32
  }
  func.func @transform_11(%arg0: i32, %arg1: i32) -> (i32, i32, i32) {
    %c0_i32 = arith.constant 0 : i32
    %c0_i32_0 = arith.constant 0 : i32
    %c0_i32_1 = arith.constant 0 : i32
    return %arg1, %c0_i32, %c0_i32_0 : i32, i32, i32
  }
  func.func @transform_12(%arg0: i32, %arg1: i32) -> (i32, i32, i32) {
    %c0_i32 = arith.constant 0 : i32
    %c0_i32_0 = arith.constant 0 : i32
    %c0_i32_1 = arith.constant 0 : i32
    return %arg1, %c0_i32, %c0_i32_0 : i32, i32, i32
  }
  func.func @transform_13(%arg0: i32, %arg1: i32) -> (i32, i32, i32) {
    %c0_i32 = arith.constant 0 : i32
    %c0_i32_0 = arith.constant 0 : i32
    %c0_i32_1 = arith.constant 0 : i32
    return %arg1, %c0_i32, %c0_i32_0 : i32, i32, i32
  }
  func.func @transform_14(%arg0: i32, %arg1: i32) -> (i32, i32, i32) {
    %c0_i32 = arith.constant 0 : i32
    %c0_i32_0 = arith.constant 0 : i32
    %c0_i32_1 = arith.constant 0 : i32
    return %arg1, %c0_i32, %c0_i32_0 : i32, i32, i32
  }
  func.func @transform_15(%arg0: i32, %arg1: i32) -> (i32, i32, i32) {
    %c0_i32 = arith.constant 0 : i32
    %c0_i32_0 = arith.constant 0 : i32
    %c0_i32_1 = arith.constant 0 : i32
    return %arg1, %c0_i32, %c0_i32_0 : i32, i32, i32
  }
  func.func @transform_16(%arg0: i32, %arg1: i32) -> (i32, i32, i32) {
    %c0_i32 = arith.constant 0 : i32
    %c0_i32_0 = arith.constant 0 : i32
    %c0_i32_1 = arith.constant 0 : i32
    return %arg1, %c0_i32, %c0_i32_0 : i32, i32, i32
  }
  func.func @transform_17(%arg0: i32, %arg1: i32) -> (i32, i32, i32) {
    %c0_i32 = arith.constant 0 : i32
    %c0_i32_0 = arith.constant 0 : i32
    %c0_i32_1 = arith.constant 0 : i32
    return %arg1, %c0_i32, %c0_i32_0 : i32, i32, i32
  }
  func.func @transform_18(%arg0: i32, %arg1: i32) -> (i32, i32, i32) {
    %c0_i32 = arith.constant 0 : i32
    %c0_i32_0 = arith.constant 0 : i32
    %c0_i32_1 = arith.constant 0 : i32
    return %arg1, %c0_i32, %c0_i32_0 : i32, i32, i32
  }
  func.func @transform_19(%arg0: i32, %arg1: i32) -> (i32, i32, i32) {
    %c0_i32 = arith.constant 0 : i32
    %c0_i32_0 = arith.constant 0 : i32
    %c0_i32_1 = arith.constant 0 : i32
    return %arg1, %c0_i32, %c0_i32_0 : i32, i32, i32
  }
  func.func @transform_20(%arg0: i32, %arg1: i32) -> (i32, i32, i32) {
    %c0_i32 = arith.constant 0 : i32
    %c0_i32_0 = arith.constant 0 : i32
    %c0_i32_1 = arith.constant 0 : i32
    return %arg1, %c0_i32, %c0_i32_0 : i32, i32, i32
  }
  func.func @transform_21(%arg0: i32, %arg1: i32) -> (i32, i32, i32) {
    %c0_i32 = arith.constant 0 : i32
    %c0_i32_0 = arith.constant 0 : i32
    %c0_i32_1 = arith.constant 0 : i32
    return %arg1, %c0_i32, %c0_i32_0 : i32, i32, i32
  }
  func.func @transform_22(%arg0: i32, %arg1: i32) -> (i32, i32, i32) {
    %c0_i32 = arith.constant 0 : i32
    %c0_i32_0 = arith.constant 0 : i32
    %c0_i32_1 = arith.constant 0 : i32
    return %arg1, %c0_i32, %c0_i32_0 : i32, i32, i32
  }
  func.func @transform_23(%arg0: i32, %arg1: i32) -> (i32, i32, i32) {
    %c0_i32 = arith.constant 0 : i32
    %c0_i32_0 = arith.constant 0 : i32
    %c0_i32_1 = arith.constant 0 : i32
    return %arg1, %c0_i32, %c0_i32_0 : i32, i32, i32
  }
  func.func @transform_24(%arg0: i32, %arg1: i32) -> (i32, i32) {
    %c0_i32 = arith.constant 0 : i32
    %c0_i32_0 = arith.constant 0 : i32
    %c0_i32_1 = arith.constant 0 : i32
    return %c0_i32, %c0_i32_0 : i32, i32
  }
  func.func @transform_25(%arg0: i32, %arg1: i32) -> (i32, i32) {
    %c0_i32 = arith.constant 0 : i32
    %c0_i32_0 = arith.constant 0 : i32
    %c0_i32_1 = arith.constant 0 : i32
    return %c0_i32, %c0_i32_0 : i32, i32
  }
  func.func @transform_26(%arg0: i32, %arg1: i32) -> (i32, i32, i32) {
    %c0_i32 = arith.constant 0 : i32
    %c0_i32_0 = arith.constant 0 : i32
    %c0_i32_1 = arith.constant 0 : i32
    return %arg0, %c0_i32, %c0_i32_0 : i32, i32, i32
  }
}

</mosaic_0001>

<bundles_post_ra>
// kernel: transformer_decoder_forward.1
= control target key start
LH: loop header
LB: loop body
LE: loop exit
PB: predicated region body
PF: predicated region fallthrough
CT: control target
= control target key end

     0   :  { %s5484_s0 = inlined_call_operand.vmem [shape: f32[2,8,32], index: 0, kind: input, shape index: {}]   ;;  %s5485_s1 = inlined_call_operand.vmem [shape: f32[2,12,32], index: 1, kind: input, shape index: {}]   ;;  %s5486_s2 = inlined_call_operand.vmem [shape: f32[8,8], index: 2, kind: input, shape index: {}]   ;;  %s5487_s3 = inlined_call_operand.vmem [shape: f32[8,12], index: 3, kind: input, shape index: {}]   ;;  %s5488_s4 = inlined_call_operand.vmem [shape: bf16[2,32,96], index: 4, kind: input, shape index: {}]   ;;  %s5489_s5 = inlined_call_operand.hbm [shape: f32[2,1,96], index: 5, kind: input, shape index: {}]   ;;  %s5490_s6 = inlined_call_operand.vmem [shape: bf16[2,32,32], index: 6, kind: input, shape index: {}]   ;;  %s5491_s7 = inlined_call_operand.hbm [shape: f32[2,1,32], index: 7, kind: input, shape index: {}]   ;;  %s5492_s8 = inlined_call_operand.vmem [shape: bf16[2,32,32], index: 8, kind: input, shape index: {}]   ;;  %s5493_s9 = inlined_call_operand.hbm [shape: f32[2,1,32], index: 9, kind: input, shape index: {}]   ;;  %s5494_s10 = inlined_call_operand.vmem [shape: bf16[2,32,64], index: 10, kind: input, shape index: {}]   ;;  %s5495_s11 = inlined_call_operand.hbm [shape: f32[2,1,64], index: 11, kind: input, shape index: {}]   ;;  %s5496_s12 = inlined_call_operand.hbm [shape: bf16[2,32,32], index: 12, kind: input, shape index: {}]   ;;  %s5497_s13 = inlined_call_operand.hbm [shape: f32[2,1,32], index: 13, kind: input, shape index: {}]   ;;  %s5498_s14 = inlined_call_operand.hbm [shape: bf16[2,32,64], index: 14, kind: input, shape index: {}]   ;;  %s5499_s15 = inlined_call_operand.hbm [shape: f32[2,1,64], index: 15, kind: input, shape index: {}]   ;;  %s5500_s16 = inlined_call_operand.vmem [shape: bf16[2,64,32], index: 16, kind: input, shape index: {}]   ;;  %s5501_s17 = inlined_call_operand.hbm [shape: f32[2,1,32], index: 17, kind: input, shape index: {}]   ;;  %s5502_s18 = inlined_call_operand.hbm [shape: f32[2,1,32], index: 18, kind: input, shape index: {}]   ;;  %s5503_s19 = inlined_call_operand.hbm [shape: f32[2,1,32], index: 19, kind: input, shape index: {}]   ;;  %s5504_s20 = inlined_call_operand.hbm [shape: f32[2,1,32], index: 20, kind: input, shape index: {}]   ;;  %s5505_s21 = inlined_call_operand.hbm [shape: f32[2,1,32], index: 21, kind: input, shape index: {}]   ;;  %s5506_s22 = inlined_call_operand.hbm [shape: f32[2,1,32], index: 22, kind: input, shape index: {}]   ;;  %s5507_s23 = inlined_call_operand.hbm [shape: f32[2,1,32], index: 23, kind: input, shape index: {}]   ;;  %s5508_s24 = inlined_call_operand.vmem [shape: bf16[32,128], index: 24, kind: input, shape index: {}]   ;;  %s5509_s25 = inlined_call_operand.vmem [shape: f32[1,128], index: 25, kind: input, shape index: {}]   ;;  %s5510_s26 = inlined_call_operand.vmem [shape: f32[2,8,128], index: 26, kind: output, shape index: {}]  }
   0x1   :  { %5525 = sst [smem:[#allocation37_spill]] %s5484_s0 }
   0x2   :  { %5526 = sst [smem:[#allocation38_spill]] %s5485_s1 }
   0x3   :  { %5527 = sst [smem:[#allocation39_spill]] %s5486_s2 }
   0x4   :  { %5528 = sst [smem:[#allocation40_spill]] %s5487_s3 }
   0x5   :  { %5529 = sst [smem:[#allocation41_spill]] %s5488_s4 }
   0x6   :  { %5530 = sst [smem:[#allocation42_spill]] %s5489_s5 }
   0x7   :  { %5531 = sst [smem:[#allocation43_spill]] %s5490_s6 }
   0x8   :  { %5532 = sst [smem:[#allocation44_spill]] %s5491_s7 }
   0x9   :  { %5533 = sst [smem:[#allocation45_spill]] %s5492_s8 }
   0xa   :  { %5534 = sst [smem:[#allocation46_spill]] %s5493_s9 }
   0xb   :  { %5535 = sst [smem:[#allocation47_spill]] %s5494_s10 }
   0xc   :  { %5536 = sst [smem:[#allocation48_spill]] %s5495_s11 }
   0xd   :  { %5537 = sst [smem:[#allocation49_spill]] %s5496_s12 }
   0xe   :  { %5538 = sst [smem:[#allocation50_spill]] %s5497_s13 }
   0xf   :  { %5539 = sst [smem:[#allocation51_spill]] %s5498_s14 }
  0x10   :  { %5540 = sst [smem:[#allocation52_spill]] %s5499_s15 }
  0x11   :  { %5541 = sst [smem:[#allocation53_spill]] %s5500_s16 }
  0x12   :  { %5542 = sst [smem:[#allocation54_spill]] %s5501_s17 }
  0x13   :  { %5543 = sst [smem:[#allocation55_spill]] %s5502_s18 }
  0x14   :  { %5544 = sst [smem:[#allocation56_spill]] %s5503_s19 }
  0x15   :  { %5545 = sst [smem:[#allocation57_spill]] %s5504_s20 }
  0x16   :  { %5546 = sst [smem:[#allocation58_spill]] %s5508_s24 }
  0x17   :  { %5547 = sst [smem:[#allocation59_spill]] %s5509_s25 }
  0x18   :  { %5548 = sst [smem:[#allocation60_spill]] %s5510_s26 }
  0x19   :  { %31 = vsyncpa [#allocation4], 0 }
  0x1a   :  { %33 = vsyncpa [#allocation4 + $0x1], 0 }
  0x1b   :  { %34 = vsyncpa [#allocation6], 0 }
  0x1c   :  { %36 = vsyncpa [#allocation6 + $0x1], 0 }
  0x1d   :  { %37 = vsyncpa [#allocation9], 0 }
  0x1e   :  { %39 = vsyncpa [#allocation9 + $0x1], 0 }
  0x1f   :  { %40 = vsyncpa [#allocation12], 0 }
  0x20   :  { %42 = vsyncpa [#allocation12 + $0x1], 0 }
  0x21   :  { %43 = vsyncpa [#allocation15], 0 }
  0x22   :  { %45 = vsyncpa [#allocation15 + $0x1], 0 }
  0x23   :  { %46 = vsyncpa [#allocation18], 0 }
  0x24   :  { %48 = vsyncpa [#allocation18 + $0x1], 0 }
  0x25   :  { %49 = vsyncpa [#allocation21], 0 }
  0x26   :  { %51 = vsyncpa [#allocation21 + $0x1], 0 }
  0x27   :  { %52 = vsyncpa [#allocation24], 0 }
  0x28   :  { %54 = vsyncpa [#allocation24 + $0x1], 0  ;;  %s4652_s27 = smov 0   ;;  %s4654_s3 = smov 0  }
  0x29   :  { %s4656_s7 = smov 0   ;;  %s4658_s28 = smov 0  }
  0x2a   :  { %s4660_s8 = smov 0   ;;  %s4662_s4 = smov 0  }
  0x2b LB: > { %5549 = sst [smem:[#allocation34_spill]] %s4492_s7  ;;  %s5513_s29 = sadd.s32 4294967295, %s4504_s4   ;;  %s4504_s4 = sphi %s4662_s4, %s60_s4   ;;  %s4500_s8 = sphi %s4660_s8, %s5604_s8   ;;  %s4496_s28 = sphi %s4658_s28, %s5603_s28   ;;  %s4492_s7 = sphi %s4656_s7, %s5599_s7   ;;  %s4488_s3 = sphi %s4654_s3, %s5602_s3   ;;  %s4484_s27 = sphi %s4652_s27, %s5601_s27  }
  0x2c   : > { %s69_s0 = sadd.s32 1, %s4500_s8  ;;  %s199_s9 = sadd.s32 1, %s4492_s7 }
  0x2d   : > { %p70_p0 = scmp.ge.s32.totalorder %s69_s0, 2  ;;  %p206_p1 = scmp.ne.s32.totalorder %s4492_s7, %s4488_s3 }
  0x2e   : > { %p207_p2 = scmp.eq.s32.totalorder %s4504_s4, 0  ;;  %p212_p4 = scmp.ne.s32.totalorder %s4488_s3, %s4484_s27 }
  0x2f   : > { %s5606_s0 = smov (%p70_p0, %s69_s0), 0  ;;  %p213_p5 = scmp.eq.s32.totalorder %s5513_s29, 0 }
  0x30   : > { %5550 = sst [smem:[#allocation35_spill]] %s5606_s0  ;;  %p4688_p3 = por %p207_p2, %p206_p1 }
  0x31   : > { %s196_s2 = ssub.s32 %s4500_s8, %s5606_s0  ;;  %p4697_p7 = por %p213_p5, %p212_p4 }
  0x32   : > { %p197_p6 = scmp.eq.s32.totalorder %s196_s2, 0  ;;  %p3631_p8 = scmp.ge.s32.totalorder %s4504_s4, 2 }
  0x33   : > { %s4706_s6 = sand.u32 (!%p3631_p8), 1, %s4492_s7   ;;  %s4709_s1 = sand.u32 (!%p3631_p8), 1, %s4504_s4  }
  0x34   : > { %s4702_s10 = scalar_select %p197_p6, %s4492_s7, %s199_s9  }
  0x35   : > { %799 = sbr.rel (%p3631_p8) target bundleno = 115 (0x73), region = 40  ;;  %s5554_s29 = sld [smem:[#allocation44_spill]] (!%p3631_p8) }
  0x36   : > { %5553 = sst [smem:[#allocation36_spill]] %s4702_s10  ;;  %s839_s0 = scalar_lea.vmem (!%p3631_p8), [#allocation5], %s4706_s6 }
  0x37   : > { %s846_s10 = sshll.u32 (!%p3631_p8), %s839_s0, 4  ;;  %s5518_s7 = scalar_lea.sflag (!%p3631_p8), [#allocation6], %s4709_s1  ;;  %s847_s10 = int_to_ptr.vmem [resolvable:$true] %s846_s10 }
  0x38   : > { %s5555_s11 = sld [smem:[#allocation48_spill]] (!%p3631_p8)  ;;  %s889_s24 = scalar_lea.vmem (!%p3631_p8), [#allocation8], %s4706_s6 }
  0x39   : > { %s896_s16 = sshll.u32 (!%p3631_p8), %s889_s24, 4  ;;  %s5519_s0 = scalar_lea.sflag (!%p3631_p8), [#allocation9], %s4709_s1  ;;  %s897_s16 = int_to_ptr.vmem [resolvable:$true] %s896_s16 }
  0x3a   : > { %s5556_s13 = sld [smem:[#allocation50_spill]]  ;;  %s5520_s24 = scalar_lea.sflag [#allocation12], %s4709_s1 }
  0x3b   : > { %s842_s9 = scalar_lea.hbm %s5554_s29, %s4500_s8  ;;  %s5557_s15 = sld [smem:[#allocation52_spill]] }
  0x3c   : > { %s844_s26 = sshll.u32 %s842_s9, 4  ;;  %s5558_s18 = sld [smem:[#allocation55_spill]]  ;;  %s845_s26 = int_to_ptr.hbm [resolvable:$true] %s844_s26 }
  0x3d   : > { %3796 = dma.hbm_to_vmem [thread:$0]  (%p4688_p3), %s845_s26, 16, %s847_s10, %s5518_s7  }
  0x3e   : > { %s892_s2 = scalar_lea.hbm %s5555_s11, %s4500_s8  ;;  %s928_s10 = scalar_lea.vmem [#allocation11], %s4706_s6 }
  0x3f   : > { %s894_s29 = sshll.u32 %s892_s2, 4  ;;  %s935_s27 = sshll.u32 %s928_s10, 4  ;;  %s895_s29 = int_to_ptr.hbm [resolvable:$true] %s894_s29  ;;  %s936_s27 = int_to_ptr.vmem [resolvable:$true] %s935_s27 }
  0x40   : > { %3798 = dma.hbm_to_vmem [thread:$0]  (%p4688_p3), %s895_s29, 16, %s897_s16, %s5519_s0  }
  0x41   : > { %s931_s25 = scalar_lea.hbm %s5556_s13, %s4500_s8  ;;  %s970_s29 = scalar_lea.hbm %s5557_s15, %s4500_s8 }
  0x42   : > { %s933_s2 = sshll.u32 %s931_s25, 4  ;;  %s972_s9 = sshll.u32 %s970_s29, 4  ;;  %s934_s2 = int_to_ptr.hbm [resolvable:$true] %s933_s2  ;;  %s973_s9 = int_to_ptr.hbm [resolvable:$true] %s972_s9 }
  0x43   : > { %3800 = dma.hbm_to_vmem [thread:$0]  (%p4688_p3), %s934_s2, 16, %s936_s27, %s5520_s24  }
  0x44   : > { %s967_s26 = scalar_lea.vmem [#allocation14], %s4706_s6  ;;  %s5521_s25 = scalar_lea.sflag [#allocation15], %s4709_s1 }
  0x45   : > { %s974_s0 = sshll.u32 %s967_s26, 4  ;;  %s1012_s7 = scalar_lea.hbm %s5558_s18, %s4500_s8  ;;  %s975_s0 = int_to_ptr.vmem [resolvable:$true] %s974_s0 }
  0x46   : > { %3802 = dma.hbm_to_vmem [thread:$0]  (%p4688_p3), %s973_s9, 16, %s975_s0, %s5521_s25  }
  0x47   : > { %s1009_s2 = scalar_lea.vmem [#allocation17], %s4706_s6  ;;  %s1014_s29 = sshll.u32 %s1012_s7, 4  ;;  %s1015_s29 = int_to_ptr.hbm [resolvable:$true] %s1014_s29 }
  0x48   : > { %s1016_s16 = sshll.u32 %s1009_s2, 4  ;;  %s5522_s26 = scalar_lea.sflag [#allocation18], %s4709_s1  ;;  %s1017_s16 = int_to_ptr.vmem [resolvable:$true] %s1016_s16 }
  0x49   : > { %3804 = dma.hbm_to_vmem [thread:$0]  (%p4688_p3), %s1015_s29, 16, %s1017_s16, %s5522_s26  }
  0x4a   : > { %s5559_s20 = sld [smem:[#allocation57_spill]]  ;;  %s1043_s27 = scalar_lea.vmem [#allocation20], %s4706_s6 }
  0x4b   : > { %s1050_s25 = sshll.u32 %s1043_s27, 4  ;;  %s5523_s7 = scalar_lea.sflag [#allocation21], %s4709_s1  ;;  %s1051_s25 = int_to_ptr.vmem [resolvable:$true] %s1050_s25 }
  0x4c   : > { %s1080_s24 = scalar_lea.hbm %s5506_s22, %s4500_s8  ;;  %s1077_s29 = scalar_lea.vmem [#allocation23], %s4706_s6 }
  0x4d   : > { %s1084_s0 = sshll.u32 %s1077_s29, 4  ;;  %s5524_s27 = scalar_lea.sflag [#allocation24], %s4709_s1  ;;  %s1085_s0 = int_to_ptr.vmem [resolvable:$true] %s1084_s0 }
  0x4e   : > { %s5561_s15 = sld [smem:[#allocation46_spill]]  ;;  %s1097_s29 = scalar_lea.hbm %s5507_s23, %s4500_s8 }
  0x4f   : > { %s5563_s12 = sld [smem:[#allocation49_spill]] }
  0x50   : > { %s1046_s9 = scalar_lea.hbm %s5559_s20, %s4500_s8  ;;  %s5565_s14 = sld [smem:[#allocation51_spill]] }
  0x51   : > { %s1048_s10 = sshll.u32 %s1046_s9, 4  ;;  %s1082_s9 = sshll.u32 %s1080_s24, 4  ;;  %s1049_s10 = int_to_ptr.hbm [resolvable:$true] %s1048_s10  ;;  %s1083_s9 = int_to_ptr.hbm [resolvable:$true] %s1082_s9 }
  0x52   : > { %3806 = dma.hbm_to_vmem [thread:$0]  (%p4688_p3), %s1049_s10, 16, %s1051_s25, %s5523_s7  }
  0x53   : > { %3808 = dma.hbm_to_vmem [thread:$0]  (%p4688_p3), %s1083_s9, 16, %s1085_s0, %s5524_s27  }
  0x54   : > { %s5560_s10 = sld [smem:[#allocation42_spill]]  ;;  %s814_s7 = scalar_lea.vmem [#allocation3], %s4706_s6 }
  0x55   : > { %s821_s11 = sshll.u32 %s814_s7, 4  ;;  %s812_s24 = scalar_lea.sflag [#allocation4], %s4706_s6  ;;  %s822_s11 = int_to_ptr.vmem [resolvable:$true] %s821_s11 }
  0x56   : > { %s867_s18 = scalar_lea.hbm %s5561_s15, %s4500_s8  ;;  %s864_s0 = scalar_lea.vmem [#allocation7], %s4706_s6 }
  0x57   : > { %s869_s20 = sshll.u32 %s867_s18, 4  ;;  %s871_s26 = sshll.u32 %s864_s0, 4  ;;  %s870_s20 = int_to_ptr.hbm [resolvable:$true] %s869_s20  ;;  %s872_s26 = int_to_ptr.vmem [resolvable:$true] %s871_s26 }
  0x58   : > { %s5562_s9 = scalar_lea.sflag [#allocation6], %s4709_s1  ;;  %s3632_s7 = sshll.u32 %s4706_s6, 4 }
  0x59   : > { %3797 = dma.hbm_to_vmem [thread:$0]  (%p4688_p3), %s870_s20, 16, %s872_s26, %s5562_s9  }
  0x5a   : > { %s817_s2 = scalar_lea.hbm %s5560_s10, %s4500_s8  ;;  %s3770_s25 = sshll.u32 %s4500_s8, 4 }
  0x5b   : > { %s819_s16 = sshll.u32 %s817_s2, 4  ;;  %s907_s15 = scalar_lea.vmem [#allocation10], %s3632_s7  ;;  %s820_s16 = int_to_ptr.hbm [resolvable:$true] %s819_s16 }
  0x5c   : > { %3795 = dma.hbm_to_vmem [thread:$0]  (%p4688_p3), %s820_s16, 16, %s822_s11, %s812_s24  }
  0x5d   : > { %s912_s11 = scalar_lea.hbm %s5563_s12, %s3770_s25  ;;  %s915_s18 = sshll.u32 %s907_s15, 4  ;;  %s916_s18 = int_to_ptr.vmem [resolvable:$true] %s915_s18 }
  0x5e   : > { %s913_s13 = sshll.u32 %s912_s11, 4  ;;  %s4506_s16 = smov 64   ;;  %s914_s13 = int_to_ptr.hbm [resolvable:$true] %s913_s13 }
  0x5f   : > { %s4507_s24 = smov 4   ;;  %s5564_s20 = scalar_lea.sflag [#allocation9], %s4709_s1 }
  0x60   : > { %3799 = dma.hbm_to_vmem [thread:$0]  (%p4688_p3), %s914_s13, 256, %s916_s18, %s5564_s20, %s4506_s16, %s4506_s16, %s4507_s24  }
  0x61   : > { %s951_s26 = scalar_lea.hbm %s5565_s14, %s3770_s25  ;;  %s946_s10 = scalar_lea.vmem [#allocation13], %s3632_s7 }
  0x62   : > { %s952_s9 = sshll.u32 %s951_s26, 4  ;;  %s954_s2 = sshll.u32 %s946_s10, 4  ;;  %s953_s9 = int_to_ptr.hbm [resolvable:$true] %s952_s9  ;;  %s955_s2 = int_to_ptr.vmem [resolvable:$true] %s954_s2 }
  0x63   : > { %s5566_s11 = scalar_lea.sflag [#allocation12], %s4709_s1  ;;  %s5567_s17 = sld [smem:[#allocation54_spill]] }
  0x64   : > { %3801 = dma.hbm_to_vmem [thread:$0]  (%p4688_p3), %s953_s9, 256, %s955_s2, %s5566_s11, %s4506_s16, %s4506_s16, %s4507_s24  }
  0x65   : > { %s992_s20 = scalar_lea.vmem [#allocation16], %s4706_s6  ;;  %s5568_s7 = scalar_lea.sflag [#allocation15], %s4709_s1 }
  0x66   : > { %s999_s25 = sshll.u32 %s992_s20, 4  ;;  %s5569_s19 = sld [smem:[#allocation56_spill]]  ;;  %s1000_s25 = int_to_ptr.vmem [resolvable:$true] %s999_s25 }
  0x67   : > { %s1026_s27 = scalar_lea.vmem [#allocation19], %s4706_s6  ;;  %s5570_s9 = scalar_lea.sflag [#allocation18], %s4709_s1 }
  0x68   : > { %s1033_s26 = sshll.u32 %s1026_s27, 4  ;;  %s1063_s11 = scalar_lea.hbm %s5505_s21, %s4500_s8  ;;  %s1034_s26 = int_to_ptr.vmem [resolvable:$true] %s1033_s26 }
  0x69   : > { %s995_s13 = scalar_lea.hbm %s5567_s17, %s4500_s8  ;;  %s1065_s15 = sshll.u32 %s1063_s11, 4  ;;  %s1066_s15 = int_to_ptr.hbm [resolvable:$true] %s1065_s15 }
  0x6a   : > { %s997_s18 = sshll.u32 %s995_s13, 4  ;;  %s1060_s13 = scalar_lea.vmem [#allocation22], %s4706_s6  ;;  %s998_s18 = int_to_ptr.hbm [resolvable:$true] %s997_s18 }
  0x6b   : > { %3803 = dma.hbm_to_vmem [thread:$0]  (%p4688_p3), %s998_s18, 16, %s1000_s25, %s5568_s7  }
  0x6c   : > { %s1029_s16 = scalar_lea.hbm %s5569_s19, %s4500_s8  ;;  %s1067_s18 = sshll.u32 %s1060_s13, 4  ;;  %s1068_s18 = int_to_ptr.vmem [resolvable:$true] %s1067_s18 }
  0x6d   : > { %s1031_s24 = sshll.u32 %s1029_s16, 4  ;;  %s5571_s20 = scalar_lea.sflag [#allocation21], %s4709_s1  ;;  %s1032_s24 = int_to_ptr.hbm [resolvable:$true] %s1031_s24 }
  0x6e   : > { %3805 = dma.hbm_to_vmem [thread:$0]  (%p4688_p3), %s1032_s24, 16, %s1034_s26, %s5570_s9  }
  0x6f   : > { %3807 = dma.hbm_to_vmem [thread:$0]  (%p4688_p3), %s1066_s15, 16, %s1068_s18, %s5571_s20  }
  0x70   : > { %s1099_s0 = sshll.u32 %s1097_s29, 4  ;;  %s1094_s16 = scalar_lea.vmem [#allocation25], %s4706_s6  ;;  %s1100_s0 = int_to_ptr.hbm [resolvable:$true] %s1099_s0 }
  0x71   : > { %s1101_s27 = sshll.u32 %s1094_s16, 4  ;;  %s5572_s24 = scalar_lea.sflag [#allocation24], %s4709_s1  ;;  %s1102_s27 = int_to_ptr.vmem [resolvable:$true] %s1101_s27 }
  0x72   : > { %3809 = dma.hbm_to_vmem [thread:$0]  (%p4688_p3), %s1100_s0, 16, %s1102_s27, %s5572_s24  }
  0x73 PF: > { %p3638_p9 = scmp.ge.s32.totalorder %s4504_s4, 1  ;;  %p1106_p10 = scmp.lt.s32.totalorder %s4504_s4, 3 }
  0x75   : > { %p1107_p11 = pnand %p3638_p9, %p1106_p10 }
  0x76   : > { %s4853_s26 = sand.u32 (!%p1107_p11), 1, %s4488_s3  }
  0x77   : > { %1110 = sbr.rel (%p1107_p11) target bundleno = 3374 (0xd2e), region = 124  ;;  %s1113_s6 = scalar_lea.sflag (!%p1107_p11), [#allocation4], %s4853_s26 }
  0x7c   : > { %4451 = dma.done.wait (%p4697_p7), %s1113_s6, 16  }
  0x7d   : > { %4453 = vsyncadd (%p4697_p7), %s1113_s6, 4294967280  ;;  %s5573_s30 = sadd.s32 4294967295, %s4504_s4  }
  0x7e   : > { %s4863_s1 = sand.u32 1, %s5573_s30  }
  0x7f   : > { %s1122_s10 = scalar_lea.sflag [#allocation6], %s4863_s1 }
  0x80   : > { %4455 = dma.done.wait (%p4697_p7), %s1122_s10, 32  }
  0x81   : > { %4457 = vsyncadd (%p4697_p7), %s1122_s10, 4294967264  ;;  %s1140_s15 = scalar_lea.sflag [#allocation9], %s4863_s1 }
  0x82   : > { %4459 = dma.done.wait (%p4697_p7), %s1140_s15, 272  }
  0x83   : > { %4461 = vsyncadd (%p4697_p7), %s1140_s15, 4294967024  ;;  %s3639_s18 = sshll.u32 %s4853_s26, 4  ;;  %s1159_s25 = scalar_lea.sflag [#allocation12], %s4863_s1 }
  0x84   : > { %s4879_s20 = scalar_lea.vmem [#allocation10], %s3639_s18 }
  0x85   : > { %4463 = dma.done.wait (%p4697_p7), %s1159_s25, 272  }
  0x86   : > { %4465 = vsyncadd (%p4697_p7), %s1159_s25, 4294967024  ;;  %s4887_s29 = scalar_lea.vmem [#allocation13], %s3639_s18  ;;  %s1178_s0 = scalar_lea.sflag [#allocation15], %s4863_s1 }
  0x87   : > { %4467 = dma.done.wait (%p4697_p7), %s1178_s0, 32  }
  0x88   : > { %4469 = vsyncadd (%p4697_p7), %s1178_s0, 4294967264  ;;  %s1196_s24 = scalar_lea.sflag [#allocation18], %s4863_s1 }
  0x89   : > { %4471 = dma.done.wait (%p4697_p7), %s1196_s24, 32  }
  0x8a   : > { %4473 = vsyncadd (%p4697_p7), %s1196_s24, 4294967264  ;;  %s1214_s10 = scalar_lea.sflag [#allocation21], %s4863_s1 }
  0x8b   : > { %4475 = dma.done.wait (%p4697_p7), %s1214_s10, 32  }
  0x8c   : > { %4477 = vsyncadd (%p4697_p7), %s1214_s10, 4294967264  ;;  %s1232_s25 = scalar_lea.sflag [#allocation24], %s4863_s1 }
  0x8d   : > { %4479 = dma.done.wait (%p4697_p7), %s1232_s25, 32  }
  0x8e   : > { %4481 = vsyncadd (%p4697_p7), %s1232_s25, 4294967264  ;;  %p1419_p12 = scmp.lt.s32.totalorder %s4496_s28, 1  ;;  %s5574_s7 = sld [smem:[#allocation41_spill]] }
  0x8f   : > { %s5575_s1 = sld [smem:[#allocation43_spill]]  ;;  %p3651_p13 = scmp.ne.s32.totalorder %s4496_s28, 0 }
  0x90   : > { %s1420_s24 = scalar_select %p1419_p12, %s4496_s28, 1 }
  0x91   : > { %s5576_s5 = sld [smem:[#allocation45_spill]] }
  0x92   : > { %s3772_s27 = sshll.u32 %s1420_s24, 4  ;;  %s3776_s16 = sshll.u32 %s1420_s24, 5 }
  0x93   : > { %s5577_s12 = sld [smem:[#allocation47_spill]] }
  0x94   : > { %s1423_s11 = scalar_lea.vmem %s5574_s7, %s3772_s27  ;;  %s5578_s19 = sld [smem:[#allocation53_spill]] }
  0x95   : > { %s4924_s0 = scalar_lea.vmem %s5575_s1, %s3772_s27  ;;  %s1243_s7 = scalar_lea.vmem [#allocation25], %s4853_s26 }
  0x96   : > { %1454 = sbr.rel (%p3651_p13) target bundleno = 159 (0x9f), region = 188  ;;  %s5579_s10 = sld [smem:[#allocation37_spill]] (!%p3651_p13) }
  0x97   : > { %s4929_s25 = scalar_lea.vmem %s5576_s5, %s3772_s27 }
  0x99   : > { %s4934_s14 = scalar_lea.vmem %s5577_s12, %s3772_s27 }
  0x9a   : > { %s4939_s15 = scalar_lea.vmem %s5578_s19, %s3776_s16 }
  0x9b   : > { %vm1457_vm0 = vcmask 261120  }
  0x9c   : > { %v1455_v0 = vld [vmem:[%s5579_s10] sm:$0xff]  ;;  %v1456_v1 = vld [vmem:[%s5579_s10 + $0x8] sm:$0xff] }
  0x9d   : > { %1458 = vst.msk [vmem:[#allocation2] sm:$0xff] %vm1457_vm0, %v1455_v0 }
  0x9e   : > { %1459 = vst.msk [vmem:[#allocation2 + $0x8] sm:$0xff] %vm1457_vm0, %v1456_v1 }
  0x9f PF: > { %v3778_v2 = vld [vmem:[%s1423_s11 + $0x8] sm:$0xff]  ;;  %v3777_v3 = vld [vmem:[%s1423_s11] sm:$0xff]  ;;  %vm1521_vm1 = vcmask 261120   ;;  %s5580_s12 = scalar_lea.vmem [#allocation3], %s4853_s26  ;;  %s4508_s17 = smov 112   ;;  %vm1577_vm2 = vcmask 64512  }
  0xa0   : > { %1531 = vmatpush.bf16.msra.mxu0 %v3778_v2  ;;  %v3914_v7 = vld [vmem:[%s5580_s12] ss:$0 sm:$0xff]  ;;  %s4509_s19 = smov 120   ;;  %s4510_s9 = smov 104   ;;  %vm1859_vm3 = vcmask 1043456   ;;  %vm2049_vm4 = vcmask 130048  }
  0xa1   : > { %s4511_s2 = smov 96   ;;  %s4512_s11 = smov 64   ;;  %vm2052_vm5 = vcmask 195584   ;;  %vm1478_vm6 = vcmask 1041408   ;;  %vm1482_vm7 = vcmask 1043458   ;;  %vm2556_vm15 = vcmask 97280  }
  0xa2   : > { %s5581_s1 = sld [smem:[#allocation39_spill]]  ;;  %s4513_s5 = smov 8   ;;  %vm2665_vm0 = vcmask 1045504  }
  0xa3   : > { %s4514_s24 = smov 24   ;;  %s4515_s30 = smov 16  }
  0xa4   : > { %v4949_v4 = vld [vmem:[#allocation2] sm:$0xff]  ;;  %1532 = vmatpush.bf16.msra.mxu0 %v3777_v3  ;;  %s5582_s13 = sld [smem:[#allocation38_spill]]  ;;  %s5586_s18 = scalar_lea.vmem [#allocation19], %s4853_s26 }
  0xa5   : > { %v4951_v5 = vld [vmem:[#allocation2 + $0x8] sm:$0xff]  ;;  %s5587_s6 = scalar_lea.vmem [#allocation7], %s4853_s26  ;;  %p3756_p0 = scmp.ne.s32.totalorder %s4496_s28, 1 }
  0xa6   : > { %v1500_v6 = vpack.c.bf16 %v4951_v5, %v4949_v4 }
  0xa8   : > { %3660 = vmatmul.msk.bf16.vlgmr.msra.gmra.mxu0 %vm1521_vm1, %v1500_v6  ;;  %v1498_v0 = vld [vmem:[%s5581_s1] sm:$0xff]  ;;  %s5596_s1 = sld [smem:[#allocation59_spill]] (!%p3756_p0) }
 0x125   : > { %v1534_v8 = vpop.f32.mrf.mxu0 }
 0x126   : > { %v1535_v9 = vadd.f32 %v3914_v7, %v1534_v8 }
 0x128   : > { %v1557_v10 = vpack.c.bf16 %v1535_v9, %v1535_v9  ;;  %v1539_v14 = vmul.f32 0.35355338, %v1535_v9 }
 0x12a   : > { %1565 = vrot.lane.b32.xlu2 %v1557_v10, %s4508_s17  ;;  %1561 = vrot.lane.b32.xlu0 %v1557_v10, %s4509_s19  ;;  %v1541_v16 = vpack.c.bf16 %v1539_v14, %v1539_v14  ;;  %v1573_v18 = vunpack.c.l.b16 %v1557_v10 }
 0x12c   : > { %v1574_v19 = vpack.c.b16 %v1573_v18, %v1573_v18 }
 0x12d   : > { %v1536_v11 = vpop.f32.mrf.mxu0 }
 0x12e   : > { %v1537_v12 = vadd.f32 %v3914_v7, %v1536_v11 }
 0x130   : > { %v1558_v13 = vpack.c.bf16 %v1537_v12, %v1537_v12  ;;  %v1540_v30 = vmul.f32 0.35355338, %v1537_v12 }
 0x132   : > { %1567 = vrot.lane.b32.xlu1 %v1558_v13, %s4508_s17  ;;  %1571 = vrot.lane.b32.xlu2 %v1558_v13, %s4510_s9  ;;  %v1597_v15 = vunpack.c.l.b16 %v1558_v13  ;;  %v1542_v35 = vpack.c.bf16 %v1540_v30, %v1540_v30 }
 0x133   : > { %1563 = vrot.lane.b32.xlu0 %v1558_v13, %s4509_s19 }
 0x134   : > { %v1598_v17 = vpack.c.b16 %v1597_v15, %v1597_v15 }
 0x13a   : > { %1569 = vrot.lane.b32.xlu1 %v1557_v10, %s4510_s9  ;;  %1545 = vrot.lane.b32.xlu2 %v1541_v16, %s4509_s19 }
 0x13b   : > { %1599 = vrot.lane.b32.xlu0 %v1598_v17, %s4511_s2 }
 0x143   : > { %1575 = vrot.lane.b32.xlu0 %v1574_v19, %s4511_s2 }
 0x184   : > { %v1566_v26 = vpop.permute.xlu2 %1565 }
 0x185   : > { %v1666_v39 = vunpack.c.l.b16 %v1566_v26 }
 0x187   : > { %v4987_v43 = vpack.c.b16 %v1666_v39, %v1666_v39 }
 0x18c   : > { %v1572_v37 = vpop.permute.xlu2 %1571 }
 0x18d   : > { %v1735_v38 = vunpack.c.l.b16 %v1572_v37 }
 0x18f   : > { %v4985_v42 = vpack.c.b16 %v1735_v38, %v1735_v38 }
 0x194   : > { %v1546_v44 = vpop.permute.xlu2 %1545 }
 0x19c   : > { %v1562_v20 = vpop.permute.xlu0 %1561 }
 0x19d   : > { %v1620_v21 = vunpack.c.l.b16 %v1562_v20 }
 0x19f   : > { %v1621_v22 = vpack.c.b16 %v1620_v21, %v1620_v21 }
 0x1a1   : > { %1622 = vrot.lane.b32.xlu1 %v1621_v22, %s4511_s2 }
 0x1a4   : > { %v1568_v23 = vpop.permute.xlu1 %1567 }
 0x1a5   : > { %v1689_v24 = vunpack.c.l.b16 %v1568_v23  ;;  %v1564_v25 = vpop.permute.xlu0 %1563 }
 0x1a6   : > { %v1643_v27 = vunpack.c.l.b16 %v1564_v25 }
 0x1a7   : > { %v4968_v28 = vpack.c.b16 %v1689_v24, %v1689_v24 }
 0x1a8   : > { %v4970_v29 = vpack.c.b16 %v1643_v27, %v1643_v27 }
 0x1a9   : > { %1691 = vrot.lane.b32.xlu2 %v4968_v28, %s4511_s2 }
 0x1aa   : > { %1645 = vrot.lane.b32.xlu1 %v4970_v29, %s4511_s2 }
 0x1ac   : > { %v1570_v31 = vpop.permute.xlu1 %1569 }
 0x1ad   : > { %v1712_v32 = vunpack.c.l.b16 %v1570_v31  ;;  %v1600_v33 = vpop.permute.xlu0 %1599 }
 0x1ae   : > { %v1605_v34 = vsel %vm1577_vm2, %v1600_v33, 0 }
 0x1af   : > { %v4977_v36 = vpack.c.b16 %v1712_v32, %v1712_v32  ;;  %1614 = vmatpush.bf16.xpose.msra.mxu2 %v1605_v34 }
 0x1b1   : > { %1714 = vrot.lane.b32.xlu0 %v4977_v36, %s4511_s2  ;;  %1551 = vrot.lane.b32.xlu2 %v1542_v35, %s4508_s17 }
 0x1b2   : > { %1547 = vrot.lane.b32.xlu1 %v1542_v35, %s4509_s19 }
 0x1b5   : > { %v1576_v40 = vpop.permute.xlu0 %1575 }
 0x1b6   : > { %3662 = vmatmul.msk.bf16.vlgmr.msra.gmra.mxu2 %vm1577_vm2, %v1542_v35  ;;  %v1582_v41 = vsel %vm1577_vm2, %v1576_v40, 0 }
 0x1b7   : > { %1591 = vmatpush.bf16.xpose.msra.mxu1 %v1582_v41 }
 0x1b9   : > { %1553 = vrot.lane.b32.xlu0 %v1541_v16, %s4510_s9  ;;  %1737 = vrot.lane.b32.xlu2 %v4985_v42, %s4511_s2 }
 0x1ba   : > { %1668 = vrot.lane.b32.xlu1 %v4987_v43, %s4511_s2 }
 0x1be   : > { %3661 = vmatmul.msk.bf16.vlgmr.msra.gmra.mxu1 %vm1577_vm2, %v1541_v16 }
 0x1c1   : > { %1549 = vrot.lane.b32.xlu0 %v1541_v16, %s4508_s17  ;;  %1897 = vrot.lane.b32.xlu2 %v1621_v22, %s4512_s11 }
 0x1c2   : > { %1555 = vrot.lane.b32.xlu1 %v1542_v35, %s4510_s9 }
 0x1c9   : > { %1854 = vrot.lane.b32.xlu0 %v1574_v19, %s4512_s11 }
 0x1ca   : > { %1876 = vrot.lane.b32.xlu1 %v1598_v17, %s4512_s11 }
 0x203   : > { %v1692_v45 = vpop.permute.xlu2 %1691 }
 0x204   : > { %v1697_v46 = vsel %vm1577_vm2, %v1692_v45, 0 }
 0x205   : > { %1706 = vmatpush.bf16.xpose.msrb.mxu2 %v1697_v46 }
 0x20b   : > { %v1552_v47 = vpop.permute.xlu2 %1551 }
 0x20c   : > { %3666 = vmatmul.msk.bf16.vlgmr.msrb.gmra.mxu2 %vm1577_vm2, %v1552_v47 }
 0x213   : > { %v1623_v48 = vpop.permute.xlu1 %1622  ;;  %v1738_v50 = vpop.permute.xlu2 %1737 }
 0x214   : > { %v1628_v49 = vsel %vm1577_vm2, %v1623_v48, 0  ;;  %v1743_v53 = vsel %vm1577_vm2, %v1738_v50, 0 }
 0x215   : > { %1637 = vmatpush.bf16.xpose.msra.mxu3 %v1628_v49 }
 0x21b   : > { %v1898_v54 = vpop.permute.xlu2 %1897 }
 0x21c   : > { %v1646_v51 = vpop.permute.xlu1 %1645  ;;  %3663 = vmatmul.msk.bf16.vlgmr.msra.gmra.mxu3 %vm1577_vm2, %v1546_v44  ;;  %v1903_v58 = vsel %vm1859_vm3, %v1898_v54, 0 }
 0x21d   : > { %v1651_v52 = vsel %vm1577_vm2, %v1646_v51, 0 }
 0x21e   : > { %1660 = vmatpush.bf16.xpose.msrb.mxu0 %v1651_v52 }
 0x223   : > { %v1715_v55 = vpop.permute.xlu0 %1714 }
 0x224   : > { %v1548_v56 = vpop.permute.xlu1 %1547  ;;  %v1720_v57 = vsel %vm1577_vm2, %v1715_v55, 0 }
 0x225   : > { %3664 = vmatmul.msk.bf16.vlgmr.msrb.gmra.mxu0 %vm1577_vm2, %v1548_v56  ;;  %1729 = vmatpush.bf16.xpose.msrb.mxu3 %v1720_v57 }
 0x226   : > { %1752 = vmatpush.bf16.xpose.msra.mxu0 %v1743_v53 }
 0x22b   : > { %v1554_v59 = vpop.permute.xlu0 %1553 }
 0x22c   : > { %v1669_v60 = vpop.permute.xlu1 %1668  ;;  %3667 = vmatmul.msk.bf16.vlgmr.msrb.gmra.mxu3 %vm1577_vm2, %v1554_v59 }
 0x22d   : > { %1912 = vmatpush.bf16.msra.mxu3 %v1903_v58  ;;  %v1674_v61 = vsel %vm1577_vm2, %v1669_v60, 0 }
 0x22e   : > { %1683 = vmatpush.bf16.xpose.msrb.mxu1 %v1674_v61 }
 0x233   : > { %v1550_v62 = vpop.permute.xlu0 %1549 }
 0x234   : > { %v1556_v63 = vpop.permute.xlu1 %1555 }
 0x235   : > { %3665 = vmatmul.msk.bf16.vlgmr.msrb.gmra.mxu1 %vm1577_vm2, %v1550_v62  ;;  %3668 = vmatmul.msk.bf16.vlgmr.msra.gmra.mxu0 %vm1577_vm2, %v1556_v63 }
 0x239   : > { %v1616_v1 = vpop.f32.mrf.mxu2 }
 0x23a   : > { %v1617_v2 = vadd.f32 %v1616_v1, %v1498_v0 }
 0x23b   : > { %v1593_v3 = vpop.f32.mrf.mxu1  ;;  %v1855_v6 = vpop.permute.xlu0 %1854 }
 0x23c   : > { %v1594_v7 = vadd.f32 %v1593_v3, %v1498_v0  ;;  %v1877_v8 = vpop.permute.xlu1 %1876  ;;  %v1861_v9 = vsel %vm1859_vm3, %v1855_v6, 0  ;;  %v1761_v10 = vsel %vm1577_vm2, %v1617_v2, -inf }
 0x23d   : > { %v1882_v11 = vsel %vm1859_vm3, %v1877_v8, 0  ;;  %1762 = vmax.xlane.f32.xlu2 %v1761_v10  ;;  %1870 = vmatpush.bf16.msra.mxu1 %v1861_v9 }
 0x23e   : > { %1891 = vmatpush.bf16.msra.mxu2 %v1882_v11  ;;  %v1758_v12 = vsel %vm1577_vm2, %v1594_v7, -inf }
 0x23f   : > { %1759 = vmax.xlane.f32.xlu1 %v1758_v12 }
 0x241   : > { %v1618_v13 = vpop.f32.mrf.mxu2 }
 0x243   : > { %v1595_v14 = vpop.f32.mrf.mxu1 }
 0x258   : > { %1918 = vrot.lane.b32.xlu1 %v4970_v29, %s4512_s11 }
 0x28f   : > { %v1708_v15 = vpop.f32.mrf.mxu2 }
 0x290   : > { %v1709_v49 = vadd.f32 %v1708_v15, %v1498_v0 }
 0x292   : > { %v1773_v50 = vsel %vm1577_vm2, %v1709_v49, -inf }
 0x297   : > { %v1710_v16 = vpop.f32.mrf.mxu2 }
 0x29f   : > { %v1639_v17 = vpop.f32.mrf.mxu3 }
 0x2a0   : > { %v1640_v18 = vadd.f32 %v1639_v17, %v1498_v0 }
 0x2a2   : > { %v1662_v19 = vpop.f32.mrf.mxu0  ;;  %v1764_v20 = vsel %vm1577_vm2, %v1640_v18, -inf }
 0x2a3   : > { %v1663_v21 = vadd.f32 %v1662_v19, %v1498_v0  ;;  %1765 = vmax.xlane.f32.xlu0 %v1764_v20 }
 0x2a5   : > { %v1767_v22 = vsel %vm1577_vm2, %v1663_v21, -inf }
 0x2a6   : > { %1768 = vmax.xlane.f32.xlu2 %v1767_v22 }
 0x2a7   : > { %v1641_v23 = vpop.f32.mrf.mxu3 }
 0x2aa   : > { %v1664_v24 = vpop.f32.mrf.mxu0 }
 0x2af   : > { %v1731_v25 = vpop.f32.mrf.mxu3 }
 0x2b0   : > { %v1732_v26 = vadd.f32 %v1731_v25, %v1498_v0  ;;  %v1763_v27 = vpop.xlane.xlu2 %1762 }
 0x2b1   : > { %v1783_v30 = vsub.f32 %v1617_v2, %v1763_v27 }
 0x2b2   : > { %v1685_v31 = vpop.f32.mrf.mxu1  ;;  %v1754_v29 = vpop.f32.mrf.mxu0  ;;  %v1776_v32 = vsel %vm1577_vm2, %v1732_v26, -inf }
 0x2b3   : > { %v1792_v33 = vmul.f32 1.442695, %v1783_v30  ;;  %v1686_v34 = vadd.f32 %v1685_v31, %v1498_v0  ;;  %v1760_v35 = vpop.xlane.xlu1 %1759  ;;  %1777 = vmax.xlane.f32.xlu0 %v1776_v32  ;;  %v1755_v52 = vadd.f32 %v1754_v29, %v1498_v0 }
 0x2b4   : > { %v1782_v37 = vsub.f32 %v1594_v7, %v1760_v35 }
 0x2b5   : > { %3927 = vpow2.f32 %v1792_v33  ;;  %v1770_v38 = vsel %vm1577_vm2, %v1686_v34, -inf  ;;  %v1779_v54 = vsel %vm1577_vm2, %v1755_v52, -inf }
 0x2b6   : > { %v1790_v39 = vmul.f32 1.442695, %v1782_v37  ;;  %1771 = vmax.xlane.f32.xlu1 %v1770_v38 }
 0x2b7   : > { %v1733_v40 = vpop.f32.mrf.mxu3 }
 0x2b8   : > { %3929 = vpow2.f32 %v1790_v39 }
 0x2ba   : > { %v1687_v41 = vpop.f32.mrf.mxu1  ;;  %v1756_v44 = vpop.f32.mrf.mxu0 }
 0x2bb   : > { %v3928_v45 = vpop.eup %3927 }
 0x2bc   : > { %v1809_v46 = vsel %vm1577_vm2, %v3928_v45, 0.0 }
 0x2bd   : > { %1810 = vadd.xlane.f32.xlu0 %v1809_v46 }
 0x2be   : > { %v3930_v47 = vpop.eup %3929 }
 0x2bf   : > { %v1806_v48 = vsel %vm1577_vm2, %v3930_v47, 0.0 }
 0x2c0   : > { %1807 = vadd.xlane.f32.xlu2 %v1806_v48 }
 0x2c8   : > { %1774 = vmax.xlane.f32.xlu2 %v1773_v50 }
 0x2ca   : > { %v1919_v51 = vpop.permute.xlu1 %1918 }
 0x2cb   : > { %v1924_v53 = vsel %vm1859_vm3, %v1919_v51, 0 }
 0x2cc   : > { %1933 = vmatpush.bf16.msrb.mxu0 %v1924_v53 }
 0x2d0   : > { %1780 = vmax.xlane.f32.xlu2 %v1779_v54 }
 0x2e8   : > { %1960 = vrot.lane.b32.xlu2 %v4968_v28, %s4512_s11 }
 0x316   : > { %v1766_v58 = vpop.xlane.xlu0 %1765 }
 0x317   : > { %v1784_v2 = vsub.f32 %v1640_v18, %v1766_v58 }
 0x319   : > { %v1769_v55 = vpop.xlane.xlu2 %1768  ;;  %v1794_v6 = vmul.f32 1.442695, %v1784_v2 }
 0x31a   : > { %v1785_v56 = vsub.f32 %v1663_v21, %v1769_v55 }
 0x31c   : > { %v1796_v57 = vmul.f32 1.442695, %v1785_v56 }
 0x31e   : > { %3931 = vpow2.f32 %v1796_v57 }
 0x324   : > { %v3932_v59 = vpop.eup %3931 }
 0x325   : > { %v1815_v60 = vsel %vm1577_vm2, %v3932_v59, 0.0 }
 0x326   : > { %1816 = vadd.xlane.f32.xlu0 %v1815_v60  ;;  %v1778_v61 = vpop.xlane.xlu0 %1777 }
 0x327   : > { %v1788_v62 = vsub.f32 %v1732_v26, %v1778_v61 }
 0x329   : > { %v1802_v63 = vmul.f32 1.442695, %v1788_v62  ;;  %v1772_v0 = vpop.xlane.xlu1 %1771 }
 0x32a   : > { %v1786_v1 = vsub.f32 %v1686_v34, %v1772_v0 }
 0x32b   : > { %3933 = vpow2.f32 %v1802_v63 }
 0x32c   : > { %v1798_v3 = vmul.f32 1.442695, %v1786_v1 }
 0x32e   : > { %3935 = vpow2.f32 %v1798_v3 }
 0x330   : > { %v1811_v28 = vpop.xlane.xlu0 %1810 }
 0x331   : > { %v5034_v7 = vpop.eup %3933  ;;  %3937 = vrcp.f32 %v1811_v28 }
 0x332   : > { %v1824_v8 = vsel %vm1577_vm2, %v5034_v7, 0.0  ;;  %3939 = vpow2.f32 %v1794_v6 }
 0x333   : > { %v1808_v9 = vpop.xlane.xlu2 %1807  ;;  %1825 = vadd.xlane.f32.xlu2 %v1824_v8 }
 0x334   : > { %v5038_v10 = vpop.eup %3935  ;;  %3941 = vrcp.f32 %v1808_v9 }
 0x335   : > { %v1818_v11 = vsel %vm1577_vm2, %v5038_v10, 0.0 }
 0x336   : > { %1819 = vadd.xlane.f32.xlu1 %v1818_v11 }
 0x337   : > { %v3938_v12 = vpop.eup %3937 }
 0x338   : > { %v1839_v13 = vmul.f32 %v3938_v12, %v3928_v45  ;;  %v3940_v14 = vpop.eup %3939 }
 0x339   : > { %v1812_v21 = vsel %vm1577_vm2, %v3940_v14, 0.0 }
 0x33a   : > { %v3942_v15 = vpop.eup %3941  ;;  %v1847_v16 = vpack.c.bf16 %v1839_v13, %v1839_v13 }
 0x33b   : > { %v1838_v17 = vmul.f32 %v3942_v15, %v3930_v47  ;;  %v1775_v18 = vpop.xlane.xlu2 %1774 }
 0x33c   : > { %v1787_v19 = vsub.f32 %v1709_v49, %v1775_v18  ;;  %3670 = vmatmul.msk.bf16.vlgmr.msra.gmra.mxu2 %vm1577_vm2, %v1847_v16 }
 0x33d   : > { %v1846_v20 = vpack.c.bf16 %v1838_v17, %v1838_v17 }
 0x33e   : > { %v1800_v22 = vmul.f32 1.442695, %v1787_v19  ;;  %1813 = vadd.xlane.f32.xlu1 %v1812_v21  ;;  %v3780_v19 = vld [vmem:[%s4924_s0 + $0x8] sm:$0xff] }
 0x33f   : > { %3669 = vmatmul.msk.bf16.vlgmr.msra.gmra.mxu1 %vm1577_vm2, %v1846_v20  ;;  %v3779_v20 = vld [vmem:[%s4924_s0] sm:$0xff]  ;;  %s5584_s0 = scalar_lea.vmem [#allocation8], %s4853_s26 }
 0x340   : > { %3943 = vpow2.f32 %v1800_v22 }
 0x343   : > { %v1781_v23 = vpop.xlane.xlu2 %1780 }
 0x344   : > { %v1789_v24 = vsub.f32 %v1755_v52, %v1781_v23 }
 0x346   : > { %v3944_v25 = vpop.eup %3943  ;;  %v1804_v26 = vmul.f32 1.442695, %v1789_v24 }
 0x347   : > { %v1821_v27 = vsel %vm1577_vm2, %v3944_v25, 0.0 }
 0x348   : > { %3945 = vpow2.f32 %v1804_v26  ;;  %1822 = vadd.xlane.f32.xlu0 %v1821_v27 }
 0x34b   : > { %v1961_v30 = vpop.permute.xlu2 %1960  ;;  %2002 = vrot.lane.b32.xlu2 %v4985_v42, %s4512_s11 }
 0x34c   : > { %v1966_v31 = vsel %vm1859_vm3, %v1961_v30, 0 }
 0x34d   : > { %1975 = vmatpush.bf16.msrb.mxu2 %v1966_v31 }
 0x34e   : > { %v3946_v29 = vpop.eup %3945 }
 0x34f   : > { %v1827_v32 = vsel %vm1577_vm2, %v3946_v29, 0.0 }
 0x350   : > { %1828 = vadd.xlane.f32.xlu0 %v1827_v32 }
 0x357   : > { %1981 = vrot.lane.b32.xlu1 %v4977_v36, %s4512_s11 }
 0x364   : > { %1939 = vrot.lane.b32.xlu0 %v4987_v43, %s4512_s11 }
 0x399   : > { %v1817_v33 = vpop.xlane.xlu0 %1816 }
 0x39a   : > { %3947 = vrcp.f32 %v1817_v33 }
 0x3a0   : > { %v3948_v34 = vpop.eup %3947 }
 0x3a1   : > { %v1841_v35 = vmul.f32 %v3948_v34, %v3932_v59 }
 0x3a3   : > { %v1849_v37 = vpack.c.bf16 %v1841_v35, %v1841_v35 }
 0x3a5   : > { %3672 = vmatmul.msk.bf16.vlgmr.msrb.gmra.mxu0 %vm1577_vm2, %v1849_v37 }
 0x3a6   : > { %v1826_v42 = vpop.xlane.xlu2 %1825 }
 0x3a9   : > { %v1820_v38 = vpop.xlane.xlu1 %1819 }
 0x3ae   : > { %v2003_v39 = vpop.permute.xlu2 %2002 }
 0x3af   : > { %v2008_v40 = vsel %vm1859_vm3, %v2003_v39, 0  ;;  %v1462_v39 = vld [vmem:[%s5582_s13] sm:$0xff] }
 0x3b0   : > { %2017 = vmatpush.bf16.msra.mxu0 %v2008_v40  ;;  %v1463_v40 = vld [vmem:[%s5582_s13 + $0x8] sm:$0xf] }
 0x3b1   : > { %v1814_v41 = vpop.xlane.xlu1 %1813 }
 0x3b2   : > { %3949 = vrcp.f32 %v1814_v41  ;;  %v1464_v41 = vld [vmem:[%s5582_s13 + $0x10] sm:$0xff] }
 0x3b8   : > { %v3950_v44 = vpop.eup %3949 }
 0x3b9   : > { %v1840_v36 = vmul.f32 %v3950_v44, %v3940_v14  ;;  %v1466_v44 = vpack.c.bf16 %v1462_v39, %v1462_v39 }
 0x3bb   : > { %v1848_v45 = vpack.c.bf16 %v1840_v36, %v1840_v36  ;;  %v1823_v46 = vpop.xlane.xlu0 %1822  ;;  %v1465_v36 = vld [vmem:[%s5582_s13 + $0x18] sm:$0xf] }
 0x3bc   : > { %3951 = vrcp.f32 %v1823_v46  ;;  %v5056_v43 = vpop.f32.mrf.mxu1  ;;  %v1467_v46 = vpack.c.bf16 %v1463_v40, %v1463_v40 }
 0x3bd   : > { %3671 = vmatmul.msk.bf16.vlgmr.msra.gmra.mxu3 %vm1577_vm2, %v1848_v45  ;;  %3953 = vrcp.f32 %v1826_v42  ;;  %v3783_v45 = vld [vmem:[%s4934_s14] sm:$0xff] }
 0x3bf   : > { %v5059_v47 = vpop.f32.mrf.mxu2 }
 0x3c2   : > { %v3952_v48 = vpop.eup %3951 }
 0x3c3   : > { %v1843_v49 = vmul.f32 %v3952_v48, %v3944_v25  ;;  %v1829_v50 = vpop.xlane.xlu0 %1828  ;;  %v3954_v52 = vpop.eup %3953  ;;  %v1474_v48 = vrot.slane %v1466_v44, 2 }
 0x3c4   : > { %3955 = vrcp.f32 %v1829_v50  ;;  %v1874_v51 = vpop.f32.mrf.mxu1  ;;  %v1844_v55 = vmul.f32 %v3954_v52, %v5034_v7 }
 0x3c5   : > { %v1851_v53 = vpack.c.bf16 %v1843_v49, %v1843_v49  ;;  %3957 = vrcp.f32 %v1820_v38  ;;  %v3784_v38 = vld [vmem:[%s4934_s14 + $0x8] sm:$0xff]  ;;  %v1475_v49 = vrot.slane %v1467_v46, 2  ;;  %v1481_v52 = vsel %vm1478_vm6, %v1466_v44, %v1474_v48  ;;  %s5583_s14 = scalar_lea.vmem [#allocation5], %s4853_s26 }
 0x3c6   : > { %v1852_v60 = vpack.c.bf16 %v1844_v55, %v1844_v55  ;;  %2210 = vst [vmem:[#allocation1] ss:$4 sm:$0xff] %v1481_v52 }
 0x3c7   : > { %3674 = vmatmul.msk.bf16.vlgmr.msrb.gmra.mxu2 %vm1577_vm2, %v1851_v53  ;;  %v1895_v54 = vpop.f32.mrf.mxu2  ;;  %v1483_v53 = vsel %vm1482_vm7, %v1466_v44, %v1474_v48  ;;  %v1488_v55 = vsel %vm1478_vm6, %v1467_v46, %v1475_v49 }
 0x3c8   : > { %v1485_v54 = vrot.slane %v1483_v53, 2  ;;  %2215 = vst [vmem:[#allocation1 + $0x2] ss:$4 sm:$0xff] %v1488_v55 }
 0x3c9   : > { %v1982_v56 = vpop.permute.xlu1 %1981 }
 0x3ca   : > { %v3956_v57 = vpop.eup %3955  ;;  %v1987_v58 = vsel %vm1859_vm3, %v1982_v56, 0  ;;  %2213 = vst [vmem:[#allocation1 + $0x1] ss:$4 sm:$0xff] %v1485_v54 }
 0x3cb   : > { %v1845_v59 = vmul.f32 %v3956_v57, %v3946_v29  ;;  %1996 = vmatpush.bf16.msrb.mxu3 %v1987_v58  ;;  %v3958_v62 = vpop.eup %3957 }
 0x3cc   : > { %v1842_v63 = vmul.f32 %v3958_v62, %v5038_v10 }
 0x3cd   : > { %v1853_v61 = vpack.c.bf16 %v1845_v59, %v1845_v59 }
 0x3ce   : > { %3675 = vmatmul.msk.bf16.vlgmr.msrb.gmra.mxu3 %vm1577_vm2, %v1852_v60  ;;  %v1850_v2 = vpack.c.bf16 %v1842_v63, %v1842_v63  ;;  %v3915_v60 = vld [vmem:[%s5583_s14] ss:$0 sm:$0xff] }
 0x3cf   : > { %3676 = vmatmul.msk.bf16.vlgmr.msra.gmra.mxu0 %vm1577_vm2, %v1853_v61  ;;  %2247 = vmatpush.bf16.msra.mxu3 %v3784_v38 }
 0x3d3   : > { %2248 = vmatpush.bf16.msra.mxu3 %v3783_v45 }
 0x3d6   : > { %v1940_v0 = vpop.permute.xlu0 %1939 }
 0x3d7   : > { %v1945_v1 = vsel %vm1859_vm3, %v1940_v0, 0 }
 0x3d8   : > { %1954 = vmatpush.bf16.msrb.mxu1 %v1945_v1 }
 0x3db   : > { %3673 = vmatmul.msk.bf16.vlgmr.msrb.gmra.mxu1 %vm1577_vm2, %v1850_v2 }
 0x3dc   : > { %2085 = vmatpush.bf16.msra.mxu1 %v3780_v19 }
 0x3e0   : > { %2086 = vmatpush.bf16.msra.mxu1 %v3779_v20 }
 0x422   : > { %v1935_v3 = vpop.f32.mrf.mxu0 }
 0x42a   : > { %v1937_v6 = vpop.f32.mrf.mxu0 }
 0x440   : > { %v1914_v28 = vpop.f32.mrf.mxu3 }
 0x441   : > { %v3884_v7 = vpack.i.bf16 %v1935_v3, %v1914_v28 }
 0x443   : > { %3885 = vrot.lane.b32.xlu0 %v3884_v7, %s4513_s5 }
 0x448   : > { %v1916_v8 = vpop.f32.mrf.mxu3 }
 0x44a   : > { %v1977_v9 = vpop.f32.mrf.mxu2 }
 0x44c   : > { %v2019_v11 = vpop.f32.mrf.mxu0 }
 0x451   : > { %v1998_v10 = vpop.f32.mrf.mxu3 }
 0x452   : > { %v1979_v12 = vpop.f32.mrf.mxu2  ;;  %v3894_v13 = vpack.i.bf16 %v2019_v11, %v1998_v10  ;;  %v4516_v10 = vmov 32.0  }
 0x453   : > { %3959 = vrcp.f32 %v4516_v10 }
 0x454   : > { %v2021_v14 = vpop.f32.mrf.mxu0  ;;  %3895 = vrot.lane.b32.xlu2 %v3894_v13, %s4514_s24 }
 0x458   : > { %v1956_v15 = vpop.f32.mrf.mxu1 }
 0x459   : > { %v3889_v16 = vpack.i.bf16 %v1977_v9, %v1956_v15  ;;  %v2000_v17 = vpop.f32.mrf.mxu3  ;;  %v3960_v12 = vpop.eup %3959 }
 0x45a   : > { %v2104_v13 = vmul.f32 32.0, %v3960_v12  ;;  %vm2108_vm8 = vweird.f32 %v3960_v12 }
 0x45b   : > { %3890 = vrot.lane.b32.xlu1 %v3889_v16, %s4515_s30 }
 0x460   : > { %v1958_v18 = vpop.f32.mrf.mxu1 }
 0x4ae   : > { %v3896_v24 = vpop.permute.xlu2 %3895 }
 0x4af   : > { %v3898_v30 = vunpack.i.h.bf16 %v3896_v24  ;;  %v3897_v31 = vunpack.i.l.bf16 %v3896_v24 }
 0x4b5   : > { %v3886_v21 = vpop.permute.xlu0 %3885 }
 0x4b6   : > { %v3888_v22 = vunpack.i.h.bf16 %v3886_v21  ;;  %v3887_v23 = vunpack.i.l.bf16 %v3886_v21 }
 0x4b8   : > { %v2048_v29 = vsel %vm1577_vm2, %v5059_v47, %v3888_v22  ;;  %v2047_v32 = vsel %vm1577_vm2, %v5056_v43, %v3887_v23  ;;  %v1468_v43 = vpack.c.bf16 %v1464_v41, %v1464_v41  ;;  %v1469_v47 = vpack.c.bf16 %v1465_v36, %v1465_v36  ;;  %v3782_v23 = vld [vmem:[%s4929_s25 + $0x8] sm:$0xff] }
 0x4b9   : > { %2194 = vmatpush.bf16.msra.mxu2 %v3782_v23 }
 0x4ba   : > { %v1476_v50 = vrot.slane %v1468_v43, 2  ;;  %v1477_v51 = vrot.slane %v1469_v47, 2 }
 0x4bc   : > { %v1491_v56 = vsel %vm1478_vm6, %v1468_v43, %v1476_v50  ;;  %v1492_v57 = vsel %vm1482_vm7, %v1468_v43, %v1476_v50  ;;  %v1497_v59 = vsel %vm1478_vm6, %v1469_v47, %v1477_v51 }
 0x4bd   : > { %v1494_v58 = vrot.slane %v1492_v57, 2  ;;  %2217 = vst [vmem:[#allocation1 + $0x3] ss:$4 sm:$0xff] %v1491_v56 }
 0x4be   : > { %2222 = vst [vmem:[#allocation1 + $0x21] ss:$4 sm:$0xff] %v1497_v59 }
 0x4bf   : > { %2220 = vst [vmem:[#allocation1 + $0x20] ss:$4 sm:$0xff] %v1494_v58 }
 0x4c4   : > { %v2223_v62 = vld.sshfl [vmem:[#allocation1] sm:$0xff pattern:$0x73625140] }
 0x4c5   : > { %3703 = vmatmul.msk.bf16.vlgmr.msra.gmra.mxu3 %vm1521_vm1, %v2223_v62 }
 0x4c6   : > { %v2224_v9 = vld.sshfl [vmem:[#allocation1 + $0x20] sm:$0xff pattern:$0x73625140] }
 0x4cd   : > { %v3891_v25 = vpop.permute.xlu1 %3890 }
 0x4ce   : > { %v3893_v26 = vunpack.i.h.bf16 %v3891_v25  ;;  %v3892_v27 = vunpack.i.l.bf16 %v3891_v25 }
 0x4d0   : > { %v2051_v33 = vsel %vm2049_vm4, %v2048_v29, %v3893_v26  ;;  %v2050_v34 = vsel %vm2049_vm4, %v2047_v32, %v3892_v27  ;;  %v3781_v26 = vld [vmem:[%s4929_s25] sm:$0xff]  ;;  %s5585_s25 = scalar_lea.vmem [#allocation17], %s4853_s26 }
 0x4d1   : > { %v2054_v35 = vsel %vm2052_vm5, %v2051_v33, %v3898_v30  ;;  %v2053_v37 = vsel %vm2052_vm5, %v2050_v34, %v3897_v31  ;;  %2195 = vmatpush.bf16.msra.mxu2 %v3781_v26  ;;  %v3918_v34 = vld [vmem:[%s5584_s0] ss:$0 sm:$0xff]  ;;  %s5597_s0 = sld [smem:[#allocation60_spill]] (!%p3756_p0) }
 0x4d2   : > { %v2055_v42 = vpack.c.bf16 %v2054_v35, %v2053_v37 }
 0x4d4   : > { %3685 = vmatmul.msk.bf16.vlgmr.msra.gmra.mxu1 %vm1521_vm1, %v2055_v42 }
 0x4d5   : > { %3704 = vmatmul.msk.bf16.gmra.mxu3 %vm1521_vm1, %v2224_v9 }
 0x548   : > { %v2250_v35 = vpop.f32.mrf.mxu3 }
 0x549   : > { %v2251_v42 = vadd.f32 %v3918_v34, %v2250_v35 }
 0x54b   : > { %v2277_v41 = vpack.c.bf16 %v2251_v42, %v2251_v42 }
 0x54d   : > { %v2283_v36 = vrot.slane %v2277_v41, 2 }
 0x54f   : > { %v5142_v46 = vsel %vm1478_vm6, %v2277_v41, %v2283_v36  ;;  %v2289_v43 = vsel %vm1482_vm7, %v2277_v41, %v2283_v36 }
 0x550   : > { %v2252_v47 = vpop.f32.mrf.mxu3  ;;  %v5145_v48 = vrot.slane %v2289_v43, 2  ;;  %2343 = vst [vmem:[#allocation1] ss:$4 sm:$0xff] %v5142_v46 }
 0x551   : > { %v2088_v61 = vpop.f32.mrf.mxu1  ;;  %v2253_v49 = vadd.f32 %v3918_v34, %v2252_v47 }
 0x552   : > { %v2089_v63 = vadd.f32 %v3915_v60, %v2088_v61  ;;  %2346 = vst [vmem:[#allocation1 + $0x1] ss:$4 sm:$0xff] %v5145_v48 }
 0x553   : > { %v2278_v51 = vpack.c.bf16 %v2253_v49, %v2253_v49 }
 0x554   : > { %v5107_v0 = vadd.f32 %v2089_v63, %v4949_v4 }
 0x555   : > { %v2284_v55 = vrot.slane %v2278_v51, 2 }
 0x556   : > { %v2097_v1 = vsel %vm1521_vm1, %v5107_v0, 0.0  ;;  %v2112_v2 = vmul.f32 %v5107_v0, %v5107_v0 }
 0x557   : > { %2098 = vadd.xlane.f32.xlu0 %v2097_v1  ;;  %v5154_v57 = vsel %vm1478_vm6, %v2278_v51, %v2284_v55  ;;  %v2295_v58 = vsel %vm1482_vm7, %v2278_v51, %v2284_v55 }
 0x558   : > { %v2114_v3 = vsel %vm1521_vm1, %v2112_v2, 0.0  ;;  %v5157_v59 = vrot.slane %v2295_v58, 2  ;;  %2348 = vst [vmem:[#allocation1 + $0x2] ss:$4 sm:$0xff] %v5154_v57 }
 0x559   : > { %v2090_v6 = vpop.f32.mrf.mxu1  ;;  %2115 = vadd.xlane.f32.xlu2 %v2114_v3 }
 0x55a   : > { %v2091_v28 = vadd.f32 %v3915_v60, %v2090_v6  ;;  %v2255_v60 = vpop.f32.mrf.mxu3  ;;  %v3916_v6 = vld [vmem:[%s5585_s25] ss:$0 sm:$0xff] }
 0x55b   : > { %v2256_v63 = vadd.f32 %v3918_v34, %v2255_v60 }
 0x55c   : > { %v5115_v7 = vadd.f32 %v2091_v28, %v4951_v5  ;;  %v2105_v5 = vsub.f32 1.0, %v2104_v13 }
 0x55d   : > { %v2279_v3 = vpack.c.bf16 %v2256_v63, %v2256_v63 }
 0x55e   : > { %v2100_v8 = vsel %vm1521_vm1, %v5115_v7, 0.0  ;;  %v2113_v4 = vmul.f32 %v5115_v7, %v5115_v7  ;;  %v2106_v14 = vmul.f32 %v3960_v12, %v2105_v5 }
 0x55f   : > { %2101 = vadd.xlane.f32.xlu1 %v2100_v8  ;;  %v2349_v10 = vld.sshfl [vmem:[#allocation1] sm:$0xff pattern:$0x73625140] }
 0x560   : > { %v2117_v11 = vsel %vm1521_vm1, %v2113_v4, 0.0  ;;  %v2107_v15 = vadd.f32 %v3960_v12, %v2106_v14  ;;  %v2285_v4 = vrot.slane %v2279_v3, 2  ;;  %v3917_v14 = vld [vmem:[%s5586_s18] ss:$0 sm:$0xff]  ;;  %2369 = vst [vmem:[#allocation1] ss:$4 sm:$0xff] %v5157_v59 }
 0x561   : > { %2118 = vadd.xlane.f32.xlu0 %v2117_v11 }
 0x562   : > { %v5123_v16 = vsel %vm2108_vm8, %v3960_v12, %v2107_v15  ;;  %v2301_v12 = vsel %vm1482_vm7, %v2279_v3, %v2285_v4  ;;  %vm3087_vm8 = vcmask 523264  }
 0x563   : > { %v5177_v15 = vrot.slane %v2301_v12, 2 }
 0x565   : > { %2374 = vst [vmem:[#allocation1 + $0x2] ss:$4 sm:$0xff] %v5177_v15 }
 0x571   : > { %2309 = vrot.lane.b32.xlu2 %v5145_v48, %s4509_s19 }
 0x575   : > { %2311 = vrot.lane.b32.xlu0 %v5154_v57, %s4509_s19 }
 0x578   : > { %2307 = vrot.lane.b32.xlu1 %v5142_v46, %s4509_s19 }
 0x579   : > { %2317 = vrot.lane.b32.xlu2 %v5177_v15, %s4509_s19 }
 0x580   : > { %2313 = vrot.lane.b32.xlu1 %v5157_v59, %s4509_s19 }
 0x581   : > { %2323 = vrot.lane.b32.xlu2 %v5154_v57, %s4508_s17 }
 0x588   : > { %2319 = vrot.lane.b32.xlu1 %v5142_v46, %s4508_s17 }
 0x589   : > { %2329 = vrot.lane.b32.xlu2 %v5177_v15, %s4508_s17 }
 0x590   : > { %2325 = vrot.lane.b32.xlu1 %v5157_v59, %s4508_s17 }
 0x591   : > { %2333 = vrot.lane.b32.xlu2 %v5145_v48, %s4510_s9 }
 0x599   : > { %2337 = vrot.lane.b32.xlu2 %v5157_v59, %s4510_s9 }
 0x5ca   : > { %v2099_v17 = vpop.xlane.xlu0 %2098 }
 0x5cb   : > { %v5126_v18 = vmul.f32 %v5123_v16, %v2099_v17 }
 0x5cc   : > { %v2116_v19 = vpop.xlane.xlu2 %2115 }
 0x5cd   : > { %v2122_v20 = vmul.f32 %v5126_v18, %v5126_v18  ;;  %v2120_v21 = vmul.f32 %v2116_v19, %v5123_v16  ;;  %v2128_v1 = vsub.f32 %v5107_v0, %v5126_v18  ;;  %v5171_v0 = vsel %vm1478_vm6, %v2279_v3, %v2285_v4 }
 0x5ce   : > { %2315 = vrot.lane.b32.xlu0 %v5171_v0, %s4509_s19  ;;  %2371 = vst [vmem:[#allocation1 + $0x1] ss:$4 sm:$0xff] %v5171_v0  ;;  %v2353_v18 = vsel %vm1577_vm2, %v2349_v10, 0 }
 0x5cf   : > { %v2124_v22 = vsub.f32 %v2120_v21, %v2122_v20  ;;  %2362 = vmatpush.bf16.xpose.msrb.mxu0 %v2353_v18 }
 0x5d1   : > { %v2126_v24 = vmax.f32 %v2124_v22, 0.0 }
 0x5d2   : > { %v2102_v25 = vpop.xlane.xlu1 %2101 }
 0x5d3   : > { %v2130_v27 = vadd.f32 1e-05, %v2126_v24  ;;  %v5134_v30 = vmul.f32 %v5123_v16, %v2102_v25  ;;  %v3919_v25 = vld [vmem:[%s5587_s6] ss:$0 sm:$0xff] }
 0x5d4   : > { %v2119_v31 = vpop.xlane.xlu0 %2118  ;;  %v5212_v24 = vpop.permute.xlu2 %2309 }
 0x5d5   : > { %3961 = vrsqrt.f32 %v2130_v27  ;;  %v2123_v29 = vmul.f32 %v5134_v30, %v5134_v30  ;;  %v2121_v32 = vmul.f32 %v2119_v31, %v5123_v16  ;;  %vm2138_vm10 = vweird.f32 %v2130_v27  ;;  %v2375_v22 = vld.sshfl [vmem:[#allocation1] sm:$0xff pattern:$0x73625140] }
 0x5d6   : > { %v2129_v9 = vsub.f32 %v5115_v7, %v5134_v30  ;;  %v2257_v7 = vpop.f32.mrf.mxu3  ;;  %2321 = vrot.lane.b32.xlu0 %v5145_v48, %s4508_s17  ;;  %v2379_v23 = vsel %vm1577_vm2, %v2375_v22, 0  ;;  %2398 = vst [vmem:[#allocation1 + $0x1] ss:$4 sm:$0xff] %v5212_v24 }
 0x5d7   : > { %v2125_v33 = vsub.f32 %v2121_v32, %v2123_v29  ;;  %2388 = vmatpush.bf16.xpose.msrb.mxu1 %v2379_v23 }
 0x5d9   : > { %v2127_v37 = vmax.f32 %v2125_v33, 0.0 }
 0x5db   : > { %v3962_v38 = vpop.eup %3961  ;;  %v2131_v40 = vadd.f32 1e-05, %v2127_v37 }
 0x5dc   : > { %v2133_v39 = vmul.f32 %v3962_v38, %v2130_v27  ;;  %vm2139_vm9 = vweird.f32 %v3962_v38  ;;  %v5227_v37 = vpop.permute.xlu2 %2317 }
 0x5dd   : > { %3963 = vrsqrt.f32 %v2131_v40  ;;  %vm2140_vm11 = vmor %vm2138_vm10, %vm2139_vm9  ;;  %vm2148_vm13 = vweird.f32 %v2131_v40 }
 0x5de   : > { %v2134_v44 = vmul.f32 %v3962_v38, %v2133_v39  ;;  %2327 = vrot.lane.b32.xlu0 %v5171_v0, %s4508_s17 }
 0x5e0   : > { %v2135_v45 = vmul.f32 0.5, %v2134_v44 }
 0x5e2   : > { %v2136_v50 = vsub.f32 1.5, %v2135_v45 }
 0x5e3   : > { %v3964_v52 = vpop.eup %3963 }
 0x5e4   : > { %v2137_v53 = vmul.f32 %v3962_v38, %v2136_v50  ;;  %v2143_v54 = vmul.f32 %v3964_v52, %v2131_v40  ;;  %vm2149_vm12 = vweird.f32 %v3964_v52  ;;  %v5242_v36 = vpop.permute.xlu2 %2323 }
 0x5e5   : > { %vm2150_vm14 = vmor %vm2148_vm13, %vm2149_vm12 }
 0x5e6   : > { %v2144_v56 = vmul.f32 %v3964_v52, %v2143_v54  ;;  %v2141_v61 = vsel %vm2140_vm11, %v3962_v38, %v2137_v53  ;;  %2331 = vrot.lane.b32.xlu0 %v5142_v46, %s4510_s9 }
 0x5e7   : > { %v2152_v28 = vmul.f32 %v2141_v61, %v2128_v1  ;;  %v5220_v31 = vpop.permute.xlu0 %2311 }
 0x5e8   : > { %v2145_v62 = vmul.f32 0.5, %v2144_v56  ;;  %2401 = vst [vmem:[#allocation1 + $0x2] ss:$4 sm:$0xff] %v5220_v31 }
 0x5e9   : > { %v2157_v13 = vmul.f32 %v3916_v6, %v2152_v28 }
 0x5ea   : > { %v2146_v2 = vsub.f32 1.5, %v2145_v62  ;;  %v5217_v27 = vpop.permute.xlu1 %2307 }
 0x5eb   : > { %v5188_v19 = vadd.f32 %v3917_v14, %v2157_v13  ;;  %2395 = vst [vmem:[#allocation1] ss:$4 sm:$0xff] %v5217_v27 }
 0x5ec   : > { %v2147_v8 = vmul.f32 %v3964_v52, %v2146_v2  ;;  %v5256_v49 = vpop.permute.xlu2 %2329 }
 0x5ee   : > { %v2151_v11 = vsel %vm2150_vm14, %v3964_v52, %v2147_v8 }
 0x5ef   : > { %v2153_v5 = vmul.f32 %v2151_v11, %v2129_v9 }
 0x5f1   : > { %v2158_v17 = vmul.f32 %v3916_v6, %v2153_v5 }
 0x5f2   : > { %v5225_v34 = vpop.permute.xlu1 %2313  ;;  %v2402_v42 = vld.sshfl [vmem:[#allocation1] sm:$0xff pattern:$0x73625140] }
 0x5f3   : > { %v5190_v20 = vadd.f32 %v3917_v14, %v2158_v17  ;;  %2428 = vst [vmem:[#allocation1 + $0x2] ss:$4 sm:$0xff] %v5227_v37  ;;  %v2406_v39 = vsel %vm1577_vm2, %v2402_v42, 0 }
 0x5f4   : > { %2422 = vst [vmem:[#allocation1] ss:$4 sm:$0xff] %v5225_v34  ;;  %2415 = vmatpush.bf16.xpose.msrb.mxu2 %v2406_v39  ;;  %v5268_v54 = vpop.permute.xlu2 %2333 }
 0x5f5   : > { %v2164_v21 = vpack.c.bf16 %v5190_v20, %v5188_v19 }
 0x5f7   : > { %3694 = vmatmul.msk.bf16.vlgmr.msra.gmra.mxu2 %vm1521_vm1, %v2164_v21 }
 0x5fa   : > { %v5240_v44 = vpop.permute.xlu1 %2319 }
 0x5fc   : > { %v5275_v61 = vpop.permute.xlu2 %2337 }
 0x602   : > { %v5254_v47 = vpop.permute.xlu1 %2325 }
 0x640   : > { %v5229_v38 = vpop.permute.xlu0 %2315 }
 0x641   : > { %2425 = vst [vmem:[#allocation1 + $0x1] ss:$4 sm:$0xff] %v5229_v38 }
 0x648   : > { %v2429_v45 = vld.sshfl [vmem:[#allocation1] sm:$0xff pattern:$0x73625140]  ;;  %v5244_v43 = vpop.permute.xlu0 %2321 }
 0x649   : > { %2455 = vst [vmem:[#allocation1 + $0x2] ss:$4 sm:$0xff] %v5242_v36  ;;  %v2433_v56 = vsel %vm1577_vm2, %v2429_v45, 0 }
 0x64a   : > { %2449 = vst [vmem:[#allocation1] ss:$4 sm:$0xff] %v5240_v44  ;;  %2442 = vmatpush.bf16.xpose.msra.mxu0 %v2433_v56 }
 0x64b   : > { %2452 = vst [vmem:[#allocation1 + $0x1] ss:$4 sm:$0xff] %v5244_v43 }
 0x650   : > { %v5258_v51 = vpop.permute.xlu0 %2327 }
 0x652   : > { %v2456_v50 = vld.sshfl [vmem:[#allocation1] sm:$0xff pattern:$0x73625140] }
 0x653   : > { %2482 = vst [vmem:[#allocation1 + $0x2] ss:$4 sm:$0xff] %v5256_v49  ;;  %v2460_v52 = vsel %vm1577_vm2, %v2456_v50, 0 }
 0x654   : > { %2476 = vst [vmem:[#allocation1] ss:$4 sm:$0xff] %v5254_v47  ;;  %2469 = vmatpush.bf16.xpose.msra.mxu1 %v2460_v52 }
 0x655   : > { %2479 = vst [vmem:[#allocation1 + $0x1] ss:$4 sm:$0xff] %v5258_v51 }
 0x658   : > { %v5266_v53 = vpop.permute.xlu0 %2331 }
 0x65c   : > { %v2483_v55 = vld.sshfl [vmem:[#allocation1] sm:$0xff pattern:$0x73625140] }
 0x65d   : > { %2506 = vst [vmem:[#allocation1 + $0x1] ss:$4 sm:$0xff] %v5268_v54  ;;  %v2487_v58 = vsel %vm1577_vm2, %v2483_v55, 0 }
 0x65e   : > { %2503 = vst [vmem:[#allocation1] ss:$4 sm:$0xff] %v5266_v53  ;;  %2496 = vmatpush.bf16.xpose.msra.mxu2 %v2487_v58 }
 0x67a   : > { %v2197_v26 = vpop.f32.mrf.mxu2 }
 0x67b   : > { %v2198_v30 = vadd.f32 %v3919_v25, %v2197_v26 }
 0x67d   : > { %v2259_v29 = vmul.f32 0.35355338, %v2198_v30 }
 0x67f   : > { %v2261_v32 = vpack.c.bf16 %v2259_v29, %v2259_v29 }
 0x681   : > { %2265 = vrot.lane.b32.xlu1 %v2261_v32, %s4509_s19  ;;  %3705 = vmatmul.msk.bf16.vlgmr.msrb.gmra.mxu0 %vm1577_vm2, %v2261_v32 }
 0x682   : > { %v2199_v33 = vpop.f32.mrf.mxu2 }
 0x683   : > { %v2200_v35 = vadd.f32 %v3919_v25, %v2199_v33 }
 0x685   : > { %v2260_v40 = vmul.f32 0.35355338, %v2200_v35 }
 0x687   : > { %v2262_v41 = vpack.c.bf16 %v2260_v40, %v2260_v40 }
 0x689   : > { %2271 = vrot.lane.b32.xlu2 %v2262_v41, %s4508_s17  ;;  %2267 = vrot.lane.b32.xlu0 %v2262_v41, %s4509_s19 }
 0x68a   : > { %3706 = vmatmul.msk.bf16.vlgmr.msrb.gmra.mxu1 %vm1577_vm2, %v2262_v41  ;;  %2335 = vrot.lane.b32.xlu1 %v5154_v57, %s4510_s9 }
 0x691   : > { %2275 = vrot.lane.b32.xlu2 %v2262_v41, %s4510_s9  ;;  %2341 = vrot.lane.b32.xlu0 %v5177_v15, %s4510_s9 }
 0x692   : > { %2339 = vrot.lane.b32.xlu1 %v5171_v0, %s4510_s9 }
 0x699   : > { %2269 = vrot.lane.b32.xlu0 %v2261_v32, %s4508_s17 }
 0x69a   : > { %2273 = vrot.lane.b32.xlu1 %v2261_v32, %s4510_s9  ;;  %s5588_s9 = sld [smem:[#allocation40_spill]] }
 0x6a0   : > { %v5281_v1 = vld [vmem:[%s5588_s9] sm:$0xff] }
 0x6e3   : > { %v2272_v28 = vpop.permute.xlu2 %2271 }
 0x6eb   : > { %v2276_v22 = vpop.permute.xlu2 %2275 }
 0x6f3   : > { %v2266_v60 = vpop.permute.xlu1 %2265 }
 0x6f4   : > { %3707 = vmatmul.msk.bf16.vlgmr.msrb.gmra.mxu2 %vm1577_vm2, %v2266_v60 }
 0x6fb   : > { %v2268_v62 = vpop.permute.xlu0 %2267 }
 0x6fc   : > { %v2336_v63 = vpop.permute.xlu1 %2335  ;;  %3708 = vmatmul.msk.bf16.vlgmr.msra.gmra.mxu0 %vm1577_vm2, %v2268_v62 }
 0x6fd   : > { %2509 = vst [vmem:[#allocation1 + $0x2] ss:$4 sm:$0xff] %v2336_v63 }
 0x6fe   : > { %v2364_v2 = vpop.f32.mrf.mxu0 }
 0x6ff   : > { %v5284_v3 = vadd.f32 %v2364_v2, %v5281_v1 }
 0x701   : > { %v2557_v6 = vsel %vm2556_vm15, %v5284_v3, -inf }
 0x702   : > { %2558 = vmax.xlane.f32.xlu2 %v2557_v6 }
 0x703   : > { %v2342_v8 = vpop.permute.xlu0 %2341 }
 0x704   : > { %v2510_v4 = vld.sshfl [vmem:[#allocation1] sm:$0xff pattern:$0x73625140]  ;;  %v2340_v9 = vpop.permute.xlu1 %2339  ;;  %3710 = vmatmul.msk.bf16.vlgmr.msra.gmra.mxu2 %vm1577_vm2, %v2272_v28 }
 0x705   : > { %2530 = vst [vmem:[#allocation1] ss:$4 sm:$0xff] %v5275_v61  ;;  %v2514_v11 = vsel %vm1577_vm2, %v2510_v4, 0 }
 0x706   : > { %2533 = vst [vmem:[#allocation1 + $0x1] ss:$4 sm:$0xff] %v2340_v9  ;;  %2523 = vmatpush.bf16.xpose.msrb.mxu3 %v2514_v11  ;;  %v2366_v10 = vpop.f32.mrf.mxu0 }
 0x707   : > { %2536 = vst [vmem:[#allocation1 + $0x2] ss:$4 sm:$0xff] %v2342_v8  ;;  %v2390_v12 = vpop.f32.mrf.mxu1 }
 0x708   : > { %v5292_v13 = vadd.f32 %v2390_v12, %v5281_v1 }
 0x70a   : > { %v2560_v5 = vsel %vm2556_vm15, %v5292_v13, -inf }
 0x70b   : > { %2561 = vmax.xlane.f32.xlu1 %v2560_v5  ;;  %v2270_v14 = vpop.permute.xlu0 %2269 }
 0x70c   : > { %v2274_v7 = vpop.permute.xlu1 %2273  ;;  %3709 = vmatmul.msk.bf16.vlgmr.msra.gmra.mxu1 %vm1577_vm2, %v2270_v14 }
 0x70d   : > { %3711 = vmatmul.msk.bf16.vlgmr.msrb.gmra.mxu3 %vm1577_vm2, %v2274_v7 }
 0x70e   : > { %v2537_v17 = vld.sshfl [vmem:[#allocation1] sm:$0xff pattern:$0x73625140] }
 0x70f   : > { %2653 = vst [vmem:[#allocation1] ss:$4 sm:$0xff] %v5142_v46  ;;  %v2541_v18 = vsel %vm1577_vm2, %v2537_v17, 0  ;;  %v2392_v21 = vpop.f32.mrf.mxu1 }
 0x710   : > { %2655 = vst [vmem:[#allocation1 + $0x1] ss:$4 sm:$0xff] %v5145_v48  ;;  %2550 = vmatpush.bf16.xpose.msrb.mxu0 %v2541_v18 }
 0x711   : > { %2657 = vst [vmem:[#allocation1 + $0x2] ss:$4 sm:$0xff] %v5154_v57 }
 0x717   : > { %3712 = vmatmul.msk.bf16.vlgmr.msrb.gmra.mxu0 %vm1577_vm2, %v2276_v22 }
 0x718   : > { %v2658_v23 = vld.sshfl [vmem:[#allocation1] sm:$0xff pattern:$0x73625140] }
 0x719   : > { %2682 = vst [vmem:[#allocation1] ss:$4 sm:$0xff] %v5157_v59 }
 0x71a   : > { %2684 = vst [vmem:[#allocation1 + $0x1] ss:$4 sm:$0xff] %v5171_v0 }
 0x71b   : > { %2686 = vst [vmem:[#allocation1 + $0x2] ss:$4 sm:$0xff] %v5177_v15 }
 0x722   : > { %v2687_v25 = vld.sshfl [vmem:[#allocation1] sm:$0xff pattern:$0x73625140] }
 0x723   : > { %2710 = vst [vmem:[#allocation1] ss:$4 sm:$0xff] %v5217_v27 }
 0x724   : > { %2712 = vst [vmem:[#allocation1 + $0x1] ss:$4 sm:$0xff] %v5212_v24 }
 0x725   : > { %2714 = vst [vmem:[#allocation1 + $0x2] ss:$4 sm:$0xff] %v5220_v31 }
 0x72c   : > { %v2715_v46 = vld.sshfl [vmem:[#allocation1] sm:$0xff pattern:$0x73625140] }
 0x72d   : > { %2738 = vst [vmem:[#allocation1] ss:$4 sm:$0xff] %v5225_v34 }
 0x72e   : > { %2740 = vst [vmem:[#allocation1 + $0x1] ss:$4 sm:$0xff] %v5229_v38 }
 0x72f   : > { %2742 = vst [vmem:[#allocation1 + $0x2] ss:$4 sm:$0xff] %v5227_v37 }
 0x736   : > { %v2743_v48 = vld.sshfl [vmem:[#allocation1] sm:$0xff pattern:$0x73625140] }
 0x737   : > { %2766 = vst [vmem:[#allocation1] ss:$4 sm:$0xff] %v5240_v44 }
 0x738   : > { %2768 = vst [vmem:[#allocation1 + $0x1] ss:$4 sm:$0xff] %v5244_v43 }
 0x739   : > { %2770 = vst [vmem:[#allocation1 + $0x2] ss:$4 sm:$0xff] %v5242_v36 }
 0x740   : > { %v5315_v57 = vld.sshfl [vmem:[#allocation1] sm:$0xff pattern:$0x73625140] }
 0x741   : > { %2794 = vst [vmem:[#allocation1] ss:$4 sm:$0xff] %v5254_v47 }
 0x742   : > { %2796 = vst [vmem:[#allocation1 + $0x1] ss:$4 sm:$0xff] %v5258_v51 }
 0x743   : > { %2798 = vst [vmem:[#allocation1 + $0x2] ss:$4 sm:$0xff] %v5256_v49 }
 0x74a   : > { %v5320_v59 = vld.sshfl [vmem:[#allocation1] sm:$0xff pattern:$0x73625140] }
 0x74b   : > { %2822 = vst [vmem:[#allocation1] ss:$4 sm:$0xff] %v5266_v53 }
 0x74c   : > { %2824 = vst [vmem:[#allocation1 + $0x1] ss:$4 sm:$0xff] %v5268_v54 }
 0x74d   : > { %2826 = vst [vmem:[#allocation1 + $0x2] ss:$4 sm:$0xff] %v2336_v63 }
 0x754   : > { %v5324_v0 = vld.sshfl [vmem:[#allocation1] sm:$0xff pattern:$0x73625140] }
 0x755   : > { %2850 = vst [vmem:[#allocation1] ss:$4 sm:$0xff] %v5275_v61 }
 0x756   : > { %2852 = vst [vmem:[#allocation1 + $0x1] ss:$4 sm:$0xff] %v2340_v9 }
 0x757   : > { %2854 = vst [vmem:[#allocation1 + $0x2] ss:$4 sm:$0xff] %v2342_v8 }
 0x775   : > { %v2559_v43 = vpop.xlane.xlu2 %2558 }
 0x776   : > { %v2581_v47 = vsub.f32 %v5284_v3, %v2559_v43 }
 0x777   : > { %v2417_v15 = vpop.f32.mrf.mxu2 }
 0x778   : > { %v2418_v24 = vadd.f32 %v2417_v15, %v5281_v1  ;;  %v2589_v49 = vmul.f32 1.442695, %v2581_v47 }
 0x779   : > { %v2444_v26 = vpop.f32.mrf.mxu0 }
 0x77a   : > { %v2563_v27 = vsel %vm2556_vm15, %v2418_v24, -inf  ;;  %v2445_v37 = vadd.f32 %v2444_v26, %v5281_v1  ;;  %3965 = vpow2.f32 %v2589_v49  ;;  %v2855_v26 = vld.sshfl [vmem:[#allocation1] sm:$0xff pattern:$0x73625140] }
 0x77b   : > { %2564 = vmax.xlane.f32.xlu0 %v2563_v27 }
 0x77c   : > { %v2566_v44 = vsel %vm2556_vm15, %v2445_v37, -inf }
 0x77e   : > { %v2562_v53 = vpop.xlane.xlu1 %2561 }
 0x77f   : > { %v2419_v30 = vpop.f32.mrf.mxu2  ;;  %v2582_v55 = vsub.f32 %v5292_v13, %v2562_v53 }
 0x780   : > { %v3966_v50 = vpop.eup %3965 }
 0x781   : > { %v2446_v31 = vpop.f32.mrf.mxu0  ;;  %v2605_v51 = vsel %vm2556_vm15, %v3966_v50, 0.0  ;;  %v2591_v58 = vmul.f32 1.442695, %v2582_v55 }
 0x783   : > { %3967 = vpow2.f32 %v2591_v58 }
 0x787   : > { %v2498_v29 = vpop.f32.mrf.mxu2 }
 0x788   : > { %v2499_v52 = vadd.f32 %v2498_v29, %v5281_v1 }
 0x789   : > { %v2471_v32 = vpop.f32.mrf.mxu1  ;;  %v5348_v61 = vpop.eup %3967 }
 0x78a   : > { %v2472_v33 = vadd.f32 %v2471_v32, %v5281_v1  ;;  %v2572_v54 = vsel %vm2556_vm15, %v2499_v52, -inf  ;;  %v2608_v62 = vsel %vm2556_vm15, %v5348_v61, 0.0 }
 0x78c   : > { %v2569_v34 = vsel %vm2556_vm15, %v2472_v33, -inf }
 0x78d   : > { %2570 = vmax.xlane.f32.xlu1 %v2569_v34 }
 0x78f   : > { %v2500_v35 = vpop.f32.mrf.mxu2  ;;  %2717 = vrot.lane.b32.xlu0 %v2715_v46, %s4511_s2 }
 0x790   : > { %v2525_v42 = vpop.f32.mrf.mxu3 }
 0x791   : > { %v2526_v38 = vadd.f32 %v2525_v42, %v5281_v1  ;;  %v2473_v39 = vpop.f32.mrf.mxu1 }
 0x793   : > { %v2575_v40 = vsel %vm2556_vm15, %v2526_v38, -inf }
 0x794   : > { %v2552_v41 = vpop.f32.mrf.mxu0  ;;  %2576 = vmax.xlane.f32.xlu2 %v2575_v40 }
 0x795   : > { %2567 = vmax.xlane.f32.xlu1 %v2566_v44  ;;  %v5344_v56 = vadd.f32 %v2552_v41, %v5281_v1 }
 0x797   : > { %v2578_v60 = vsel %vm2556_vm15, %v5344_v56, -inf }
 0x798   : > { %v2527_v36 = vpop.f32.mrf.mxu3 }
 0x79c   : > { %v2554_v45 = vpop.f32.mrf.mxu0 }
 0x7ac   : > { %2660 = vrot.lane.b32.xlu2 %v2658_v23, %s4511_s2 }
 0x7ae   : > { %2689 = vrot.lane.b32.xlu1 %v2687_v25, %s4511_s2 }
 0x7b9   : > { %2606 = vadd.xlane.f32.xlu0 %v2605_v51 }
 0x7c1   : > { %2573 = vmax.xlane.f32.xlu0 %v2572_v54 }
 0x7c9   : > { %2579 = vmax.xlane.f32.xlu0 %v2578_v60 }
 0x7d5   : > { %2609 = vadd.xlane.f32.xlu2 %v2608_v62 }
 0x7dd   : > { %2745 = vrot.lane.b32.xlu0 %v2743_v48, %s4511_s2 }
 0x7ee   : > { %v2565_v63 = vpop.xlane.xlu0 %2564 }
 0x7ef   : > { %v2583_v2 = vsub.f32 %v2418_v24, %v2565_v63 }
 0x7f1   : > { %v2593_v3 = vmul.f32 1.442695, %v2583_v2 }
 0x7f3   : > { %3969 = vpow2.f32 %v2593_v3 }
 0x7f9   : > { %v5353_v1 = vpop.eup %3969 }
 0x7fa   : > { %v2611_v6 = vsel %vm2556_vm15, %v5353_v1, 0.0 }
 0x7fb   : > { %2612 = vadd.xlane.f32.xlu1 %v2611_v6 }
 0x800   : > { %v2571_v28 = vpop.xlane.xlu1 %2570 }
 0x801   : > { %v2585_v8 = vsub.f32 %v2472_v33, %v2571_v28  ;;  %v2718_v4 = vpop.permute.xlu0 %2717 }
 0x802   : > { %v2723_v9 = vsel %vm2665_vm0, %v2718_v4, 0 }
 0x803   : > { %v2597_v11 = vmul.f32 1.442695, %v2585_v8  ;;  %2732 = vmatpush.bf16.msra.mxu3 %v2723_v9 }
 0x805   : > { %3971 = vpow2.f32 %v2597_v11 }
 0x807   : > { %v2577_v10 = vpop.xlane.xlu2 %2576 }
 0x808   : > { %v2587_v12 = vsub.f32 %v2526_v38, %v2577_v10  ;;  %v2568_v13 = vpop.xlane.xlu1 %2567 }
 0x809   : > { %v2584_v14 = vsub.f32 %v2445_v37, %v2568_v13 }
 0x80a   : > { %v2601_v5 = vmul.f32 1.442695, %v2587_v12 }
 0x80b   : > { %v5358_v7 = vpop.eup %3971  ;;  %v2595_v18 = vmul.f32 1.442695, %v2584_v14 }
 0x80c   : > { %3973 = vpow2.f32 %v2601_v5  ;;  %v2617_v17 = vsel %vm2556_vm15, %v5358_v7, 0.0 }
 0x80d   : > { %2618 = vadd.xlane.f32.xlu0 %v2617_v17  ;;  %3975 = vpow2.f32 %v2595_v18 }
 0x80f   : > { %v2661_v21 = vpop.permute.xlu2 %2660 }
 0x810   : > { %v2667_v22 = vsel %vm2665_vm0, %v2661_v21, 0 }
 0x811   : > { %2676 = vmatpush.bf16.msrb.mxu1 %v2667_v22 }
 0x812   : > { %v3974_v23 = vpop.eup %3973 }
 0x813   : > { %v2623_v25 = vsel %vm2556_vm15, %v3974_v23, 0.0  ;;  %v3976_v46 = vpop.eup %3975 }
 0x814   : > { %2624 = vadd.xlane.f32.xlu2 %v2623_v25  ;;  %v2614_v48 = vsel %vm2556_vm15, %v3976_v46, 0.0 }
 0x81c   : > { %2615 = vadd.xlane.f32.xlu2 %v2614_v48 }
 0x820   : > { %v2690_v15 = vpop.permute.xlu1 %2689 }
 0x821   : > { %v2695_v24 = vsel %vm2665_vm0, %v2690_v15, 0  ;;  %2829 = vrot.lane.b32.xlu0 %v5324_v0, %s4511_s2 }
 0x822   : > { %2704 = vmatpush.bf16.msrb.mxu2 %v2695_v24 }
 0x829   : > { %2857 = vrot.lane.b32.xlu0 %v2855_v26, %s4511_s2 }
 0x82c   : > { %v2607_v27 = vpop.xlane.xlu0 %2606 }
 0x82d   : > { %3977 = vrcp.f32 %v2607_v27 }
 0x833   : > { %v3978_v30 = vpop.eup %3977 }
 0x834   : > { %v2637_v31 = vmul.f32 %v3978_v30, %v3966_v50  ;;  %v2574_v29 = vpop.xlane.xlu0 %2573 }
 0x835   : > { %v2586_v32 = vsub.f32 %v2499_v52, %v2574_v29 }
 0x836   : > { %v2645_v33 = vpack.c.bf16 %v2637_v31, %v2637_v31 }
 0x837   : > { %v2599_v34 = vmul.f32 1.442695, %v2586_v32 }
 0x838   : > { %3713 = vmatmul.msk.bf16.vlgmr.msrb.gmra.mxu1 %vm2556_vm15, %v2645_v33 }
 0x839   : > { %3979 = vpow2.f32 %v2599_v34 }
 0x83c   : > { %v2580_v35 = vpop.xlane.xlu0 %2579 }
 0x83d   : > { %v2588_v37 = vsub.f32 %v5344_v56, %v2580_v35 }
 0x83f   : > { %v5371_v42 = vpop.eup %3979  ;;  %v2603_v0 = vmul.f32 1.442695, %v2588_v37 }
 0x840   : > { %v2620_v38 = vsel %vm2556_vm15, %v5371_v42, 0.0 }
 0x841   : > { %3981 = vpow2.f32 %v2603_v0  ;;  %2621 = vadd.xlane.f32.xlu1 %v2620_v38  ;;  %v3786_v0 = vld [vmem:[%s4879_s20 + $0x8] sm:$0xff]  ;;  %v3785_v38 = vld [vmem:[%s4879_s20] sm:$0xff]  ;;  %s5589_s20 = scalar_lea.vmem [#allocation11], %s4853_s26 }
 0x847   : > { %v3982_v39 = vpop.eup %3981 }
 0x848   : > { %v2610_v40 = vpop.xlane.xlu2 %2609  ;;  %v2626_v41 = vsel %vm2556_vm15, %v3982_v39, 0.0 }
 0x849   : > { %3983 = vrcp.f32 %v2610_v40  ;;  %2627 = vadd.xlane.f32.xlu2 %v2626_v41 }
 0x84f   : > { %v3984_v44 = vpop.eup %3983  ;;  %v2746_v36 = vpop.permute.xlu0 %2745 }
 0x850   : > { %v2638_v45 = vmul.f32 %v3984_v44, %v5348_v61  ;;  %v2751_v43 = vsel %vm2665_vm0, %v2746_v36, 0 }
 0x851   : > { %2760 = vmatpush.bf16.msra.mxu0 %v2751_v43 }
 0x852   : > { %v2646_v47 = vpack.c.bf16 %v2638_v45, %v2638_v45 }
 0x854   : > { %3714 = vmatmul.msk.bf16.vlgmr.msrb.gmra.mxu2 %vm2556_vm15, %v2646_v47 }
 0x85a   : > { %2801 = vrot.lane.b32.xlu1 %v5320_v59, %s4511_s2 }
 0x861   : > { %2773 = vrot.lane.b32.xlu2 %v5315_v57, %s4511_s2  ;;  %s5591_s2 = scalar_lea.vmem [#allocation22], %s4853_s26 }
 0x86e   : > { %v2613_v49 = vpop.xlane.xlu1 %2612 }
 0x86f   : > { %3985 = vrcp.f32 %v2613_v49 }
 0x875   : > { %v3986_v50 = vpop.eup %3985 }
 0x876   : > { %v2639_v51 = vmul.f32 %v3986_v50, %v5353_v1 }
 0x878   : > { %v2647_v52 = vpack.c.bf16 %v2639_v51, %v2639_v51 }
 0x87a   : > { %3715 = vmatmul.msk.bf16.vlgmr.msra.gmra.mxu3 %vm2556_vm15, %v2647_v52 }
 0x880   : > { %v2619_v54 = vpop.xlane.xlu0 %2618 }
 0x887   : > { %v2625_v53 = vpop.xlane.xlu2 %2624 }
 0x888   : > { %3987 = vrcp.f32 %v2625_v53 }
 0x88e   : > { %v3988_v55 = vpop.eup %3987 }
 0x88f   : > { %v2616_v56 = vpop.xlane.xlu2 %2615  ;;  %v2643_v58 = vmul.f32 %v3988_v55, %v3974_v23 }
 0x890   : > { %3989 = vrcp.f32 %v2616_v56 }
 0x891   : > { %v2651_v61 = vpack.c.bf16 %v2643_v58, %v2643_v58  ;;  %3991 = vrcp.f32 %v2619_v54  ;;  %v3920_v58 = vld [vmem:[%s5589_s20] ss:$0 sm:$0xff] }
 0x893   : > { %v2830_v60 = vpop.permute.xlu0 %2829 }
 0x894   : > { %v2835_v59 = vsel %vm2665_vm0, %v2830_v60, 0 }
 0x895   : > { %2844 = vmatpush.bf16.msrb.mxu3 %v2835_v59 }
 0x896   : > { %v3990_v57 = vpop.eup %3989 }
 0x897   : > { %v2640_v62 = vmul.f32 %v3990_v57, %v3976_v46  ;;  %v3992_v4 = vpop.eup %3991 }
 0x898   : > { %3719 = vmatmul.msk.bf16.vlgmr.msrb.gmra.mxu3 %vm2556_vm15, %v2651_v61  ;;  %v2641_v11 = vmul.f32 %v3992_v4, %v5358_v7 }
 0x899   : > { %v2648_v63 = vpack.c.bf16 %v2640_v62, %v2640_v62 }
 0x89a   : > { %v2649_v14 = vpack.c.bf16 %v2641_v11, %v2641_v11 }
 0x89b   : > { %3716 = vmatmul.msk.bf16.vlgmr.msra.gmra.mxu0 %vm2556_vm15, %v2648_v63  ;;  %v2858_v2 = vpop.permute.xlu0 %2857 }
 0x89c   : > { %v2863_v3 = vsel %vm2665_vm0, %v2858_v2, 0 }
 0x89d   : > { %2872 = vmatpush.bf16.msrb.mxu0 %v2863_v3 }
 0x8b4   : > { %v2622_v8 = vpop.xlane.xlu1 %2621 }
 0x8b5   : > { %v2678_v1 = vpop.f32.mrf.mxu1 }
 0x8bc   : > { %v2628_v6 = vpop.xlane.xlu2 %2627 }
 0x8bd   : > { %3993 = vrcp.f32 %v2628_v6  ;;  %v2680_v28 = vpop.f32.mrf.mxu1 }
 0x8be   : > { %3995 = vrcp.f32 %v2622_v8 }
 0x8c3   : > { %v3994_v9 = vpop.eup %3993 }
 0x8c4   : > { %v2644_v10 = vmul.f32 %v3994_v9, %v3982_v39  ;;  %v2774_v12 = vpop.permute.xlu2 %2773  ;;  %v3996_v17 = vpop.eup %3995 }
 0x8c5   : > { %v2779_v13 = vsel %vm2665_vm0, %v2774_v12, 0  ;;  %v2642_v18 = vmul.f32 %v3996_v17, %v5371_v42 }
 0x8c6   : > { %v2652_v5 = vpack.c.bf16 %v2644_v10, %v2644_v10  ;;  %2788 = vmatpush.bf16.msra.mxu1 %v2779_v13 }
 0x8c7   : > { %v2650_v23 = vpack.c.bf16 %v2642_v18, %v2642_v18 }
 0x8c8   : > { %3720 = vmatmul.msk.bf16.vlgmr.msrb.gmra.mxu0 %vm2556_vm15, %v2652_v5 }
 0x8c9   : > { %3717 = vmatmul.msk.bf16.vlgmr.msra.gmra.mxu1 %vm2556_vm15, %v2649_v14  ;;  %v3788_v14 = vld [vmem:[%s4887_s29 + $0x8] sm:$0xff] }
 0x8ca   : > { %2938 = vmatpush.bf16.msrb.mxu1 %v3786_v0 }
 0x8cc   : > { %v2802_v21 = vpop.permute.xlu1 %2801 }
 0x8cd   : > { %v2807_v22 = vsel %vm2665_vm0, %v2802_v21, 0  ;;  %v3787_v21 = vld [vmem:[%s4887_s29] sm:$0xff]  ;;  %s5590_s29 = scalar_lea.vmem [#allocation20], %s4853_s26 }
 0x8ce   : > { %2816 = vmatpush.bf16.msra.mxu2 %v2807_v22  ;;  %2939 = vmatpush.bf16.msrb.mxu1 %v3785_v38 }
 0x8d1   : > { %3718 = vmatmul.msk.bf16.vlgmr.msra.gmra.mxu2 %vm2556_vm15, %v2650_v23 }
 0x8d2   : > { %3040 = vmatpush.bf16.msrb.mxu2 %v3788_v14 }
 0x8d6   : > { %3041 = vmatpush.bf16.msrb.mxu2 %v3787_v21 }
 0x8d7   : > { %v2706_v7 = vpop.f32.mrf.mxu2 }
 0x8df   : > { %v2708_v25 = vpop.f32.mrf.mxu2 }
 0x8fd   : > { %v2734_v46 = vpop.f32.mrf.mxu3 }
 0x905   : > { %v2736_v48 = vpop.f32.mrf.mxu3 }
 0x918   : > { %v2762_v15 = vpop.f32.mrf.mxu0 }
 0x919   : > { %v3899_v24 = vpack.i.bf16 %v2762_v15, %v2734_v46 }
 0x91b   : > { %3900 = vrot.lane.b32.xlu1 %v3899_v24, %s4513_s5  ;;  %v2846_v26 = vpop.f32.mrf.mxu3  ;;  %s5592_s5 = scalar_lea.vmem [#allocation14], %s4853_s26 }
 0x920   : > { %v2764_v27 = vpop.f32.mrf.mxu0 }
 0x923   : > { %v2848_v30 = vpop.f32.mrf.mxu3 }
 0x945   : > { %v2874_v31 = vpop.f32.mrf.mxu0 }
 0x946   : > { %v3909_v29 = vpack.i.bf16 %v2874_v31, %v2846_v26  ;;  %v2790_v32 = vpop.f32.mrf.mxu1 }
 0x948   : > { %3910 = vrot.lane.b32.xlu0 %v3909_v29, %s4514_s24  ;;  %s5593_s24 = scalar_lea.vmem [#allocation16], %s4853_s26 }
 0x94d   : > { %v2876_v33 = vpop.f32.mrf.mxu0 }
 0x94e   : > { %v2792_v34 = vpop.f32.mrf.mxu1 }
 0x954   : > { %v2818_v35 = vpop.f32.mrf.mxu2 }
 0x955   : > { %v3904_v37 = vpack.i.bf16 %v2818_v35, %v2790_v32 }
 0x957   : > { %3905 = vrot.lane.b32.xlu2 %v3904_v37, %s4515_s30  ;;  %s5595_s30 = sld [smem:[#allocation58_spill]] (!%p3756_p0) }
 0x95c   : > { %v2820_v42 = vpop.f32.mrf.mxu2 }
 0x95d   : > { %v3921_v42 = vld [vmem:[%s5590_s29] ss:$0 sm:$0xff] }
 0x98d   : > { %v3901_v39 = vpop.permute.xlu1 %3900 }
 0x98e   : > { %v3903_v41 = vunpack.i.h.bf16 %v3901_v39  ;;  %v3902_v44 = vunpack.i.l.bf16 %v3901_v39 }
 0x990   : > { %v2903_v47 = vsel %vm1577_vm2, %v2706_v7, %v3903_v41  ;;  %v2902_v49 = vsel %vm1577_vm2, %v2678_v1, %v3902_v44 }
 0x9b1   : > { %v3906_v40 = vpop.permute.xlu2 %3905 }
 0x9b2   : > { %v3908_v36 = vunpack.i.h.bf16 %v3906_v40  ;;  %v3907_v45 = vunpack.i.l.bf16 %v3906_v40 }
 0x9b4   : > { %v2905_v52 = vsel %vm2049_vm4, %v2903_v47, %v3908_v36  ;;  %v2904_v53 = vsel %vm2049_vm4, %v2902_v49, %v3907_v45  ;;  %v3922_v36 = vld [vmem:[%s5591_s2] ss:$0 sm:$0xff] }
 0x9ba   : > { %v3911_v43 = vpop.permute.xlu0 %3910 }
 0x9bb   : > { %v3913_v50 = vunpack.i.h.bf16 %v3911_v43  ;;  %v3912_v51 = vunpack.i.l.bf16 %v3911_v43 }
 0x9bd   : > { %v2907_v54 = vsel %vm2052_vm5, %v2905_v52, %v3913_v50  ;;  %v2906_v55 = vsel %vm2052_vm5, %v2904_v53, %v3912_v51  ;;  %v3792_v50 = vld [vmem:[%s4939_s15 + $0x18] sm:$0xff]  ;;  %v3791_v51 = vld [vmem:[%s4939_s15 + $0x10] sm:$0xff]  ;;  %v3790_v52 = vld [vmem:[%s4939_s15 + $0x8] sm:$0xff] }
 0x9be   : > { %v2908_v56 = vpack.c.bf16 %v2907_v54, %v2906_v55  ;;  %3095 = vmatpush.bf16.msra.mxu3 %v3792_v50  ;;  %v3789_v53 = vld [vmem:[%s4939_s15] sm:$0xff]  ;;  %s5594_s15 = scalar_lea.vmem [#allocation23], %s4853_s26 }
 0x9bf   : > { %v3923_v55 = vld [vmem:[%s5592_s5] ss:$0 sm:$0xff] }
 0x9c0   : > { %3729 = vmatmul.msk.bf16.vlgmr.msrb.gmra.mxu1 %vm1521_vm1, %v2908_v56 }
 0x9c2   : > { %3096 = vmatpush.bf16.msra.mxu3 %v3791_v51 }
 0x9c6   : > { %3097 = vmatpush.bf16.msra.mxu3 %v3790_v52 }
 0x9ca   : > { %3098 = vmatpush.bf16.msra.mxu3 %v3789_v53 }
 0xa3d   : > { %v2941_v60 = vpop.f32.mrf.mxu1 }
 0xa3e   : > { %v2942_v59 = vadd.f32 %v3920_v58, %v2941_v60 }
 0xa40   : > { %v2948_v57 = vadd.f32 %v2942_v59, %v5188_v19 }
 0xa42   : > { %v2950_v61 = vsel %vm1521_vm1, %v2948_v57, 0.0  ;;  %v2958_v62 = vmul.f32 %v2948_v57, %v2948_v57 }
 0xa43   : > { %2951 = vadd.xlane.f32.xlu1 %v2950_v61 }
 0xa44   : > { %v2960_v63 = vsel %vm1521_vm1, %v2958_v62, 0.0  ;;  %v3924_v62 = vld [vmem:[%s5593_s24] ss:$0 sm:$0xff] }
 0xa45   : > { %v2943_v2 = vpop.f32.mrf.mxu1  ;;  %2961 = vadd.xlane.f32.xlu0 %v2960_v63 }
 0xa46   : > { %v2944_v3 = vadd.f32 %v3920_v58, %v2943_v2 }
 0xa48   : > { %v2949_v1 = vadd.f32 %v2944_v3, %v5190_v20 }
 0xa4a   : > { %v2953_v6 = vsel %vm1521_vm1, %v2949_v1, 0.0  ;;  %v2959_v28 = vmul.f32 %v2949_v1, %v2949_v1 }
 0xa4b   : > { %2954 = vadd.xlane.f32.xlu2 %v2953_v6 }
 0xa4c   : > { %v2963_v8 = vsel %vm1521_vm1, %v2959_v28, 0.0 }
 0xa4d   : > { %2964 = vadd.xlane.f32.xlu1 %v2963_v8 }
 0xab6   : > { %v2952_v19 = vpop.xlane.xlu1 %2951 }
 0xab7   : > { %v2956_v4 = vmul.f32 %v2952_v19, %v5123_v16 }
 0xab8   : > { %v2962_v9 = vpop.xlane.xlu0 %2961 }
 0xab9   : > { %v2968_v11 = vmul.f32 %v2956_v4, %v2956_v4  ;;  %v2966_v10 = vmul.f32 %v2962_v9, %v5123_v16  ;;  %v2974_v35 = vsub.f32 %v2948_v57, %v2956_v4 }
 0xabb   : > { %v2970_v12 = vsub.f32 %v2966_v10, %v2968_v11 }
 0xabd   : > { %v2972_v13 = vmax.f32 %v2970_v12, 0.0 }
 0xabe   : > { %v2955_v5 = vpop.xlane.xlu2 %2954 }
 0xabf   : > { %v2976_v20 = vadd.f32 1e-05, %v2972_v13  ;;  %v2957_v17 = vmul.f32 %v2955_v5, %v5123_v16 }
 0xac0   : > { %v2965_v18 = vpop.xlane.xlu1 %2964 }
 0xac1   : > { %3997 = vrsqrt.f32 %v2976_v20  ;;  %v2969_v22 = vmul.f32 %v2957_v17, %v2957_v17  ;;  %v2967_v23 = vmul.f32 %v2965_v18, %v5123_v16  ;;  %vm2984_vm3 = vweird.f32 %v2976_v20 }
 0xac2   : > { %v2975_v39 = vsub.f32 %v2949_v1, %v2957_v17 }
 0xac3   : > { %v2971_v7 = vsub.f32 %v2967_v23, %v2969_v22 }
 0xac5   : > { %v2973_v25 = vmax.f32 %v2971_v7, 0.0 }
 0xac7   : > { %v3998_v46 = vpop.eup %3997  ;;  %v2977_v15 = vadd.f32 1e-05, %v2973_v25 }
 0xac8   : > { %v2979_v48 = vmul.f32 %v3998_v46, %v2976_v20  ;;  %vm2985_vm2 = vweird.f32 %v3998_v46 }
 0xac9   : > { %3999 = vrsqrt.f32 %v2977_v15  ;;  %vm2986_vm4 = vmor %vm2984_vm3, %vm2985_vm2  ;;  %vm2994_vm6 = vweird.f32 %v2977_v15 }
 0xaca   : > { %v2980_v24 = vmul.f32 %v3998_v46, %v2979_v48 }
 0xacc   : > { %v2981_v26 = vmul.f32 0.5, %v2980_v24 }
 0xace   : > { %v2982_v27 = vsub.f32 1.5, %v2981_v26 }
 0xacf   : > { %v4000_v30 = vpop.eup %3999 }
 0xad0   : > { %v2983_v31 = vmul.f32 %v3998_v46, %v2982_v27  ;;  %v2989_v29 = vmul.f32 %v4000_v30, %v2977_v15  ;;  %vm2995_vm5 = vweird.f32 %v4000_v30 }
 0xad1   : > { %vm2996_vm7 = vmor %vm2994_vm6, %vm2995_vm5 }
 0xad2   : > { %v2990_v32 = vmul.f32 %v4000_v30, %v2989_v29  ;;  %v2987_v33 = vsel %vm2986_vm4, %v3998_v46, %v2983_v31 }
 0xad3   : > { %v2998_v0 = vmul.f32 %v2987_v33, %v2974_v35  ;;  %v3925_v35 = vld [vmem:[%s5594_s15] ss:$0 sm:$0xff] }
 0xad4   : > { %v2991_v34 = vmul.f32 0.5, %v2990_v32 }
 0xad5   : > { %v3003_v41 = vmul.f32 %v3921_v42, %v2998_v0 }
 0xad6   : > { %v2992_v37 = vsub.f32 1.5, %v2991_v34 }
 0xad7   : > { %v3008_v43 = vadd.f32 %v3922_v36, %v3003_v41 }
 0xad8   : > { %v2993_v38 = vmul.f32 %v4000_v30, %v2992_v37 }
 0xada   : > { %v2997_v40 = vsel %vm2996_vm7, %v4000_v30, %v2993_v38 }
 0xadb   : > { %v2999_v44 = vmul.f32 %v2997_v40, %v2975_v39 }
 0xadd   : > { %v3004_v45 = vmul.f32 %v3921_v42, %v2999_v44  ;;  %v3926_v42 = vld [vmem:[%s1243_s7] ss:$0 sm:$0xff] }
 0xadf   : > { %v3009_v47 = vadd.f32 %v3922_v36, %v3004_v45 }
 0xae1   : > { %v3010_v49 = vpack.c.bf16 %v3009_v47, %v3008_v43 }
 0xae3   : > { %3738 = vmatmul.msk.bf16.vlgmr.msrb.gmra.mxu2 %vm1521_vm1, %v3010_v49 }
 0xb66   : > { %v3043_v54 = vpop.f32.mrf.mxu2 }
 0xb67   : > { %v3044_v56 = vadd.f32 %v3923_v55, %v3043_v54 }
 0xb69   : > { %v3048_v59 = vmax.f32 %v3044_v56, 0.0 }
 0xb6e   : > { %v3045_v58 = vpop.f32.mrf.mxu2 }
 0xb6f   : > { %v3046_v60 = vadd.f32 %v3923_v55, %v3045_v58 }
 0xb71   : > { %v3049_v57 = vmax.f32 %v3046_v60, 0.0 }
 0xb73   : > { %v3050_v61 = vpack.c.bf16 %v3049_v57, %v3048_v59 }
 0xb75   : > { %3755 = vmatmul.msk.bf16.vlgmr.msra.gmra.mxu3 %vm3087_vm8, %v3050_v61 }
 0xbf8   : > { %v3100_v63 = vpop.f32.mrf.mxu3 }
 0xbf9   : > { %v3101_v2 = vadd.f32 %v3924_v62, %v3100_v63 }
 0xbfb   : > { %v3107_v3 = vadd.f32 %v3101_v2, %v3008_v43 }
 0xbfd   : > { %v3109_v1 = vsel %vm1521_vm1, %v3107_v3, 0.0  ;;  %v3117_v6 = vmul.f32 %v3107_v3, %v3107_v3 }
 0xbfe   : > { %3110 = vadd.xlane.f32.xlu2 %v3109_v1 }
 0xbff   : > { %v3119_v28 = vsel %vm1521_vm1, %v3117_v6, 0.0 }
 0xc00   : > { %v3102_v8 = vpop.f32.mrf.mxu3  ;;  %3120 = vadd.xlane.f32.xlu1 %v3119_v28 }
 0xc01   : > { %v3103_v19 = vadd.f32 %v3924_v62, %v3102_v8 }
 0xc03   : > { %v3108_v4 = vadd.f32 %v3103_v19, %v3009_v47 }
 0xc05   : > { %v3112_v9 = vsel %vm1521_vm1, %v3108_v4, 0.0  ;;  %v3118_v11 = vmul.f32 %v3108_v4, %v3108_v4 }
 0xc06   : > { %3113 = vadd.xlane.f32.xlu0 %v3112_v9 }
 0xc07   : > { %v3122_v10 = vsel %vm1521_vm1, %v3118_v11, 0.0 }
 0xc08   : > { %3123 = vadd.xlane.f32.xlu2 %v3122_v10 }
 0xc71   : > { %v3111_v12 = vpop.xlane.xlu2 %3110 }
 0xc72   : > { %v3115_v13 = vmul.f32 %v3111_v12, %v5123_v16 }
 0xc73   : > { %v3121_v5 = vpop.xlane.xlu1 %3120 }
 0xc74   : > { %v3127_v14 = vmul.f32 %v3115_v13, %v3115_v13  ;;  %v3125_v20 = vmul.f32 %v3121_v5, %v5123_v16  ;;  %v3133_v34 = vsub.f32 %v3107_v3, %v3115_v13 }
 0xc76   : > { %v3129_v17 = vsub.f32 %v3125_v20, %v3127_v14 }
 0xc78   : > { %v3131_v18 = vmax.f32 %v3129_v17, 0.0 }
 0xc79   : > { %v3114_v21 = vpop.xlane.xlu0 %3113 }
 0xc7a   : > { %v3135_v22 = vadd.f32 1e-05, %v3131_v18  ;;  %v3116_v23 = vmul.f32 %v3114_v21, %v5123_v16 }
 0xc7b   : > { %v3124_v7 = vpop.xlane.xlu2 %3123 }
 0xc7c   : > { %4001 = vrsqrt.f32 %v3135_v22  ;;  %v3128_v25 = vmul.f32 %v3116_v23, %v3116_v23  ;;  %v3126_v46 = vmul.f32 %v3124_v7, %v5123_v16  ;;  %vm3143_vm10 = vweird.f32 %v3135_v22 }
 0xc7d   : > { %v3134_v45 = vsub.f32 %v3108_v4, %v3116_v23 }
 0xc7e   : > { %v3130_v48 = vsub.f32 %v3126_v46, %v3128_v25 }
 0xc80   : > { %v3132_v15 = vmax.f32 %v3130_v48, 0.0 }
 0xc82   : > { %v4002_v24 = vpop.eup %4001  ;;  %v3136_v27 = vadd.f32 1e-05, %v3132_v15 }
 0xc83   : > { %v3138_v26 = vmul.f32 %v4002_v24, %v3135_v22  ;;  %vm3144_vm9 = vweird.f32 %v4002_v24 }
 0xc84   : > { %4003 = vrsqrt.f32 %v3136_v27  ;;  %vm3145_vm11 = vmor %vm3143_vm10, %vm3144_vm9  ;;  %vm3153_vm13 = vweird.f32 %v3136_v27 }
 0xc85   : > { %v3139_v30 = vmul.f32 %v4002_v24, %v3138_v26 }
 0xc87   : > { %v3140_v31 = vmul.f32 0.5, %v3139_v30 }
 0xc89   : > { %v3141_v29 = vsub.f32 1.5, %v3140_v31 }
 0xc8a   : > { %v4004_v32 = vpop.eup %4003 }
 0xc8b   : > { %v3142_v33 = vmul.f32 %v4002_v24, %v3141_v29  ;;  %v3148_v37 = vmul.f32 %v4004_v32, %v3136_v27  ;;  %vm3154_vm12 = vweird.f32 %v4004_v32 }
 0xc8c   : > { %vm3155_vm14 = vmor %vm3153_vm13, %vm3154_vm12 }
 0xc8d   : > { %v3146_v16 = vsel %vm3145_vm11, %v4002_v24, %v3142_v33  ;;  %v3149_v38 = vmul.f32 %v4004_v32, %v3148_v37 }
 0xc8e   : > { %v3157_v0 = vmul.f32 %v3146_v16, %v3133_v34 }
 0xc8f   : > { %v3150_v40 = vmul.f32 0.5, %v3149_v38 }
 0xc90   : > { %v3162_v39 = vmul.f32 %v3925_v35, %v3157_v0 }
 0xc91   : > { %v3151_v44 = vsub.f32 1.5, %v3150_v40 }
 0xc92   : > { %v3167_v41 = vadd.f32 %v3926_v42, %v3162_v39 }
 0xc93   : > { %v3152_v36 = vmul.f32 %v4004_v32, %v3151_v44 }
 0xc94   : > { %3169 = vst.msk [vmem:[#allocation2] sm:$0xff] %vm1521_vm1, %v3167_v41 }
 0xc95   : > { %v3156_v43 = vsel %vm3155_vm14, %v4004_v32, %v3152_v36 }
 0xc96   : > { %v3158_v47 = vmul.f32 %v3156_v43, %v3134_v45 }
 0xc98   : > { %v3163_v49 = vmul.f32 %v3925_v35, %v3158_v47  ;;  %3174 = sbr.rel (%p3756_p0) target bundleno = 3374 (0xd2e), region = 192 }
 0xc9a   : > { %v3168_v50 = vadd.f32 %v3926_v42, %v3163_v49 }
 0xc9c   : > { %3170 = vst.msk [vmem:[#allocation2 + $0x8] sm:$0xff] %vm1521_vm1, %v3168_v50 }
 0xc9d   : > { %v3794_v51 = vld [vmem:[%s5595_s30 + $0x8] sm:$0xff]  ;;  %v3793_v52 = vld [vmem:[%s5595_s30] sm:$0xff]  ;;  %v3175_v53 = vpack.c.bf16 %v3168_v50, %v3167_v41 }
 0xc9e   : > { %3205 = vmatpush.bf16.msra.mxu0 %v3794_v51  ;;  %v4005_v54 = vld [vmem:[%s5596_s1] ss:$0 sm:$0xff] }
 0xca2   : > { %3206 = vmatpush.bf16.msra.mxu0 %v3793_v52 }
 0xca5   : > { %3765 = vmatmul.msk.bf16.vlgmr.msra.gmra.mxu0 %vm1521_vm1, %v3175_v53 }
 0xd22   : > { %v3208_v55 = vpop.f32.mrf.mxu0 }
 0xd23   : > { %v3209_v56 = vadd.f32 %v4005_v54, %v3208_v55 }
 0xd25   : > { %3213 = vst [vmem:[%s5597_s0] sm:$0xff] %v3209_v56 }
 0xd2a   : > { %v3210_v58 = vpop.f32.mrf.mxu0 }
 0xd2b   : > { %v3211_v60 = vadd.f32 %v4005_v54, %v3210_v58 }
 0xd2d   : > { %3214 = vst [vmem:[%s5597_s0 + $0x8] sm:$0xff] %v3211_v60 }
 0xd2e PF: > { %s60_s4 = sadd.s32 1, %s4504_s4   ;;  %s5598_s6 = sld [smem:[#allocation34_spill]] }
 0xd2f   : > { %p57_p1 = scmp.ge.s32.totalorder %s60_s4, 4   ;;  %s5599_s7 = sld [smem:[#allocation36_spill]] }
 0xd30   : > { %s5600_s17 = sld [smem:[#allocation35_spill]]  ;;  %s5601_s27 = smov %s4488_s3 }
 0xd31   : > { %s5603_s28 = smov %s4500_s8 }
 0xd32   :  { %59 = sbr.rel (!%p57_p1) target bundleno = 43 (0x2b), region = 398 }
 0xd34   : > { %s5602_s3 = smov %s5598_s6 }
 0xd36   : > { %s5604_s8 = smov %s5600_s17 }
 0xd37   :  { %3237 = vsyncpa [#allocation4], 1 }
 0xd38   :  { %3239 = vsyncpa [#allocation4 + $0x1], 1 }
 0xd39   :  { %3240 = vsyncpa [#allocation6], 1 }
 0xd3a   :  { %3242 = vsyncpa [#allocation6 + $0x1], 1 }
 0xd3b   :  { %3243 = vsyncpa [#allocation9], 1 }
 0xd3c   :  { %3245 = vsyncpa [#allocation9 + $0x1], 1 }
 0xd3d   :  { %3246 = vsyncpa [#allocation12], 1 }
 0xd3e   :  { %3248 = vsyncpa [#allocation12 + $0x1], 1 }
 0xd3f   :  { %3249 = vsyncpa [#allocation15], 1 }
 0xd40   :  { %3251 = vsyncpa [#allocation15 + $0x1], 1 }
 0xd41   :  { %3252 = vsyncpa [#allocation18], 1 }
 0xd42   :  { %3254 = vsyncpa [#allocation18 + $0x1], 1 }
 0xd43   :  { %3255 = vsyncpa [#allocation21], 1 }
 0xd44   :  { %3257 = vsyncpa [#allocation21 + $0x1], 1 }
 0xd45   :  { %3258 = vsyncpa [#allocation24], 1 }
 0xd46   :  { %3260 = vsyncpa [#allocation24 + $0x1], 1 }

</bundles_post_ra>
